<compile_context>
chip_gen: v6e
topology: v6e:2x2x1
jax: 0.10.0
libtpu: 0.0.40
codegen_flags: <defaults>
</compile_context>

<pallas_src>
import functools

import jax
import jax.numpy as jnp
from jax.experimental import pallas as pl
from jax.experimental.pallas import tpu as pltpu

_HIGHEST = jax.lax.Precision.HIGHEST


def _fold_max(x, num, width):
    """x: (rows, num*width). Returns (rows, width): per-lane max over the `num` groups."""
    cur, n = x, num
    while n > 1:
        half = n // 2
        m = jnp.maximum(cur[:, :half * width], cur[:, half * width:2 * half * width])
        if n % 2:                                     # fold the leftover group into group 0
            last = cur[:, (n - 1) * width:n * width]
            head = jnp.maximum(m[:, :width], last)
            m = head if half == 1 else jnp.concatenate([head, m[:, width:]], axis=-1)
        cur, n = m, half
    return cur


def _ca_kernel(x_ref, poolT_ref, perm_ref, expand_ref, wsq_ref, wex1_ref, wex2_ref,
               bC_ref, bCr_ref, o_ref, *, H, W, C, Cr, nb):
    f32 = jnp.float32
    R, Rr = nb * C, nb * Cr

    def dot(a, b):
        return jnp.dot(a, b, precision=_HIGHEST, preferred_element_type=f32)

    xf = x_ref[...].astype(f32)                          # (R, H*W) lane-dense slab

    # ---- avg pools on the MXU: one matmul gives both directional sums ----
    sums = dot(xf, poolT_ref[...])                       # (R, H+W)
    avg_h = sums[:, :H] * (1.0 / W)                      # mean over W   (R, H)
    avg_w = sums[:, H:] * (1.0 / H)                      # mean over H   (R, W)

    # ---- max pools: contiguous halving folds (no per-row scatter / XLU reduces) ----
    max_w = _fold_max(xf, H, W)                          # max over H    (R, W)
    xT = dot(xf, perm_ref[...])                          # exact lane transpose: (w,h) order
    max_h = _fold_max(xT, W, H)                          # max over W    (R, H)

    # ---- squeeze: conv_1x1_{h,w} -> conv_1x1 -> BN (folded) -> ReLU, batched ----
    # TODO(synk): PyTorch default is train-mode BN (batch statistics); eval-mode
    #             running-stats BN is what is folded/implemented here.
    wsq = wsq_ref[...]                                   # (R, 4R) = [Wh_bd | Ww_bd]
    b1 = bC_ref[:, 0:1]
    y_h = jnp.maximum(dot(wsq[:, :2 * R], jnp.concatenate([avg_h, max_h], axis=0)) + b1, 0.0)
    y_w = jnp.maximum(dot(wsq[:, 2 * R:], jnp.concatenate([avg_w, max_w], axis=0)) + b1, 0.0)

    # ---- excitation MLPs F_h / F_w (conv+BN folded, ReLU, conv+bias), batched ----
    wex1, wex2 = wex1_ref[...], wex2_ref[...]            # (Rr, 2R), (R, 2Rr)
    u_h = jnp.maximum(dot(wex1[:, :R], y_h) + bCr_ref[:, 0:1], 0.0)     # (Rr, H)
    u_w = jnp.maximum(dot(wex1[:, R:], y_w) + bCr_ref[:, 1:2], 0.0)     # (Rr, W)
    t_h = dot(wex2[:, :Rr], u_h) + bC_ref[:, 1:2]                       # (R, H)
    t_w = dot(wex2[:, Rr:], u_w) + bC_ref[:, 2:3]                       # (R, W)
    s_h = 1.0 / (1.0 + jnp.exp(-t_h))
    s_w = 1.0 / (1.0 + jnp.exp(-t_w))

    # ---- expand gates to (R, H*W) with exact 0/1 matmuls, apply, store lane-dense ----
    expand = expand_ref[...]                             # (H+W, HW) = [eh; ew]
    gate = dot(s_h, expand[:H, :]) * dot(s_w, expand[H:, :])
    o_ref[...] = (xf * gate).astype(o_ref.dtype)


def _pick_block_n(n, c, hw, itemsize, budget=4 << 20):
    """Images per grid step: large lane-dense blocks, exact divisor of N, rows a multiple
    of 8 (or whole array), preferring an even number of >=2 grid steps (v7x megacore)."""
    per_img = max(c * hw * itemsize, 1)
    cap = max(1, min(n, max(1, 512 // max(c, 1)), budget // per_img))
    cands = [nb for nb in range(1, cap + 1)
             if n % nb == 0 and ((nb * c) % 8 == 0 or nb == n)]
    if not cands:
        return n
    even = [nb for nb in cands if (n // nb) >= 2 and (n // nb) % 2 == 0]
    multi = [nb for nb in cands if (n // nb) >= 2]
    return max(even or multi or cands)


def ca_layer(x, p, *, eps=1e-5):
    """x: (N, C, H, W).  p: parameter dict (see __main__).  Eval-mode BatchNorm."""
    N, C, H, W = x.shape
    HW = H * W
    f32 = jnp.float32
    mm = functools.partial(jnp.matmul, precision=_HIGHEST)

    Cr = p['fh_w1'].shape[0]
    nb = _pick_block_n(N, C, HW, x.dtype.itemsize)
    R, Rr = nb * C, nb * Cr

    # ---- host-side constant folding: BN into convs, conv_1x1 into conv_1x1_{h,w} ----
    s1 = p['bn1_g'] * jax.lax.rsqrt(p['bn1_v'] + eps)
    w1e = p['w1'] * s1[:, None]
    b1e = p['bn1_b'] - p['bn1_m'] * s1                            # (C,)
    wh_f = mm(w1e, p['wh'])                                       # (C, 2C)  [avg | max]
    ww_f = mm(w1e, p['ww'])                                       # (C, 2C)

    sh = p['fh_bn_g'] * jax.lax.rsqrt(p['fh_bn_v'] + eps)
    fh1e = p['fh_w1'] * sh[:, None]
    bh1e = (p['fh_b1'] - p['fh_bn_m']) * sh + p['fh_bn_b']
    sw = p['fw_bn_g'] * jax.lax.rsqrt(p['fw_bn_v'] + eps)
    fw1e = p['fw_w1'] * sw[:, None]
    bw1e = (p['fw_b1'] - p['fw_bn_m']) * sw + p['fw_bn_b']

    # ---- batch the per-image 1x1 convs across the block via block-diagonal weights ----
    eye = jnp.eye(nb, dtype=f32)
    bd = lambda w: jnp.kron(eye, w.astype(f32))
    col = lambda v: jnp.tile(v.astype(f32), nb)                   # per-channel -> per-row
    wsq = jnp.concatenate([bd(wh_f[:, :C]), bd(wh_f[:, C:]),
                           bd(ww_f[:, :C]), bd(ww_f[:, C:])], axis=1)      # (R, 4R)
    wex1 = jnp.concatenate([bd(fh1e), bd(fw1e)], axis=1)                   # (Rr, 2R)
    wex2 = jnp.concatenate([bd(p['fh_w2']), bd(p['fw_w2'])], axis=1)       # (R, 2Rr)
    bC = jnp.stack([col(b1e), col(p['fh_b2']), col(p['fw_b2'])], axis=1)   # (R, 3)
    bCr = jnp.stack([col(bh1e), col(bw1e)], axis=1)                        # (Rr, 2)

    # ---- pooling / lane-transpose / gate-expansion 0/1 matrices ----
    lane = jnp.arange(HW, dtype=jnp.int32)
    hid, wid = lane // W, lane % W
    ehT = (hid[:, None] == jnp.arange(H, dtype=jnp.int32)[None, :]).astype(f32)   # (HW, H)
    ewT = (wid[:, None] == jnp.arange(W, dtype=jnp.int32)[None, :]).astype(f32)   # (HW, W)
    poolT = jnp.concatenate([ehT, ewT], axis=1)                                   # (HW, H+W)
    perm = ((wid[:, None] * H + hid[:, None]) == lane[None, :]).astype(f32)       # (HW, HW)
    expand = jnp.concatenate([ehT.T, ewT.T], axis=0)                              # (H+W, HW)

    consts = [poolT, perm, expand, wsq, wex1, wex2, bC, bCr]
    consts = [c.astype(f32) for c in consts]

    block_bytes = R * HW * x.dtype.itemsize
    const_bytes = sum(int(c.size) * c.dtype.itemsize for c in consts)
    est = 4 * block_bytes + 2 * const_bytes + (8 << 20)
    vmem_limit = int(min(48 << 20, max(32 << 20, est)))

    x2 = x.reshape(N * C, HW)                                     # lane-dense slab layout
    x_spec = pl.BlockSpec((R, HW), lambda n: (n, 0))
    const_specs = [pl.BlockSpec(c.shape, lambda n: (0, 0)) for c in consts]

    out = pl.pallas_call(
        functools.partial(_ca_kernel, H=H, W=W, C=C, Cr=Cr, nb=nb),
        out_shape=jax.ShapeDtypeStruct((N * C, HW), x.dtype),
        grid=(N // nb,),
        in_specs=[x_spec] + const_specs,
        out_specs=x_spec,
        compiler_params=pltpu.CompilerParams(
            dimension_semantics=("parallel",),
            vmem_limit_bytes=vmem_limit),
    )(x2, *consts)
    return out.reshape(N, C, H, W)


def _reference(x, p, eps=1e-5):
    """Pure-JAX reference mirroring the PyTorch forward (eval-mode BN), unfused."""
    N, C, H, W = x.shape
    ein = functools.partial(jnp.einsum, precision=_HIGHEST)

    def bn(z, g, b, m, v):                                        # z: (N, ch, L)
        s = g * jax.lax.rsqrt(v + eps)
        return (z - m[None, :, None]) * s[None, :, None] + b[None, :, None]

    avg_h = jnp.mean(x, axis=3); max_h = jnp.max(x, axis=3)       # (N, C, H)
    avg_w = jnp.mean(x, axis=2); max_w = jnp.max(x, axis=2)       # (N, C, W)
    xh = ein('oc,ncl->nol', p['wh'], jnp.concatenate([avg_h, max_h], axis=1))
    xw = ein('oc,ncl->nol', p['ww'], jnp.concatenate([avg_w, max_w], axis=1))
    xc = jnp.concatenate([xh, xw], axis=2)                        # (N, C, H+W)
    xc = jnp.maximum(bn(ein('oc,ncl->nol', p['w1'], xc),
                        p['bn1_g'], p['bn1_b'], p['bn1_m'], p['bn1_v']), 0.0)
    zh, zw = xc[:, :, :H], xc[:, :, H:]

    def mlp(z, w1, b1, g, bb, m, v, w2, b2):
        z = ein('oc,ncl->nol', w1, z) + b1[None, :, None]
        z = jnp.maximum(bn(z, g, bb, m, v), 0.0)
        return ein('oc,ncl->nol', w2, z) + b2[None, :, None]

    s_h = jax.nn.sigmoid(mlp(zh, p['fh_w1'], p['fh_b1'], p['fh_bn_g'], p['fh_bn_b'],
                             p['fh_bn_m'], p['fh_bn_v'], p['fh_w2'], p['fh_b2']))
    s_w = jax.nn.sigmoid(mlp(zw, p['fw_w1'], p['fw_b1'], p['fw_bn_g'], p['fw_bn_b'],
                             p['fw_bn_m'], p['fw_bn_v'], p['fw_w2'], p['fw_b2']))
    return x * s_h[:, :, :, None] * s_w[:, :, None, :]


if __name__ == "__main__":
    key = jax.random.PRNGKey(0)
    N, C, H, W = 2, 32, 16, 16
    reduction = 16
    Cr = max(C // reduction, 1)

    ks = list(jax.random.split(key, 24))
    nrm = lambda k, shape, s=0.2: s * jax.random.normal(k, shape, jnp.float32)

    x = jax.random.normal(ks[0], (N, C, H, W), jnp.float32)
    p = dict(
        # conv_1x1_h / conv_1x1_w: Conv2d(2C, C, 1, bias=False) -> (C, 2C)
        wh=nrm(ks[1], (C, 2 * C)),
        ww=nrm(ks[2], (C, 2 * C)),
        # conv_1x1: Conv2d(C, C, 1, bias=False) -> (C, C); bn: BatchNorm2d(C)
        w1=nrm(ks[3], (C, C)),
        bn1_g=1.0 + nrm(ks[4], (C,), 0.1), bn1_b=nrm(ks[5], (C,), 0.1),
        bn1_m=nrm(ks[6], (C,), 0.1), bn1_v=jnp.abs(nrm(ks[7], (C,), 1.0)) + 0.5,
        # F_h: Conv2d(C, Cr, 1) + BN(Cr) + ReLU + Conv2d(Cr, C, 1)
        fh_w1=nrm(ks[8], (Cr, C)), fh_b1=nrm(ks[9], (Cr,), 0.1),
        fh_bn_g=1.0 + nrm(ks[10], (Cr,), 0.1), fh_bn_b=nrm(ks[11], (Cr,), 0.1),
        fh_bn_m=nrm(ks[12], (Cr,), 0.1), fh_bn_v=jnp.abs(nrm(ks[13], (Cr,), 1.0)) + 0.5,
        fh_w2=nrm(ks[14], (C, Cr)), fh_b2=nrm(ks[15], (C,), 0.1),
        # F_w: same structure
        fw_w1=nrm(ks[16], (Cr, C)), fw_b1=nrm(ks[17], (Cr,), 0.1),
        fw_bn_g=1.0 + nrm(ks[18], (Cr,), 0.1), fw_bn_b=nrm(ks[19], (Cr,), 0.1),
        fw_bn_m=nrm(ks[20], (Cr,), 0.1), fw_bn_v=jnp.abs(nrm(ks[21], (Cr,), 1.0)) + 0.5,
        fw_w2=nrm(ks[22], (C, Cr)), fw_b2=nrm(ks[23], (C,), 0.1),
    )

    out = jax.block_until_ready(ca_layer(x, p))
    ref = _reference(x, p)
    err = float(jnp.max(jnp.abs(out - ref)))
    assert jnp.allclose(out, ref, atol=1e-4, rtol=1e-4), f"max abs err {err}"
    print("KERNEL_OK")
</pallas_src>

<mosaic_0001>
module attributes {stable_mosaic.version = 11 : i64} {
  func.func @_ca_kernel(%arg0: i32, %arg1: memref<32x256xf32, #tpu.memory_space<vmem>>, %arg2: memref<256x32xf32, #tpu.memory_space<vmem>>, %arg3: memref<256x256xf32, #tpu.memory_space<vmem>>, %arg4: memref<32x256xf32, #tpu.memory_space<vmem>>, %arg5: memref<32x128xf32, #tpu.memory_space<vmem>>, %arg6: memref<2x64xf32, #tpu.memory_space<vmem>>, %arg7: memref<32x4xf32, #tpu.memory_space<vmem>>, %arg8: memref<32x3xf32, #tpu.memory_space<vmem>>, %arg9: memref<2x2xf32, #tpu.memory_space<vmem>>, %arg10: memref<32x256xf32, #tpu.memory_space<vmem>>) attributes {dimension_semantics = [#tpu.dimension_semantics<parallel>], iteration_bounds = array<i64: 2>, scalar_prefetch = 0 : i64, scratch_operands = 0 : i64, tpu.core_type = #tpu.core_type<tc>, window_params = [{transform_indices = @transform_0, window_bounds = array<i64: 32, 256>}, {pipeline_mode = #tpu.pipeline_mode<synchronous>, transform_indices = @transform_1, window_bounds = array<i64: 256, 32>}, {pipeline_mode = #tpu.pipeline_mode<synchronous>, transform_indices = @transform_2, window_bounds = array<i64: 256, 256>}, {pipeline_mode = #tpu.pipeline_mode<synchronous>, transform_indices = @transform_3, window_bounds = array<i64: 32, 256>}, {pipeline_mode = #tpu.pipeline_mode<synchronous>, transform_indices = @transform_4, window_bounds = array<i64: 32, 128>}, {pipeline_mode = #tpu.pipeline_mode<synchronous>, transform_indices = @transform_5, window_bounds = array<i64: 2, 64>}, {pipeline_mode = #tpu.pipeline_mode<synchronous>, transform_indices = @transform_6, window_bounds = array<i64: 32, 4>}, {pipeline_mode = #tpu.pipeline_mode<synchronous>, transform_indices = @transform_7, window_bounds = array<i64: 32, 3>}, {pipeline_mode = #tpu.pipeline_mode<synchronous>, transform_indices = @transform_8, window_bounds = array<i64: 2, 2>}, {transform_indices = @transform_9, window_bounds = array<i64: 32, 256>}]} {
    %c0 = arith.constant 0 : index
    %c0_0 = arith.constant 0 : index
    %0 = vector.load %arg1[%c0, %c0_0] : memref<32x256xf32, #tpu.memory_space<vmem>>, vector<32x256xf32>
    %c0_1 = arith.constant 0 : index
    %c0_2 = arith.constant 0 : index
    %1 = vector.load %arg2[%c0_1, %c0_2] : memref<256x32xf32, #tpu.memory_space<vmem>>, vector<256x32xf32>
    %cst = arith.constant dense<0.000000e+00> : vector<32x32xf32>
    %2 = tpu.matmul %0, %1, %cst {dimension_numbers = #tpu.dot_dimension_numbers<[1], [0], [0], [1], [0, 0, 1, 1], [], []>, precision = #tpu.contract_precision<fp32>} : vector<32x256xf32>, vector<256x32xf32>, vector<32x32xf32> -> vector<32x32xf32>
    %3 = vector.extract_strided_slice %2 {offsets = [0, 0], sizes = [32, 16], strides = [1, 1]} : vector<32x32xf32> to vector<32x16xf32>
    %cst_3 = arith.constant 6.250000e-02 : f32
    %4 = vector.broadcast %cst_3 : f32 to vector<32x16xf32>
    %5 = arith.mulf %3, %4 : vector<32x16xf32>
    %6 = vector.extract_strided_slice %2 {offsets = [0, 16], sizes = [32, 16], strides = [1, 1]} : vector<32x32xf32> to vector<32x16xf32>
    %cst_4 = arith.constant 6.250000e-02 : f32
    %7 = vector.broadcast %cst_4 : f32 to vector<32x16xf32>
    %8 = arith.mulf %6, %7 : vector<32x16xf32>
    %9 = vector.extract_strided_slice %0 {offsets = [0, 0], sizes = [32, 128], strides = [1, 1]} : vector<32x256xf32> to vector<32x128xf32>
    %10 = vector.extract_strided_slice %0 {offsets = [0, 128], sizes = [32, 128], strides = [1, 1]} : vector<32x256xf32> to vector<32x128xf32>
    %11 = arith.maximumf %9, %10 : vector<32x128xf32>
    %12 = vector.extract_strided_slice %11 {offsets = [0, 0], sizes = [32, 64], strides = [1, 1]} : vector<32x128xf32> to vector<32x64xf32>
    %13 = vector.extract_strided_slice %11 {offsets = [0, 64], sizes = [32, 64], strides = [1, 1]} : vector<32x128xf32> to vector<32x64xf32>
    %14 = arith.maximumf %12, %13 : vector<32x64xf32>
    %15 = vector.extract_strided_slice %14 {offsets = [0, 0], sizes = [32, 32], strides = [1, 1]} : vector<32x64xf32> to vector<32x32xf32>
    %16 = vector.extract_strided_slice %14 {offsets = [0, 32], sizes = [32, 32], strides = [1, 1]} : vector<32x64xf32> to vector<32x32xf32>
    %17 = arith.maximumf %15, %16 : vector<32x32xf32>
    %18 = vector.extract_strided_slice %17 {offsets = [0, 0], sizes = [32, 16], strides = [1, 1]} : vector<32x32xf32> to vector<32x16xf32>
    %19 = vector.extract_strided_slice %17 {offsets = [0, 16], sizes = [32, 16], strides = [1, 1]} : vector<32x32xf32> to vector<32x16xf32>
    %20 = arith.maximumf %18, %19 : vector<32x16xf32>
    %c0_5 = arith.constant 0 : index
    %c0_6 = arith.constant 0 : index
    %21 = vector.load %arg3[%c0_5, %c0_6] : memref<256x256xf32, #tpu.memory_space<vmem>>, vector<256x256xf32>
    %cst_7 = arith.constant dense<0.000000e+00> : vector<32x256xf32>
    %22 = tpu.matmul %0, %21, %cst_7 {dimension_numbers = #tpu.dot_dimension_numbers<[1], [0], [0], [1], [0, 0, 1, 1], [], []>, precision = #tpu.contract_precision<fp32>} : vector<32x256xf32>, vector<256x256xf32>, vector<32x256xf32> -> vector<32x256xf32>
    %23 = vector.extract_strided_slice %22 {offsets = [0, 0], sizes = [32, 128], strides = [1, 1]} : vector<32x256xf32> to vector<32x128xf32>
    %24 = vector.extract_strided_slice %22 {offsets = [0, 128], sizes = [32, 128], strides = [1, 1]} : vector<32x256xf32> to vector<32x128xf32>
    %25 = arith.maximumf %23, %24 : vector<32x128xf32>
    %26 = vector.extract_strided_slice %25 {offsets = [0, 0], sizes = [32, 64], strides = [1, 1]} : vector<32x128xf32> to vector<32x64xf32>
    %27 = vector.extract_strided_slice %25 {offsets = [0, 64], sizes = [32, 64], strides = [1, 1]} : vector<32x128xf32> to vector<32x64xf32>
    %28 = arith.maximumf %26, %27 : vector<32x64xf32>
    %29 = vector.extract_strided_slice %28 {offsets = [0, 0], sizes = [32, 32], strides = [1, 1]} : vector<32x64xf32> to vector<32x32xf32>
    %30 = vector.extract_strided_slice %28 {offsets = [0, 32], sizes = [32, 32], strides = [1, 1]} : vector<32x64xf32> to vector<32x32xf32>
    %31 = arith.maximumf %29, %30 : vector<32x32xf32>
    %32 = vector.extract_strided_slice %31 {offsets = [0, 0], sizes = [32, 16], strides = [1, 1]} : vector<32x32xf32> to vector<32x16xf32>
    %33 = vector.extract_strided_slice %31 {offsets = [0, 16], sizes = [32, 16], strides = [1, 1]} : vector<32x32xf32> to vector<32x16xf32>
    %34 = arith.maximumf %32, %33 : vector<32x16xf32>
    %c0_8 = arith.constant 0 : index
    %c0_9 = arith.constant 0 : index
    %35 = vector.load %arg5[%c0_8, %c0_9] : memref<32x128xf32, #tpu.memory_space<vmem>>, vector<32x128xf32>
    %c0_10 = arith.constant 0 : index
    %c0_11 = arith.constant 0 : index
    %36 = vector.load %arg8[%c0_10, %c0_11] : memref<32x3xf32, #tpu.memory_space<vmem>>, vector<32x1xf32>
    %37 = vector.extract_strided_slice %35 {offsets = [0, 0], sizes = [32, 64], strides = [1, 1]} : vector<32x128xf32> to vector<32x64xf32>
    %38 = tpu.concatenate %5, %34 in 0 : vector<32x16xf32>, vector<32x16xf32> -> vector<64x16xf32>
    %cst_12 = arith.constant dense<0.000000e+00> : vector<32x16xf32>
    %39 = tpu.matmul %37, %38, %cst_12 {dimension_numbers = #tpu.dot_dimension_numbers<[1], [0], [0], [1], [0, 0, 1, 1], [], []>, precision = #tpu.contract_precision<fp32>} : vector<32x64xf32>, vector<64x16xf32>, vector<32x16xf32> -> vector<32x16xf32>
    %40 = vector.broadcast %36 : vector<32x1xf32> to vector<32x16xf32>
    %41 = arith.addf %39, %40 : vector<32x16xf32>
    %cst_13 = arith.constant 0.000000e+00 : f32
    %42 = vector.broadcast %cst_13 : f32 to vector<32x16xf32>
    %43 = arith.maximumf %41, %42 : vector<32x16xf32>
    %44 = vector.extract_strided_slice %35 {offsets = [0, 64], sizes = [32, 64], strides = [1, 1]} : vector<32x128xf32> to vector<32x64xf32>
    %45 = tpu.concatenate %8, %20 in 0 : vector<32x16xf32>, vector<32x16xf32> -> vector<64x16xf32>
    %cst_14 = arith.constant dense<0.000000e+00> : vector<32x16xf32>
    %46 = tpu.matmul %44, %45, %cst_14 {dimension_numbers = #tpu.dot_dimension_numbers<[1], [0], [0], [1], [0, 0, 1, 1], [], []>, precision = #tpu.contract_precision<fp32>} : vector<32x64xf32>, vector<64x16xf32>, vector<32x16xf32> -> vector<32x16xf32>
    %47 = vector.broadcast %36 : vector<32x1xf32> to vector<32x16xf32>
    %48 = arith.addf %46, %47 : vector<32x16xf32>
    %cst_15 = arith.constant 0.000000e+00 : f32
    %49 = vector.broadcast %cst_15 : f32 to vector<32x16xf32>
    %50 = arith.maximumf %48, %49 : vector<32x16xf32>
    %c0_16 = arith.constant 0 : index
    %c0_17 = arith.constant 0 : index
    %51 = vector.load %arg6[%c0_16, %c0_17] : memref<2x64xf32, #tpu.memory_space<vmem>>, vector<2x64xf32>
    %c0_18 = arith.constant 0 : index
    %c0_19 = arith.constant 0 : index
    %52 = vector.load %arg7[%c0_18, %c0_19] : memref<32x4xf32, #tpu.memory_space<vmem>>, vector<32x4xf32>
    %53 = vector.extract_strided_slice %51 {offsets = [0, 0], sizes = [2, 32], strides = [1, 1]} : vector<2x64xf32> to vector<2x32xf32>
    %cst_20 = arith.constant dense<0.000000e+00> : vector<2x16xf32>
    %54 = tpu.matmul %53, %43, %cst_20 {dimension_numbers = #tpu.dot_dimension_numbers<[1], [0], [0], [1], [0, 0, 1, 1], [], []>, precision = #tpu.contract_precision<fp32>} : vector<2x32xf32>, vector<32x16xf32>, vector<2x16xf32> -> vector<2x16xf32>
    %c0_21 = arith.constant 0 : index
    %c0_22 = arith.constant 0 : index
    %55 = vector.load %arg9[%c0_21, %c0_22] : memref<2x2xf32, #tpu.memory_space<vmem>>, vector<2x1xf32>
    %56 = vector.broadcast %55 : vector<2x1xf32> to vector<2x16xf32>
    %57 = arith.addf %54, %56 : vector<2x16xf32>
    %cst_23 = arith.constant 0.000000e+00 : f32
    %58 = vector.broadcast %cst_23 : f32 to vector<2x16xf32>
    %59 = arith.maximumf %57, %58 : vector<2x16xf32>
    %60 = vector.extract_strided_slice %51 {offsets = [0, 32], sizes = [2, 32], strides = [1, 1]} : vector<2x64xf32> to vector<2x32xf32>
    %cst_24 = arith.constant dense<0.000000e+00> : vector<2x16xf32>
    %61 = tpu.matmul %60, %50, %cst_24 {dimension_numbers = #tpu.dot_dimension_numbers<[1], [0], [0], [1], [0, 0, 1, 1], [], []>, precision = #tpu.contract_precision<fp32>} : vector<2x32xf32>, vector<32x16xf32>, vector<2x16xf32> -> vector<2x16xf32>
    %c0_25 = arith.constant 0 : index
    %c1 = arith.constant 1 : index
    %62 = vector.load %arg9[%c0_25, %c1] : memref<2x2xf32, #tpu.memory_space<vmem>>, vector<2x1xf32>
    %63 = vector.broadcast %62 : vector<2x1xf32> to vector<2x16xf32>
    %64 = arith.addf %61, %63 : vector<2x16xf32>
    %cst_26 = arith.constant 0.000000e+00 : f32
    %65 = vector.broadcast %cst_26 : f32 to vector<2x16xf32>
    %66 = arith.maximumf %64, %65 : vector<2x16xf32>
    %67 = vector.extract_strided_slice %52 {offsets = [0, 0], sizes = [32, 2], strides = [1, 1]} : vector<32x4xf32> to vector<32x2xf32>
    %cst_27 = arith.constant dense<0.000000e+00> : vector<32x16xf32>
    %68 = tpu.matmul %67, %59, %cst_27 {dimension_numbers = #tpu.dot_dimension_numbers<[1], [0], [0], [1], [0, 0, 1, 1], [], []>, precision = #tpu.contract_precision<fp32>} : vector<32x2xf32>, vector<2x16xf32>, vector<32x16xf32> -> vector<32x16xf32>
    %c0_28 = arith.constant 0 : index
    %c1_29 = arith.constant 1 : index
    %69 = vector.load %arg8[%c0_28, %c1_29] : memref<32x3xf32, #tpu.memory_space<vmem>>, vector<32x1xf32>
    %70 = vector.broadcast %69 : vector<32x1xf32> to vector<32x16xf32>
    %71 = arith.addf %68, %70 : vector<32x16xf32>
    %72 = vector.extract_strided_slice %52 {offsets = [0, 2], sizes = [32, 2], strides = [1, 1]} : vector<32x4xf32> to vector<32x2xf32>
    %cst_30 = arith.constant dense<0.000000e+00> : vector<32x16xf32>
    %73 = tpu.matmul %72, %66, %cst_30 {dimension_numbers = #tpu.dot_dimension_numbers<[1], [0], [0], [1], [0, 0, 1, 1], [], []>, precision = #tpu.contract_precision<fp32>} : vector<32x2xf32>, vector<2x16xf32>, vector<32x16xf32> -> vector<32x16xf32>
    %c0_31 = arith.constant 0 : index
    %c2 = arith.constant 2 : index
    %74 = vector.load %arg8[%c0_31, %c2] : memref<32x3xf32, #tpu.memory_space<vmem>>, vector<32x1xf32>
    %75 = vector.broadcast %74 : vector<32x1xf32> to vector<32x16xf32>
    %76 = arith.addf %73, %75 : vector<32x16xf32>
    %cst_32 = arith.constant 0.000000e+00 : f32
    %77 = vector.broadcast %cst_32 : f32 to vector<32x16xf32>
    %78 = arith.subf %77, %71 : vector<32x16xf32>
    %79 = math.exp %78 : vector<32x16xf32>
    %cst_33 = arith.constant 1.000000e+00 : f32
    %80 = vector.broadcast %cst_33 : f32 to vector<32x16xf32>
    %81 = arith.addf %80, %79 : vector<32x16xf32>
    %cst_34 = arith.constant 1.000000e+00 : f32
    %82 = vector.broadcast %cst_34 : f32 to vector<32x16xf32>
    %83 = arith.divf %82, %81 : vector<32x16xf32>
    %cst_35 = arith.constant 0.000000e+00 : f32
    %84 = vector.broadcast %cst_35 : f32 to vector<32x16xf32>
    %85 = arith.subf %84, %76 : vector<32x16xf32>
    %86 = math.exp %85 : vector<32x16xf32>
    %cst_36 = arith.constant 1.000000e+00 : f32
    %87 = vector.broadcast %cst_36 : f32 to vector<32x16xf32>
    %88 = arith.addf %87, %86 : vector<32x16xf32>
    %cst_37 = arith.constant 1.000000e+00 : f32
    %89 = vector.broadcast %cst_37 : f32 to vector<32x16xf32>
    %90 = arith.divf %89, %88 : vector<32x16xf32>
    %c0_38 = arith.constant 0 : index
    %c0_39 = arith.constant 0 : index
    %91 = vector.load %arg4[%c0_38, %c0_39] : memref<32x256xf32, #tpu.memory_space<vmem>>, vector<32x256xf32>
    %92 = vector.extract_strided_slice %91 {offsets = [0, 0], sizes = [16, 256], strides = [1, 1]} : vector<32x256xf32> to vector<16x256xf32>
    %cst_40 = arith.constant dense<0.000000e+00> : vector<32x256xf32>
    %93 = tpu.matmul %83, %92, %cst_40 {dimension_numbers = #tpu.dot_dimension_numbers<[1], [0], [0], [1], [0, 0, 1, 1], [], []>, precision = #tpu.contract_precision<fp32>} : vector<32x16xf32>, vector<16x256xf32>, vector<32x256xf32> -> vector<32x256xf32>
    %94 = vector.extract_strided_slice %91 {offsets = [16, 0], sizes = [16, 256], strides = [1, 1]} : vector<32x256xf32> to vector<16x256xf32>
    %cst_41 = arith.constant dense<0.000000e+00> : vector<32x256xf32>
    %95 = tpu.matmul %90, %94, %cst_41 {dimension_numbers = #tpu.dot_dimension_numbers<[1], [0], [0], [1], [0, 0, 1, 1], [], []>, precision = #tpu.contract_precision<fp32>} : vector<32x16xf32>, vector<16x256xf32>, vector<32x256xf32> -> vector<32x256xf32>
    %96 = arith.mulf %93, %95 : vector<32x256xf32>
    %97 = arith.mulf %0, %96 : vector<32x256xf32>
    %c0_42 = arith.constant 0 : index
    %c0_43 = arith.constant 0 : index
    %98 = vector.load %arg10[%c0_42, %c0_43] : memref<32x256xf32, #tpu.memory_space<vmem>>, vector<32x256xf32>
    tpu.vector_store %arg10[%c0_42, %c0_43], %97 {strides = array<i32>} : memref<32x256xf32, #tpu.memory_space<vmem>>, vector<32x256xf32>,
    return
  }
  func.func @transform_0(%arg0: i32) -> (i32, i32) {
    %c0_i32 = arith.constant 0 : i32
    %c0_i32_0 = arith.constant 0 : i32
    return %arg0, %c0_i32 : i32, i32
  }
  func.func @transform_1(%arg0: i32) -> (i32, i32) {
    %c0_i32 = arith.constant 0 : i32
    %c0_i32_0 = arith.constant 0 : i32
    %c0_i32_1 = arith.constant 0 : i32
    return %c0_i32, %c0_i32_0 : i32, i32
  }
  func.func @transform_2(%arg0: i32) -> (i32, i32) {
    %c0_i32 = arith.constant 0 : i32
    %c0_i32_0 = arith.constant 0 : i32
    %c0_i32_1 = arith.constant 0 : i32
    return %c0_i32, %c0_i32_0 : i32, i32
  }
  func.func @transform_3(%arg0: i32) -> (i32, i32) {
    %c0_i32 = arith.constant 0 : i32
    %c0_i32_0 = arith.constant 0 : i32
    %c0_i32_1 = arith.constant 0 : i32
    return %c0_i32, %c0_i32_0 : i32, i32
  }
  func.func @transform_4(%arg0: i32) -> (i32, i32) {
    %c0_i32 = arith.constant 0 : i32
    %c0_i32_0 = arith.constant 0 : i32
    %c0_i32_1 = arith.constant 0 : i32
    return %c0_i32, %c0_i32_0 : i32, i32
  }
  func.func @transform_5(%arg0: i32) -> (i32, i32) {
    %c0_i32 = arith.constant 0 : i32
    %c0_i32_0 = arith.constant 0 : i32
    %c0_i32_1 = arith.constant 0 : i32
    return %c0_i32, %c0_i32_0 : i32, i32
  }
  func.func @transform_6(%arg0: i32) -> (i32, i32) {
    %c0_i32 = arith.constant 0 : i32
    %c0_i32_0 = arith.constant 0 : i32
    %c0_i32_1 = arith.constant 0 : i32
    return %c0_i32, %c0_i32_0 : i32, i32
  }
  func.func @transform_7(%arg0: i32) -> (i32, i32) {
    %c0_i32 = arith.constant 0 : i32
    %c0_i32_0 = arith.constant 0 : i32
    %c0_i32_1 = arith.constant 0 : i32
    return %c0_i32, %c0_i32_0 : i32, i32
  }
  func.func @transform_8(%arg0: i32) -> (i32, i32) {
    %c0_i32 = arith.constant 0 : i32
    %c0_i32_0 = arith.constant 0 : i32
    %c0_i32_1 = arith.constant 0 : i32
    return %c0_i32, %c0_i32_0 : i32, i32
  }
  func.func @transform_9(%arg0: i32) -> (i32, i32) {
    %c0_i32 = arith.constant 0 : i32
    %c0_i32_0 = arith.constant 0 : i32
    return %arg0, %c0_i32 : i32, i32
  }
}

</mosaic_0001>

<bundles_post_ra>
// kernel: tpu_custom_call.1
= control target key start
LH: loop header
LB: loop body
LE: loop exit
PB: predicated region body
PF: predicated region fallthrough
CT: control target
= control target key end

     0   :  { %14 = vsyncpa [#allocation3], 0  ;;  %s13059_s0 = inlined_call_operand.vmem [shape: f32[64,256], index: 0, kind: input, shape index: {}]   ;;  %s13060_s1 = inlined_call_operand.vmem [shape: f32[256,32], index: 1, kind: input, shape index: {}]   ;;  %s13061_s2 = inlined_call_operand.hbm [shape: f32[256,256], index: 2, kind: input, shape index: {}]   ;;  %s13062_s3 = inlined_call_operand.vmem [shape: f32[32,256], index: 3, kind: input, shape index: {}]   ;;  %s13063_s4 = inlined_call_operand.vmem [shape: f32[32,128], index: 4, kind: input, shape index: {}]   ;;  %s13064_s5 = inlined_call_operand.vmem [shape: f32[2,64], index: 5, kind: input, shape index: {}]   ;;  %s13065_s6 = inlined_call_operand.vmem [shape: f32[32,4], index: 6, kind: input, shape index: {}]   ;;  %s13066_s7 = inlined_call_operand.vmem [shape: f32[32,3], index: 7, kind: input, shape index: {}]   ;;  %s13067_s8 = inlined_call_operand.vmem [shape: f32[2,2], index: 8, kind: input, shape index: {}]   ;;  %s13068_s9 = inlined_call_operand.hbm [shape: f32[64,256], index: 9, kind: output, shape index: {}]  }
   0x1   :  { %15 = vsyncpa [#allocation4], 0 }
   0x2   :  { %17 = vsyncpa [#allocation4 + $0x1], 0  ;;  %s9525_s30 = smov 0   ;;  %s9527_s10 = smov 0  }
   0x3   :  { %s9529_s11 = smov 0   ;;  %s9531_s12 = smov 0  }
   0x4 LB: > { %s9546_s13 = sadd.s32 4294967295, %s9458_s12   ;;  %s8208_s14 = sadd.s32 4294967294, %s9458_s12   ;;  %s9458_s12 = sphi %s9531_s12, %s14042_s12   ;;  %s9454_s11 = sphi %s9529_s11, %s14041_s11   ;;  %s9450_s10 = sphi %s9527_s10, %s14040_s10   ;;  %s9446_s30 = sphi %s9525_s30, %s14039_s30  }
   0x5   : > { %s9550_s15 = sadd.s32 1, %s9458_s12   ;;  %s224_s16 = sadd.s32 1, %s9454_s11 }
   0x6   : > { %s221_s17 = ssub.s32 %s9458_s12, %s9550_s15  ;;  %p234_p0 = scmp.ne.s32.totalorder %s9454_s11, %s9450_s10 }
   0x7   : > { %p222_p1 = scmp.eq.s32.totalorder %s221_s17, 0  ;;  %p235_p2 = scmp.eq.s32.totalorder %s9546_s13, 1 }
   0x8   : > { %p240_p3 = scmp.ne.s32.totalorder %s9450_s10, %s9446_s30  ;;  %p241_p4 = scmp.eq.s32.totalorder %s8208_s14, 1 }
   0x9   : > { %s9561_s18 = scalar_select %p222_p1, %s9454_s11, %s224_s16  }
   0xa   : > { %p9563_p5 = por %p235_p2, %p234_p0  ;;  %p9567_p6 = por %p241_p4, %p240_p3 }
   0xb   : > { %p8209_p7 = scmp.ge.s32.totalorder %s9458_s12, 1  ;;  %p248_p8 = scmp.lt.s32.totalorder %s9458_s12, 3 }
   0xc   : > { %s13379_s20 = scalar_select %p9567_p6, 1, 0 }
   0xd   : > { %p9261_p9 = scmp.eq.s32.totalorder %s9546_s13, 0  ;;  %p9574_p10 = pnand %p8209_p7, %p248_p8 }
   0xe   : > { %s9460_s22 = smov [#allocation2]  }
   0xf   : > { %s263_s23 = sshll.u32 %s9460_s22, 4  ;;  %p9253_p11 = pneg %p9574_p10  ;;  %s264_s23 = int_to_ptr.vmem [resolvable:$true] %s263_s23 }
  0x10   : > { %s9379_s24 = scalar_lea.vmem %s264_s23, 8192  ;;  %p9387_p3 = scmp.lt.s32.totalorder %s264_s23, %s264_s23 }
  0x11   : > { %p9254_p12 = pnand %p9261_p9, %p9253_p11  ;;  %p9380_p0 = scmp.ne.s32.totalorder %s264_s23, %s9379_s24 }
  0x12   : > { %p9388_p4 = scmp.lt.s32.totalorder %s9379_s24, %s9379_s24 }
  0x13   : > { %p9370_p13 = pneg %p9254_p12 }
  0x14   : > { %p9389_p6 = por %p9388_p4, %p9387_p3 }
  0x15   : > { %p9382_p1 = pnand %p9380_p0, %p9370_p13 }
  0x17   : > { %p9383_p2 = pneg %p9382_p1 }
  0x19   : > { %p9390_p7 = pnand %p9389_p6, %p9383_p2 }
  0x1b   : > { %9393 = shalt.err (!%p9390_p7)
}
  0x1c   : > { %s9461_s25 = smov 256   ;;  %s9462_s26 = smov 16  }
  0x1d   : > { %9256 = dma.hbm_to_vmem [thread:$0]  (!%p9254_p12), %s13061_s2, 8192, %s264_s23, [#allocation3], %s9461_s25, %s9461_s25, %s9462_s26  }
  0x1e   : > { %307 = sbr.rel (%p9574_p10) target bundleno = 2042 (0x7fa), region = 56 }
  0x23   : > { %9437 = dma.done.wait (%p9261_p9), [#allocation3], 8192  }
  0x24   : > { %9439 = vsyncadd (%p9261_p9), [#allocation3], 4294959104  ;;  %v391_v0 = vld [vmem:[%s13060_s1 + $0xf8] sm:$0xff]  ;;  %v390_v2 = vld [vmem:[%s13060_s1 + $0xf0] sm:$0xff]  ;;  %s8215_s22 = sshll.u32 %s9546_s13, 2  ;;  %s9463_s28 = smov 64  }
  0x25   : > { %v375_v1 = vld [vmem:[%s13060_s1 + $0x78] sm:$0xff]  ;;  %v9600_v3 = vand.u32 4294901760, %v391_v0  ;;  %v9604_v5 = vand.u32 4294901760, %v390_v2  ;;  %v374_v6 = vld [vmem:[%s13060_s1 + $0x70] sm:$0xff]  ;;  %v389_v7 = vld [vmem:[%s13060_s1 + $0xe8] sm:$0xff]  ;;  %p9818_p6 = scmp.lt.s32.totalorder %s8215_s22, 7 }
  0x26   : > { %v9602_v4 = vand.u32 4294901760, %v375_v1  ;;  %v373_v8 = vld [vmem:[%s13060_s1 + $0x68] sm:$0xff]  ;;  %v9615_v9 = vand.u32 4294901760, %v374_v6  ;;  %v9617_v10 = vand.u32 4294901760, %v389_v7  ;;  %v388_v12 = vld [vmem:[%s13060_s1 + $0xe0] sm:$0xff]  ;;  %v9630_v14 = vld [vmem:[%s13060_s1 + $0xd8] sm:$0xff] }
  0x27   : > { %v9619_v11 = vand.u32 4294901760, %v373_v8  ;;  %v372_v13 = vld [vmem:[%s13060_s1 + $0x60] sm:$0xff]  ;;  %8227 = vmatprep.subr.mxu0 %v9600_v3  ;;  %v9633_v15 = vand.u32 4294901760, %v388_v12  ;;  %v9638_v17 = vand.u32 4294901760, %v9630_v14  ;;  %v9641_v18 = vsub.f32 %v391_v0, %v9600_v3  ;;  %v9646_v19 = vld [vmem:[%s13060_s1 + $0x58] sm:$0xff]  ;;  %v9651_v20 = vld [vmem:[%s13060_s1 + $0xd0] sm:$0xff] }
  0x28   : > { %13381 = vst [vmem:[#allocation8_spill] sm:$0xff] %v9615_v9  ;;  %13382 = vst [vmem:[#allocation9_spill] sm:$0xff] %v9617_v10  ;;  %v9635_v16 = vand.u32 4294901760, %v372_v13  ;;  %v9656_v21 = vld [vmem:[%s13060_s1 + $0x50] sm:$0xff]  ;;  %8228 = vmatpush3.msra.mxu0 %v9602_v4  ;;  %v9660_v22 = vand.u32 4294901760, %v9646_v19  ;;  %v9663_v23 = vsub.f32 %v375_v1, %v9602_v4  ;;  %v9666_v24 = vand.u32 4294901760, %v9651_v20 }
  0x29   : > { %13383 = vst [vmem:[#allocation10_spill] sm:$0xff] %v9619_v11  ;;  %v9669_v25 = vsub.f32 %v390_v2, %v9604_v5  ;;  %v9674_v26 = vld [vmem:[%s13060_s1 + $0xc8] sm:$0xff]  ;;  %v9684_v28 = vld [vmem:[%s13060_s1 + $0xc0] sm:$0xff]  ;;  %8229 = vmatprep.subr.mxu0 %v9604_v5  ;;  %v13082_v29 = vand.u32 4294901760, %v9641_v18  ;;  %v9689_v30 = vand.u32 4294901760, %v9656_v21  ;;  %v9692_v31 = vsub.f32 %v374_v6, %v9615_v9  ;;  %v9736_v46 = vld [vmem:[%s13060_s1 + $0xb8] sm:$0xff] }
  0x2a   : > { %13384 = vst [vmem:[#allocation11_spill] sm:$0xff] %v9635_v16  ;;  %13385 = vst [vmem:[#allocation12_spill] sm:$0xff] %v9660_v22  ;;  %v9679_v27 = vld [vmem:[%s13060_s1 + $0x48] sm:$0xff]  ;;  %v9695_v32 = vand.u32 4294901760, %v9674_v26  ;;  %8230 = vmatpush3.msra.mxu0 %v9615_v9  ;;  %v13081_v33 = vand.u32 4294901760, %v9663_v23  ;;  %v9701_v35 = vsub.f32 %v389_v7, %v9617_v10  ;;  %v9709_v37 = vld [vmem:[%s13060_s1 + $0x40] sm:$0xff]  ;;  %v9717_v40 = vsub.f32 %v373_v8, %v9619_v11 }
  0x2b   : > { %13386 = vst [vmem:[#allocation13_spill] sm:$0xff] %v9666_v24  ;;  %13387 = vst [vmem:[#allocation14_spill] sm:$0xff] %v9689_v30  ;;  %v13079_v34 = vand.u32 4294901760, %v9669_v25  ;;  %v9704_v36 = vand.u32 4294901760, %v9679_v27  ;;  %8231 = vmatprep.subr.mxu0 %v9617_v10  ;;  %v665_v38 = vsub.f32 %v9641_v18, %v13082_v29  ;;  %v13078_v39 = vand.u32 4294901760, %v9692_v31  ;;  %v9749_v51 = vld [vmem:[%s13060_s1 + $0x38] sm:$0xff] }
  0x2c   : > { %13388 = vst [vmem:[#allocation15_spill] sm:$0xff] %v9695_v32  ;;  %v9720_v41 = vand.u32 4294901760, %v9684_v28  ;;  %8232 = vmatpush3.msra.mxu0 %v9619_v11  ;;  %v553_v42 = vsub.f32 %v9663_v23, %v13081_v33  ;;  %v13076_v44 = vand.u32 4294901760, %v9701_v35  ;;  %v9731_v45 = vsub.f32 %v388_v12, %v9633_v15  ;;  %v9759_v56 = vld [vmem:[%s13060_s1 + $0xb0] sm:$0xff]  ;;  %v9791_v2 = vld [vmem:[%s13060_s1 + $0xa8] sm:$0xff]  ;;  %s14044_s22 = smov (!%p9818_p6, %s8215_s22), 7 }
  0x2d   : > { %13389 = vst [vmem:[#allocation16_spill] sm:$0xff] %v9704_v36  ;;  %v672_v43 = vsub.f32 %v9669_v25, %v13079_v34  ;;  %8233 = vmatprep.subr.mxu0 %v9633_v15  ;;  %v666_v47 = vand.u32 4294901760, %v665_v38  ;;  %v560_v48 = vsub.f32 %v9692_v31, %v13078_v39  ;;  %v13074_v49 = vand.u32 4294901760, %v9717_v40  ;;  %v9774_v61 = vld [vmem:[%s13060_s1 + $0x30] sm:$0xff]  ;;  %v9939_v33 = vld [vmem:[%s13060_s1 + $0x88] sm:$0xff]  ;;  %s8224_s14 = sshll.u32 %s14044_s22, 4 }
  0x2e   : > { %13390 = vst [vmem:[#allocation17_spill] sm:$0xff] %v9720_v41  ;;  %v9744_v50 = vand.u32 4294901760, %v9709_v37  ;;  %8234 = vmatpush3.msra.mxu0 %v9635_v16  ;;  %v554_v52 = vand.u32 4294901760, %v553_v42  ;;  %v679_v54 = vsub.f32 %v9701_v35, %v13076_v44  ;;  %v13073_v55 = vand.u32 4294901760, %v9731_v45  ;;  %v9912_v44 = vld [vmem:[%s13060_s1 + $0x90] sm:$0xff]  ;;  %s9987_s25 = scalar_lea.vmem %s13059_s0, %s8224_s14  ;;  %s9464_s29 = smov 96  }
  0x2f   : > { %v673_v53 = vand.u32 4294901760, %v672_v43  ;;  %8235 = vmatprep.subr.mxu0 %v9638_v17  ;;  %8271 = vmatprep.subr.mxu1 %v666_v47  ;;  %v561_v57 = vand.u32 4294901760, %v560_v48  ;;  %v567_v58 = vsub.f32 %v9717_v40, %v13074_v49  ;;  %v9766_v59 = vsub.f32 %v372_v13, %v9635_v16  ;;  %v9805_v13 = vld [vmem:[%s13060_s1 + $0x28] sm:$0xff]  ;;  %v9896_v49 = vld [vmem:[%s13060_s1 + $0x18] sm:$0xff]  ;;  %s9465_s14 = smov 112   ;;  %s9466_s22 = smov 16  }
  0x30   : > { %13391 = vst [vmem:[#allocation18_spill] sm:$0xff] %v9744_v50  ;;  %v9769_v60 = vand.u32 4294901760, %v9736_v46  ;;  %8236 = vmatpush3.msra.mxu0 %v9660_v22  ;;  %8272 = vmatpush3.msra.mxu1 %v554_v52  ;;  %v680_v62 = vand.u32 4294901760, %v679_v54  ;;  %v686_v63 = vsub.f32 %v9731_v45, %v13073_v55  ;;  %v9783_v0 = vsub.f32 %v9630_v14, %v9638_v17  ;;  %v9837_v52 = vld [vmem:[%s13060_s1 + $0xa0] sm:$0xff]  ;;  %s9471_s23 = smov 126   ;;  %s341_s26 = sand.u32 1, %s9450_s10  }
  0x31   : > { %v9786_v1 = vand.u32 4294901760, %v9749_v51  ;;  %8237 = vmatprep.subr.mxu0 %v9666_v24  ;;  %8273 = vmatprep.subr.mxu1 %v673_v53  ;;  %v568_v6 = vand.u32 4294901760, %v567_v58  ;;  %v13072_v7 = vand.u32 4294901760, %v9766_v59  ;;  %v9797_v8 = vsub.f32 %v9646_v19, %v9660_v22  ;;  %s8226_s16 = sshll.u32 %s9546_s13, 10  ;;  %s13018_s13 = scalar_lea.sflag [#allocation4], %s341_s26 }
  0x32   : > { %13392 = vst [vmem:[#allocation19_spill] sm:$0xff] %v9769_v60  ;;  %v9800_v12 = vand.u32 4294901760, %v9759_v56  ;;  %8238 = vmatpush3.msra.mxu0 %v9689_v30  ;;  %8274 = vmatpush3.msra.mxu1 %v561_v57  ;;  %v687_v14 = vand.u32 4294901760, %v686_v63  ;;  %v13069_v38 = vand.u32 4294901760, %v9783_v0  ;;  %v9811_v42 = vsub.f32 %v9651_v20, %v9666_v24 }
  0x33   : > { %13393 = vst [vmem:[#allocation20_spill] sm:$0xff] %v9786_v1  ;;  %v9814_v19 = vand.u32 4294901760, %v9774_v61  ;;  %8239 = vmatprep.subr.mxu0 %v9695_v32  ;;  %8275 = vmatprep.subr.mxu1 %v680_v62  ;;  %v574_v43 = vsub.f32 %v9766_v59, %v13072_v7  ;;  %v13070_v47 = vand.u32 4294901760, %v9797_v8  ;;  %v9829_v20 = vsub.f32 %v9656_v21, %v9689_v30 }
  0x34   : > { %13394 = vst [vmem:[#allocation21_spill] sm:$0xff] %v9800_v12  ;;  %v9832_v48 = vand.u32 4294901760, %v9791_v2  ;;  %8240 = vmatpush3.msra.mxu0 %v9704_v36  ;;  %8276 = vmatpush3.msra.mxu1 %v568_v6  ;;  %v693_v53 = vsub.f32 %v9783_v0, %v13069_v38  ;;  %v13071_v54 = vand.u32 4294901760, %v9811_v42  ;;  %v9846_v21 = vsub.f32 %v9674_v26, %v9695_v32  ;;  %v9863_v26 = vld [vmem:[%s13060_s1 + $0x20] sm:$0xff] }
  0x35   : > { %13395 = vst [vmem:[#allocation22_spill] sm:$0xff] %v9814_v19  ;;  %v9849_v57 = vand.u32 4294901760, %v9805_v13  ;;  %8241 = vmatprep.subr.mxu0 %v9720_v41  ;;  %8277 = vmatprep.subr.mxu1 %v687_v14  ;;  %v575_v58 = vand.u32 4294901760, %v574_v43  ;;  %v581_v62 = vsub.f32 %v9797_v8, %v13070_v47  ;;  %v13075_v63 = vand.u32 4294901760, %v9829_v20 }
  0x36   : > { %13397 = vst [vmem:[#allocation23_spill] sm:$0xff] %v9832_v48  ;;  %13398 = vst [vmem:[#allocation24_spill] sm:$0xff] %v9846_v21  ;;  %v9858_v6 = vsub.f32 %v9679_v27, %v9704_v36  ;;  %8242 = vmatpush3.msra.mxu0 %v9744_v50  ;;  %v694_v38 = vand.u32 4294901760, %v693_v53  ;;  %v700_v14 = vsub.f32 %v9811_v42, %v13071_v54  ;;  %v13077_v43 = vand.u32 4294901760, %v9846_v21  ;;  %v9876_v27 = vld [vmem:[%s13060_s1 + $0x98] sm:$0xff] }
  0x37   : > { %13399 = vst [vmem:[#allocation25_spill] sm:$0xff] %v9849_v57  ;;  %v9871_v47 = vand.u32 4294901760, %v9837_v52  ;;  %8278 = vmatpush3.msra.mxu1 %v575_v58  ;;  %8243 = vmatprep.subr.mxu0 %v9769_v60  ;;  %v582_v53 = vand.u32 4294901760, %v581_v62  ;;  %v588_v54 = vsub.f32 %v9829_v20, %v13075_v63  ;;  %v9891_v55 = vsub.f32 %v9684_v28, %v9720_v41 }
  0x38   : > { %v13080_v7 = vand.u32 4294901760, %v9858_v6  ;;  %8279 = vmatprep.subr.mxu1 %v694_v38  ;;  %8244 = vmatpush3.msra.mxu0 %v9786_v1  ;;  %v701_v58 = vand.u32 4294901760, %v700_v14  ;;  %v707_v62 = vsub.f32 %v9846_v21, %v13077_v43  ;;  %v9903_v63 = vand.u32 4294901760, %v9863_v26 }
  0x39   : > { %13400 = vst [vmem:[#allocation26_spill] sm:$0xff] %v9871_v47  ;;  %13401 = vst [vmem:[#allocation27_spill] sm:$0xff] %v9891_v55  ;;  %v9907_v28 = vsub.f32 %v9709_v37, %v9744_v50  ;;  %8280 = vmatpush3.msra.mxu1 %v582_v53  ;;  %8245 = vmatprep.subr.mxu0 %v9800_v12  ;;  %v589_v38 = vand.u32 4294901760, %v588_v54  ;;  %v13085_v43 = vand.u32 4294901760, %v9891_v55  ;;  %v9920_v39 = vand.u32 4294901760, %v9876_v27  ;;  %v9925_v37 = vld [vmem:[%s13060_s1 + $0x10] sm:$0xff] }
  0x3a   : > { %v595_v14 = vsub.f32 %v9858_v6, %v13080_v7  ;;  %8281 = vmatprep.subr.mxu1 %v701_v58  ;;  %8246 = vmatpush3.msra.mxu0 %v9814_v19  ;;  %v708_v53 = vand.u32 4294901760, %v707_v62  ;;  %v9931_v34 = vsub.f32 %v9736_v46, %v9769_v60  ;;  %v9934_v7 = vand.u32 4294901760, %v9896_v49 }
  0x3b   : > { %v13086_v54 = vand.u32 4294901760, %v9907_v28  ;;  %8282 = vmatpush3.msra.mxu1 %v589_v38  ;;  %8247 = vmatprep.subr.mxu0 %v9832_v48  ;;  %v714_v62 = vsub.f32 %v9891_v55, %v13085_v43  ;;  %v9948_v46 = vsub.f32 %v9749_v51, %v9786_v1  ;;  %v9951_v29 = vand.u32 4294901760, %v9912_v44  ;;  %v9968_v51 = vld [vmem:[%s13060_s1 + $0x8] sm:$0xff] }
  0x3c   : > { %13402 = vst [vmem:[#allocation28_spill] sm:$0xff] %v9931_v34  ;;  %13403 = vst [vmem:[#allocation29_spill] sm:$0xff] %v9934_v7  ;;  %v596_v58 = vand.u32 4294901760, %v595_v14  ;;  %8283 = vmatprep.subr.mxu1 %v708_v53  ;;  %8248 = vmatpush3.msra.mxu0 %v9849_v57  ;;  %v9960_v60 = vsub.f32 %v9759_v56, %v9800_v12  ;;  %v9963_v43 = vand.u32 4294901760, %v9925_v37  ;;  %v9977_v56 = vand.u32 4294901760, %v9939_v33  ;;  %v9982_v12 = vld [vmem:[%s13060_s1 + $0x80] sm:$0xff] }
  0x3d   : > { %13404 = vst [vmem:[#allocation30_spill] sm:$0xff] %v9948_v46  ;;  %13405 = vst [vmem:[#allocation31_spill] sm:$0xff] %v9951_v29  ;;  %v602_v38 = vsub.f32 %v9907_v28, %v13086_v54  ;;  %8249 = vmatprep.subr.mxu0 %v9871_v47  ;;  %v715_v53 = vand.u32 4294901760, %v714_v62  ;;  %v9974_v14 = vsub.f32 %v9774_v61, %v9814_v19  ;;  %v13410_v62 = vand.u32 4294901760, %v9931_v34 }
  0x3e   : > { %13406 = vst [vmem:[#allocation32_spill] sm:$0xff] %v9960_v60  ;;  %13407 = vst [vmem:[#allocation33_spill] sm:$0xff] %v9963_v43  ;;  %8284 = vmatpush3.msra.mxu1 %v596_v58  ;;  %8250 = vmatpush3.msra.mxu0 %v9903_v63  ;;  %v13105_v54 = vand.u32 4294901760, %v9960_v60  ;;  %v9996_v19 = vsub.f32 %v9791_v2, %v9832_v48  ;;  %v13412_v1 = vand.u32 4294901760, %v9948_v46  ;;  %v10004_v41 = vand.u32 4294901760, %v9968_v51  ;;  %v10013_v2 = vld [vmem:[%s13060_s1] sm:$0xff] }
  0x3f   : > { %13408 = vst [vmem:[#allocation34_spill] sm:$0xff] %v9974_v14  ;;  %13409 = vst [vmem:[#allocation35_spill] sm:$0xff] %v9977_v56  ;;  %v603_v58 = vand.u32 4294901760, %v602_v38  ;;  %v721_v61 = vsub.f32 %v9931_v34, %v13410_v62  ;;  %8285 = vmatprep.subr.mxu1 %v715_v53  ;;  %8251 = vmatprep.subr.mxu0 %v9920_v39  ;;  %v10008_v62 = vsub.f32 %v9805_v13, %v9849_v57  ;;  %v353_v13 = vld [vmem:[%s9987_s25 + $0x8] sm:$0xff]  ;;  %vm3116_vm0 = vcmask 523264  }
  0x40   : > { %13411 = vst [vmem:[#allocation36_spill] sm:$0xff] %v9996_v19  ;;  %v609_v50 = vsub.f32 %v9948_v46, %v13412_v1  ;;  %13413 = vst [vmem:[#allocation37_spill] sm:$0xff] %v10004_v41  ;;  %8252 = vmatpush3.msra.mxu0 %v9934_v7  ;;  %v728_v1 = vsub.f32 %v9960_v60, %v13105_v54  ;;  %v10021_v48 = vand.u32 4294901760, %v9982_v12  ;;  %v13414_v36 = vand.u32 4294901760, %v9974_v14  ;;  %v352_v54 = vld [vmem:[%s9987_s25] sm:$0xff] }
  0x41   : > { %8286 = vmatpush3.msra.mxu1 %v603_v58  ;;  %v722_v53 = vand.u32 4294901760, %v721_v61  ;;  %8253 = vmatprep.subr.mxu0 %v9951_v29  ;;  %v10031_v32 = vsub.f32 %v9837_v52, %v9871_v47  ;;  %v13416_v30 = vand.u32 4294901760, %v9996_v19  ;;  %v10039_v24 = vand.u32 4294901760, %v10013_v2 }
  0x42   : > { %v610_v57 = vand.u32 4294901760, %v609_v50  ;;  %v616_v58 = vsub.f32 %v9974_v14, %v13414_v36  ;;  %v729_v38 = vand.u32 4294901760, %v728_v1  ;;  %8254 = vmatpush3.msra.mxu0 %v9963_v43  ;;  %v10043_v36 = vsub.f32 %v9863_v26, %v9903_v63 }
  0x43   : > { %13415 = vst [vmem:[#allocation38_spill] sm:$0xff] %v10031_v32  ;;  %8287 = vmatprep.subr.mxu1 %v722_v53  ;;  %v735_v50 = vsub.f32 %v9996_v19, %v13416_v30  ;;  %8255 = vmatprep.subr.mxu0 %v9977_v56  ;;  %v13417_v52 = vand.u32 4294901760, %v10008_v62  ;;  %v13114_v1 = vand.u32 4294901760, %v10031_v32  ;;  %v10050_v47 = vand.u32 4294901760, %v353_v13 }
  0x44   : > { %8288 = vmatpush3.msra.mxu1 %v610_v57  ;;  %v617_v61 = vand.u32 4294901760, %v616_v58  ;;  %8256 = vmatpush3.msra.mxu0 %v10004_v41  ;;  %v13115_v19 = vand.u32 4294901760, %v10043_v36  ;;  %v10056_v57 = vsub.f32 %v9876_v27, %v9920_v39  ;;  %v10058_v26 = vand.u32 4294901760, %v352_v54 }
  0x45   : > { %v623_v53 = vsub.f32 %v10008_v62, %v13417_v52  ;;  %13418 = vst [vmem:[#allocation39_spill] sm:$0xff] %v10050_v47  ;;  %8289 = vmatprep.subr.mxu1 %v729_v38  ;;  %v736_v30 = vand.u32 4294901760, %v735_v50  ;;  %8257 = vmatprep.subr.mxu0 %v10021_v48  ;;  %v742_v52 = vsub.f32 %v10031_v32, %v13114_v1  ;;  %vm9469_vm1 = vmmov 0  }
  0x46   : > { %13419 = vst [vmem:[#allocation40_spill] sm:$0xff] %v10058_v26  ;;  %8290 = vmatpush3.msra.mxu1 %v617_v61  ;;  %v10065_v38 = vsub.f32 %v353_v13, %v10050_v47  ;;  %v10069_v50 = vsub.f32 %v9896_v49, %v9934_v7  ;;  %8258 = vmatpush3.msra.mxu0 %v10039_v24  ;;  %v13118_v61 = vand.u32 4294901760, %v10056_v57  ;;  %vm4536_vm2 = vcmask 261120  }
  0x47   : > { %v624_v58 = vand.u32 4294901760, %v623_v53  ;;  %8291 = vmatprep.subr.mxu1 %v736_v30  ;;  %v630_v27 = vsub.f32 %v10043_v36, %v13115_v19  ;;  %v10077_v53 = vsub.f32 %v352_v54, %v10058_v26  ;;  %v10081_v13 = vsub.f32 %v9912_v44, %v9951_v29  ;;  %8315 = vmatprep.subr.mxu0 %v9641_v18 }
  0x48   : > { %13420 = vst [vmem:[#allocation41_spill] sm:$0xff] %v10065_v38  ;;  %v743_v1 = vand.u32 4294901760, %v742_v52  ;;  %v10084_v49 = vand.u32 4294901760, %v10065_v38  ;;  %v10090_v19 = vsub.f32 %v9925_v37, %v9963_v43  ;;  %v749_v44 = vsub.f32 %v10056_v57, %v13118_v61  ;;  %774 = vmatprep.mubr.f32.mxu1 %v10050_v47 }
  0x49   : > { %13421 = vst [vmem:[#allocation42_spill] sm:$0xff] %v10077_v53  ;;  %8292 = vmatpush3.msra.mxu1 %v624_v58  ;;  %v631_v54 = vand.u32 4294901760, %v630_v27  ;;  %v10096_v58 = vand.u32 4294901760, %v10077_v53  ;;  %v13424_v37 = vand.u32 4294901760, %v10069_v50  ;;  %v10108_v61 = vsub.f32 %v9939_v33, %v9977_v56 }
  0x4a   : > { %13422 = vst [vmem:[#allocation43_spill] sm:$0xff] %v10084_v49  ;;  %8293 = vmatprep.subr.mxu1 %v743_v1  ;;  %v491_v30 = vsub.f32 %v10065_v38, %v10084_v49  ;;  %v750_v29 = vand.u32 4294901760, %v749_v44  ;;  %v13425_v1 = vand.u32 4294901760, %v10081_v13  ;;  %v10117_v49 = vsub.f32 %v9968_v51, %v10004_v41  ;;  %v354_v41 = vld [vmem:[%s9987_s25 + $0x10] sm:$0xff] }
  0x4b   : > { %13423 = vst [vmem:[#allocation44_spill] sm:$0xff] %v10096_v58  ;;  %v637_v43 = vsub.f32 %v10069_v50, %v13424_v37  ;;  %8294 = vmatpush3.msra.mxu1 %v631_v54  ;;  %v497_v52 = vsub.f32 %v10077_v53, %v10096_v58  ;;  %v355_v37 = vld [vmem:[%s9987_s25 + $0x18] sm:$0xff]  ;;  %v13427_v33 = vand.u32 4294901760, %v10090_v19  ;;  %v13133_v44 = vand.u32 4294901760, %v10108_v61 }
  0x4c   : > { %v756_v47 = vsub.f32 %v10081_v13, %v13425_v1  ;;  %v10120_v27 = vand.u32 4294901760, %v491_v30  ;;  %8295 = vmatprep.subr.mxu1 %v750_v29  ;;  %v13134_v1 = vand.u32 4294901760, %v10117_v49  ;;  %v10131_v51 = vsub.f32 %v9982_v12, %v10021_v48 }
  0x4d   : > { %v638_v7 = vand.u32 4294901760, %v637_v43  ;;  %v644_v54 = vsub.f32 %v10090_v19, %v13427_v33  ;;  %v10126_v58 = vand.u32 4294901760, %v497_v52  ;;  %v763_v30 = vsub.f32 %v10108_v61, %v13133_v44 }
  0x4e   : > { %13426 = vst [vmem:[#allocation45_spill] sm:$0xff] %v10120_v27  ;;  %v757_v56 = vand.u32 4294901760, %v756_v47  ;;  %493 = vmatprep.mubr.f32.mxu0 %v10120_v27  ;;  %v10140_v29 = vsub.f32 %v10013_v2, %v10039_v24  ;;  %v10142_v47 = vand.u32 4294901760, %v355_v37  ;;  %v651_v12 = vsub.f32 %v10117_v49, %v13134_v1  ;;  %v356_v1 = vld [vmem:[%s9987_s25 + $0x20] sm:$0xff] }
  0x4f   : > { %13428 = vst [vmem:[#allocation46_spill] sm:$0xff] %v10126_v58  ;;  %8296 = vmatpush3.msra.mxu1 %v638_v7  ;;  %v645_v43 = vand.u32 4294901760, %v644_v54  ;;  %499 = vmatmul.mubr.f32.vlgmr.msra.gmra.mxu0 %v10126_v58  ;;  %v13136_v7 = vand.u32 4294901760, %v10131_v51  ;;  %v764_v52 = vand.u32 4294901760, %v763_v30  ;;  %v10151_v2 = vand.u32 4294901760, %v354_v41  ;;  %v357_v54 = vld [vmem:[%s9987_s25 + $0x28] sm:$0xff] }
  0x50   : > { %13429 = vst [vmem:[#allocation47_spill] sm:$0xff] %v10142_v47  ;;  %8297 = vmatprep.subr.mxu1 %v757_v56  ;;  %8316 = vmatpush3.msra.mxu0 %v9663_v23  ;;  %v13137_v33 = vand.u32 4294901760, %v10140_v29  ;;  %v652_v44 = vand.u32 4294901760, %v651_v12  ;;  %v10163_v30 = vsub.f32 %v355_v37, %v10142_v47  ;;  %v10167_v58 = vand.u32 4294901760, %v357_v54 }
  0x51   : > { %8298 = vmatpush3.msra.mxu1 %v645_v43  ;;  %13430 = vst [vmem:[#allocation48_spill] sm:$0xff] %v10151_v2  ;;  %8317 = vmatprep.subr.mxu0 %v9669_v25  ;;  %v770_v56 = vsub.f32 %v10131_v51, %v13136_v7  ;;  %vm5536_vm3 = vcmask 15360   ;;  %vm5549_vm4 = vcmask 1041408   ;;  %vm6794_vm5 = vcmask 130048  }
  0x52   : > { %8318 = vmatpush3.msra.mxu0 %v9692_v31  ;;  %8299 = vmatprep.subr.mxu1 %v764_v52  ;;  %v658_v43 = vsub.f32 %v10140_v29, %v13137_v33  ;;  %13431 = vst [vmem:[#allocation49_spill] sm:$0xff] %v10163_v30  ;;  %13432 = vst [vmem:[#allocation50_spill] sm:$0xff] %v10167_v58  ;;  %v10171_v52 = vsub.f32 %v354_v41, %v10151_v2  ;;  %v10174_v33 = vand.u32 4294901760, %v356_v1 }
  0x53   : > { %8319 = vmatprep.subr.mxu0 %v9701_v35  ;;  %8300 = vmatpush3.msra.mxu1 %v652_v44  ;;  %v771_v12 = vand.u32 4294901760, %v770_v56  ;;  %v10178_v37 = vand.u32 4294901760, %v10163_v30  ;;  %v359_v44 = vld [vmem:[%s9987_s25 + $0x38] sm:$0xff]  ;;  %v10184_v56 = vsub.f32 %v357_v54, %v10167_v58 }
  0x54   : > { %8320 = vmatpush3.msra.mxu0 %v9717_v40  ;;  %v659_v7 = vand.u32 4294901760, %v658_v43  ;;  %13433 = vst [vmem:[#allocation51_spill] sm:$0xff] %v10171_v52  ;;  %13434 = vst [vmem:[#allocation52_spill] sm:$0xff] %v10174_v33  ;;  %v10189_v41 = vand.u32 4294901760, %v10171_v52  ;;  %v10195_v43 = vsub.f32 %v356_v1, %v10174_v33 }
  0x55   : > { %8301 = vmatprep.subr.mxu1 %v771_v12  ;;  %8321 = vmatprep.subr.mxu0 %v9731_v45  ;;  %13435 = vst [vmem:[#allocation53_spill] sm:$0xff] %v10178_v37  ;;  %13436 = vst [vmem:[#allocation54_spill] sm:$0xff] %v10184_v56  ;;  %v10197_v12 = vand.u32 4294901760, %v359_v44  ;;  %v506_v54 = vsub.f32 %v10163_v30, %v10178_v37  ;;  %v10206_v27 = vand.u32 4294901760, %v10184_v56 }
  0x56   : > { %8302 = vmatpush3.msra.mxu1 %v659_v7  ;;  %8322 = vmatpush3.msra.mxu0 %v9766_v59  ;;  %13437 = vst [vmem:[#allocation55_spill] sm:$0xff] %v10189_v41  ;;  %v358_v7 = vld [vmem:[%s9987_s25 + $0x30] sm:$0xff]  ;;  %13438 = vst [vmem:[#allocation56_spill] sm:$0xff] %v10195_v43  ;;  %v512_v1 = vsub.f32 %v10171_v52, %v10189_v41 }
  0x57   : > { %776 = vmatmul.mubr.f32.vlgmr.msra.gmra.mxu1 %v10058_v26  ;;  %8323 = vmatprep.subr.mxu0 %v9783_v0  ;;  %13439 = vst [vmem:[#allocation57_spill] sm:$0xff] %v10197_v12  ;;  %13440 = vst [vmem:[#allocation58_spill] sm:$0xff] %v10206_v27  ;;  %v10208_v26 = vand.u32 4294901760, %v358_v7 }
  0x58   : > { %8359 = vmatprep.subr.mxu1 %v9600_v3  ;;  %8324 = vmatpush3.msra.mxu0 %v9797_v8 }
  0x59   : > { %8360 = vmatpush3.msra.mxu1 %v9602_v4  ;;  %8325 = vmatprep.subr.mxu0 %v9811_v42  ;;  %13441 = vst [vmem:[#allocation59_spill] sm:$0xff] %v10208_v26 }
  0x5a   : > { %8361 = vmatprep.subr.mxu1 %v9604_v5  ;;  %8326 = vmatpush3.msra.mxu0 %v9829_v20 }
  0x5b   : > { %8362 = vmatpush3.msra.mxu1 %v9615_v9  ;;  %8327 = vmatprep.subr.mxu0 %v9846_v21  ;;  %v10217_v9 = vand.u32 4294901760, %v10195_v43  ;;  %v10220_v21 = vsub.f32 %v359_v44, %v10197_v12  ;;  %v10235_v44 = vand.u32 4294901760, %v512_v1 }
  0x5c   : > { %8363 = vmatprep.subr.mxu1 %v9617_v10  ;;  %8328 = vmatpush3.msra.mxu0 %v9858_v6  ;;  %v10224_v10 = vand.u32 4294901760, %v506_v54 }
  0x5d   : > { %8364 = vmatpush3.msra.mxu1 %v9619_v11  ;;  %8329 = vmatprep.subr.mxu0 %v9891_v55  ;;  %13442 = vst [vmem:[#allocation60_spill] sm:$0xff] %v10217_v9  ;;  %13443 = vst [vmem:[#allocation61_spill] sm:$0xff] %v10220_v21  ;;  %v521_v11 = vsub.f32 %v10184_v56, %v10206_v27  ;;  %v10231_v55 = vsub.f32 %v358_v7, %v10208_v26  ;;  %v13449_v7 = vld [vmem:[#allocation14_spill] sm:$0xff] }
  0x5e   : > { %8365 = vmatprep.subr.mxu1 %v9633_v15  ;;  %8330 = vmatpush3.msra.mxu0 %v9907_v28  ;;  %13444 = vst [vmem:[#allocation62_spill] sm:$0xff] %v10224_v10  ;;  %13446 = vst [vmem:[#allocation64_spill] sm:$0xff] %v10235_v44  ;;  %v527_v54 = vsub.f32 %v10195_v43, %v10217_v9 }
  0x5f   : > { %8366 = vmatpush3.msra.mxu1 %v9635_v16  ;;  %8331 = vmatprep.subr.mxu0 %v9931_v34  ;;  %13445 = vst [vmem:[#allocation63_spill] sm:$0xff] %v10231_v55  ;;  %v10242_v34 = vand.u32 4294901760, %v10220_v21  ;;  %v13448_v16 = vld [vmem:[#allocation13_spill] sm:$0xff]  ;;  %v10248_v1 = vand.u32 4294901760, %v521_v11 }
  0x60   : > { %8367 = vmatprep.subr.mxu1 %v9638_v17  ;;  %8332 = vmatpush3.msra.mxu0 %v9948_v46  ;;  %v13453_v46 = vld [vmem:[#allocation15_spill] sm:$0xff]  ;;  %v13456_v11 = vld [vmem:[#allocation17_spill] sm:$0xff] }
  0x61   : > { %8368 = vmatpush3.msra.mxu1 %v9660_v22  ;;  %8333 = vmatprep.subr.mxu0 %v9960_v60  ;;  %13447 = vst [vmem:[#allocation65_spill] sm:$0xff] %v10242_v34  ;;  %13450 = vst [vmem:[#allocation14_spill] sm:$0xff] %v10248_v1  ;;  %v10251_v22 = vand.u32 4294901760, %v10231_v55  ;;  %v13452_v60 = vld [vmem:[#allocation36_spill] sm:$0xff] }
  0x62   : > { %8369 = vmatprep.subr.mxu1 %v13448_v16  ;;  %508 = vmatprep.mubr.f32.mxu0 %v10224_v10  ;;  %v10257_v16 = vand.u32 4294901760, %v527_v54  ;;  %v536_v10 = vsub.f32 %v10220_v21, %v10242_v34 }
  0x63   : > { %8334 = vmatpush3.msra.mxu0 %v9974_v14  ;;  %8370 = vmatpush3.msra.mxu1 %v13449_v7  ;;  %13451 = vst [vmem:[#allocation66_spill] sm:$0xff] %v10251_v22  ;;  %v13455_v14 = vld [vmem:[#allocation16_spill] sm:$0xff] }
  0x64   : > { %514 = vmatmul.mubr.f32.gmra.mxu0 %v10235_v44  ;;  %8335 = vmatprep.subr.mxu0 %v13452_v60  ;;  %13454 = vst [vmem:[#allocation36_spill] sm:$0xff] %v10257_v16  ;;  %v542_v44 = vsub.f32 %v10231_v55, %v10251_v22  ;;  %v10271_v54 = vand.u32 4294901760, %v536_v10  ;;  %v13463_v10 = vld [vmem:[#allocation22_spill] sm:$0xff] }
  0x65   : > { %8371 = vmatprep.subr.mxu1 %v13453_v46  ;;  %8336 = vmatpush3.msra.mxu0 %v10008_v62  ;;  %v13457_v46 = vld [vmem:[#allocation18_spill] sm:$0xff] }
  0x66   : > { %8372 = vmatpush3.msra.mxu1 %v13455_v14  ;;  %8337 = vmatprep.subr.mxu0 %v10031_v32  ;;  %13458 = vst [vmem:[#allocation16_spill] sm:$0xff] %v10271_v54  ;;  %v13459_v32 = vld [vmem:[#allocation19_spill] sm:$0xff] }
  0x67   : > { %8373 = vmatprep.subr.mxu1 %v13456_v11  ;;  %523 = vmatprep.mubr.f32.mxu0 %v10248_v1  ;;  %v10277_v1 = vand.u32 4294901760, %v542_v44  ;;  %v13461_v11 = vld [vmem:[#allocation20_spill] sm:$0xff]  ;;  %v13464_v44 = vld [vmem:[#allocation23_spill] sm:$0xff] }
  0x68   : > { %8338 = vmatpush3.msra.mxu0 %v10043_v36  ;;  %8374 = vmatpush3.msra.mxu1 %v13457_v46  ;;  %v13462_v46 = vld [vmem:[#allocation21_spill] sm:$0xff] }
  0x69   : > { %529 = vmatmul.mubr.f32.gmra.mxu0 %v10257_v16  ;;  %781 = vmatprep.mubr.f32.mxu1 %v10142_v47  ;;  %13460 = vst [vmem:[#allocation19_spill] sm:$0xff] %v10277_v1  ;;  %v13465_v16 = vld [vmem:[#allocation25_spill] sm:$0xff] }
  0x6a   : > { %8339 = vmatprep.subr.mxu0 %v10056_v57  ;;  %8375 = vmatprep.subr.mxu1 %v13459_v32 }
  0x6b   : > { %783 = vmatmul.mubr.f32.gmra.mxu1 %v10151_v2  ;;  %8340 = vmatpush3.msra.mxu0 %v10069_v50  ;;  %v13471_v2 = vld [vmem:[#allocation31_spill] sm:$0xff] }
  0x6c   : > { %8376 = vmatpush3.msra.mxu1 %v13461_v11  ;;  %8341 = vmatprep.subr.mxu0 %v10081_v13 }
  0x6d   : > { %8377 = vmatprep.subr.mxu1 %v13462_v46  ;;  %538 = vmatprep.mubr.f32.mxu0 %v10271_v54  ;;  %v13466_v54 = vld [vmem:[#allocation26_spill] sm:$0xff] }
  0x6e   : > { %8342 = vmatpush3.msra.mxu0 %v10090_v19  ;;  %8378 = vmatpush3.msra.mxu1 %v13463_v10 }
  0x6f   : > { %544 = vmatmul.mubr.f32.gmra.mxu0 %v10277_v1  ;;  %788 = vmatprep.mubr.f32.mxu1 %v10167_v58  ;;  %v13467_v1 = vand.u32 4294901760, %v9641_v18  ;;  %v13469_v58 = vld [vmem:[#allocation29_spill] sm:$0xff]  ;;  %v13474_v18 = vld [vmem:[#allocation35_spill] sm:$0xff] }
  0x70   : > { %8343 = vmatprep.subr.mxu0 %v10108_v61  ;;  %8379 = vmatprep.subr.mxu1 %v13464_v44 }
  0x71   : > { %790 = vmatmul.mubr.f32.gmra.mxu1 %v10174_v33  ;;  %8344 = vmatpush3.msra.mxu0 %v10117_v49  ;;  %v13468_v33 = vand.u32 4294901760, %v9663_v23  ;;  %v13475_v23 = vand.u32 4294901760, %v9701_v35  ;;  %v13481_v35 = vld [vmem:[#allocation44_spill] sm:$0xff] }
  0x72   : > { %8380 = vmatpush3.msra.mxu1 %v13465_v16  ;;  %8345 = vmatprep.subr.mxu0 %v10131_v51 }
  0x73   : > { %8381 = vmatprep.subr.mxu1 %v13466_v54  ;;  %8346 = vmatpush3.msra.mxu0 %v10140_v29 }
  0x74   : > { %932 = vmatprep.mubr.f32.mxu0 %v10065_v38  ;;  %8382 = vmatpush3.msra.mxu1 %v9903_v63  ;;  %v13470_v38 = vand.u32 4294901760, %v9669_v25  ;;  %v13477_v25 = vand.u32 4294901760, %v9717_v40  ;;  %v13482_v40 = vand.u32 4294901760, %v9783_v0  ;;  %v13486_v0 = vld [vmem:[#allocation8_spill] sm:$0xff] }
  0x75   : > { %795 = vmatprep.mubr.f32.mxu1 %v10197_v12  ;;  %935 = vmatmul.mubr.f32.vlgmr.msra.gmra.mxu0 %v10077_v53  ;;  %v13472_v53 = vld [vmem:[#allocation33_spill] sm:$0xff]  ;;  %v13473_v12 = vand.u32 4294901760, %v9692_v31  ;;  %v13479_v31 = vld [vmem:[#allocation43_spill] sm:$0xff] }
  0x76   : > { %8383 = vmatprep.subr.mxu1 %v9920_v39  ;;  %8403 = vmatprep.subr.mxu0 %v13467_v1  ;;  %v13484_v1 = vand.u32 4294901760, %v9811_v42  ;;  %v13491_v42 = vld [vmem:[#allocation10_spill] sm:$0xff] }
  0x77   : > { %797 = vmatmul.mubr.f32.gmra.mxu1 %v10208_v26  ;;  %8404 = vmatpush3.msra.mxu0 %v13468_v33  ;;  %v13476_v33 = vld [vmem:[#allocation37_spill] sm:$0xff] }
  0x78   : > { %8384 = vmatpush3.msra.mxu1 %v13469_v58  ;;  %8405 = vmatprep.subr.mxu0 %v13470_v38  ;;  %v13478_v38 = vand.u32 4294901760, %v9731_v45  ;;  %v13483_v45 = vand.u32 4294901760, %v9797_v8  ;;  %v13489_v8 = vld [vmem:[#allocation9_spill] sm:$0xff] }
  0x79   : > { %8385 = vmatprep.subr.mxu1 %v13471_v2  ;;  %941 = vmatprep.mubr.f32.mxu0 %v10163_v30 }
  0x7a   : > { %8386 = vmatpush3.msra.mxu1 %v13472_v53  ;;  %8406 = vmatpush3.msra.mxu0 %v13473_v12  ;;  %v13480_v12 = vand.u32 4294901760, %v9766_v59  ;;  %v13485_v59 = vand.u32 4294901760, %v9829_v20  ;;  %v1521_v20 = vld [vmem:[#allocation2 + $0xf8] sm:$0xff] }
  0x7b   : > { %944 = vmatmul.mubr.f32.gmra.mxu0 %v10171_v52  ;;  %8387 = vmatprep.subr.mxu1 %v13474_v18 }
  0x7c   : > { %8407 = vmatprep.subr.mxu0 %v13475_v23  ;;  %8388 = vmatpush3.msra.mxu1 %v13476_v33  ;;  %v13492_v23 = vld [vmem:[#allocation27_spill] sm:$0xff] }
  0x7d   : > { %8408 = vmatpush3.msra.mxu0 %v13477_v25  ;;  %8389 = vmatprep.subr.mxu1 %v10021_v48  ;;  %v13493_v25 = vand.u32 4294901760, %v13492_v23 }
  0x7e   : > { %8409 = vmatprep.subr.mxu0 %v13478_v38  ;;  %950 = vmatprep.mubr.f32.mxu0 %v10184_v56  ;;  %v1520_v38 = vld [vmem:[#allocation2 + $0xf0] sm:$0xff] }
  0x7f   : > { %8390 = vmatpush3.msra.mxu1 %v10039_v24  ;;  %1066 = vmatprep.mubr.f32.mxu1 %v13479_v31 }
  0x80   : > { %8410 = vmatpush3.msra.mxu0 %v13480_v12  ;;  %1070 = vmatmul.mubr.f32.vlgmr.msra.gmra.mxu1 %v13481_v35  ;;  %v13494_v12 = vand.u32 4294901760, %v9907_v28  ;;  %v13502_v28 = vld [vmem:[#allocation12_spill] sm:$0xff] }
  0x81   : > { %953 = vmatmul.mubr.f32.gmra.mxu0 %v10195_v43  ;;  %8411 = vmatprep.subr.mxu0 %v13482_v40  ;;  %v13495_v40 = vld [vmem:[#allocation11_spill] sm:$0xff] }
  0x82   : > { %8447 = vmatprep.subr.mxu1 %v9600_v3  ;;  %8412 = vmatpush3.msra.mxu0 %v13483_v45  ;;  %v13487_v3 = vld [vmem:[#allocation24_spill] sm:$0xff] }
  0x83   : > { %8448 = vmatpush3.msra.mxu1 %v9602_v4  ;;  %8413 = vmatprep.subr.mxu0 %v13484_v1  ;;  %v13488_v4 = vand.u32 4294901760, %v13487_v3  ;;  %v1518_v1 = vld [vmem:[#allocation2 + $0xe0] sm:$0xff]  ;;  %v10367_v3 = vand.u32 4294901760, %v1520_v38 }
  0x84   : > { %8449 = vmatprep.subr.mxu1 %v9604_v5  ;;  %959 = vmatprep.mubr.f32.mxu0 %v10220_v21  ;;  %v13490_v5 = vand.u32 4294901760, %v9858_v6  ;;  %v13496_v6 = vld [vmem:[#allocation28_spill] sm:$0xff]  ;;  %v10374_v23 = vand.u32 4294901760, %v1518_v1 }
  0x85   : > { %1077 = vmatprep.mubr.f32.mxu1 %v10178_v37  ;;  %8414 = vmatpush3.msra.mxu0 %v13485_v59  ;;  %v13497_v45 = vand.u32 4294901760, %v13496_v6  ;;  %v13498_v59 = vld [vmem:[#allocation30_spill] sm:$0xff]  ;;  %13501 = vst [vmem:[#allocation21_spill] sm:$0xff] %v10367_v3 }
  0x86   : > { %8450 = vmatpush3.msra.mxu1 %v13486_v0  ;;  %962 = vmatmul.mubr.f32.gmra.mxu0 %v10231_v55  ;;  %v13499_v0 = vand.u32 4294901760, %v13498_v59  ;;  %13506 = vst [vmem:[#allocation22_spill] sm:$0xff] %v10374_v23  ;;  %v10385_v59 = vsub.f32 %v1520_v38, %v10367_v3  ;;  %v10401_v38 = vsub.f32 %v1518_v1, %v10374_v23 }
  0x87   : > { %1081 = vmatmul.mubr.f32.gmra.mxu1 %v10189_v41  ;;  %8415 = vmatprep.subr.mxu0 %v13488_v4  ;;  %v1519_v4 = vld [vmem:[#allocation2 + $0xe8] sm:$0xff] }
  0x88   : > { %8451 = vmatprep.subr.mxu1 %v13489_v8  ;;  %8416 = vmatpush3.msra.mxu0 %v13490_v5  ;;  %v13503_v8 = vld [vmem:[#allocation32_spill] sm:$0xff]  ;;  %v10379_v6 = vand.u32 4294901760, %v1519_v4 }
  0x89   : > { %8452 = vmatpush3.msra.mxu1 %v13491_v42  ;;  %8417 = vmatprep.subr.mxu0 %v13493_v25  ;;  %v13504_v5 = vand.u32 4294901760, %v13503_v8  ;;  %v13505_v42 = vld [vmem:[#allocation13_spill] sm:$0xff]  ;;  %v1516_v25 = vld [vmem:[#allocation2 + $0xd0] sm:$0xff]  ;;  %v13511_v8 = vld [vmem:[#allocation15_spill] sm:$0xff] }
  0x8a   : > { %8453 = vmatprep.subr.mxu1 %v9633_v15  ;;  %1088 = vmatprep.mubr.f32.mxu1 %v10206_v27  ;;  %v10365_v15 = vand.u32 4294901760, %v1521_v20  ;;  %13509 = vst [vmem:[#allocation23_spill] sm:$0xff] %v10379_v6 }
  0x8b   : > { %8418 = vmatpush3.msra.mxu0 %v13494_v12  ;;  %8454 = vmatpush3.msra.mxu1 %v13495_v40  ;;  %v13507_v12 = vld [vmem:[#allocation34_spill] sm:$0xff] }
  0x8c   : > { %1092 = vmatmul.mubr.f32.gmra.mxu1 %v10217_v9  ;;  %8419 = vmatprep.subr.mxu0 %v13497_v45  ;;  %13500 = vst [vmem:[#allocation20_spill] sm:$0xff] %v10365_v15  ;;  %v13508_v40 = vand.u32 4294901760, %v13507_v12  ;;  %v13510_v45 = vand.u32 4294901760, %v13452_v60  ;;  %v1515_v12 = vld [vmem:[#allocation2 + $0xc8] sm:$0xff]  ;;  %v13515_v60 = vld [vmem:[#allocation38_spill] sm:$0xff]  ;;  %v13542_v9 = vld [vmem:[#allocation39_spill] sm:$0xff] }
  0x8d   : > { %8455 = vmatprep.subr.mxu1 %v9638_v17  ;;  %8420 = vmatpush3.msra.mxu0 %v13499_v0  ;;  %v1517_v17 = vld [vmem:[#allocation2 + $0xd8] sm:$0xff]  ;;  %v1514_v0 = vld [vmem:[#allocation2 + $0xc0] sm:$0xff] }
  0x8e   : > { %8456 = vmatpush3.msra.mxu1 %v13502_v28  ;;  %8421 = vmatprep.subr.mxu0 %v13504_v5  ;;  %v10388_v28 = vsub.f32 %v1521_v20, %v10365_v15  ;;  %v13512_v5 = vand.u32 4294901760, %v10008_v62  ;;  %v1513_v20 = vld [vmem:[#allocation2 + $0xb8] sm:$0xff]  ;;  %v10406_v62 = vand.u32 4294901760, %v1514_v0 }
  0x8f   : > { %8457 = vmatprep.subr.mxu1 %v13505_v42  ;;  %1099 = vmatprep.mubr.f32.mxu1 %v10242_v34  ;;  %v10395_v42 = vand.u32 4294901760, %v1516_v25  ;;  %v13520_v34 = vld [vmem:[#allocation18_spill] sm:$0xff] }
  0x90   : > { %8422 = vmatpush3.msra.mxu0 %v13508_v40  ;;  %8458 = vmatpush3.msra.mxu1 %v13449_v7  ;;  %v10393_v7 = vand.u32 4294901760, %v1517_v17  ;;  %v13516_v40 = vand.u32 4294901760, %v13515_v60  ;;  %13519 = vst [vmem:[#allocation29_spill] sm:$0xff] %v10406_v62  ;;  %v10414_v60 = vand.u32 4294901760, %v1515_v12  ;;  %v13171_v1 = vand.u32 4294901760, %v10388_v28 }
  0x91   : > { %1103 = vmatmul.mubr.f32.gmra.mxu1 %v10251_v22  ;;  %8423 = vmatprep.subr.mxu0 %v13510_v45  ;;  %13514 = vst [vmem:[#allocation26_spill] sm:$0xff] %v10395_v42  ;;  %v13517_v45 = vld [vmem:[#allocation17_spill] sm:$0xff]  ;;  %v10409_v22 = vsub.f32 %v1519_v4, %v10379_v6  ;;  %v10422_v4 = vsub.f32 %v1516_v25, %v10395_v42 }
  0x92   : > { %8459 = vmatprep.subr.mxu1 %v13511_v8  ;;  %8424 = vmatpush3.msra.mxu0 %v13512_v5  ;;  %13513 = vst [vmem:[#allocation25_spill] sm:$0xff] %v10393_v7  ;;  %v13518_v8 = vand.u32 4294901760, %v10043_v36  ;;  %v1512_v5 = vld [vmem:[#allocation2 + $0xb0] sm:$0xff]  ;;  %13522 = vst [vmem:[#allocation31_spill] sm:$0xff] %v10414_v60  ;;  %v13523_v36 = vand.u32 4294901760, %v10069_v50  ;;  %v13527_v50 = vand.u32 4294901760, %v10090_v19  ;;  %v10439_v25 = vsub.f32 %v1514_v0, %v10406_v62 }
  0x93   : > { %8460 = vmatpush3.msra.mxu1 %v13455_v14  ;;  %8425 = vmatprep.subr.mxu0 %v13516_v40  ;;  %v13521_v14 = vand.u32 4294901760, %v10056_v57  ;;  %v10427_v57 = vsub.f32 %v1517_v17, %v10393_v7  ;;  %v10432_v40 = vand.u32 4294901760, %v1512_v5  ;;  %v13531_v19 = vand.u32 4294901760, %v10385_v59 }
  0x94   : > { %8461 = vmatprep.subr.mxu1 %v13517_v45  ;;  %8426 = vmatpush3.msra.mxu0 %v13518_v8  ;;  %v1510_v45 = vld [vmem:[#allocation2 + $0xa0] sm:$0xff]  ;;  %v10424_v8 = vand.u32 4294901760, %v1513_v20  ;;  %13528 = vst [vmem:[#allocation37_spill] sm:$0xff] %v10439_v25  ;;  %v10460_v17 = vsub.f32 %v1515_v12, %v10414_v60 }
  0x95   : > { %8462 = vmatpush3.msra.mxu1 %v13520_v34  ;;  %8427 = vmatprep.subr.mxu0 %v13521_v14  ;;  %v1511_v34 = vld [vmem:[#allocation2 + $0xa8] sm:$0xff]  ;;  %v13525_v14 = vand.u32 4294901760, %v10081_v13  ;;  %13526 = vst [vmem:[#allocation35_spill] sm:$0xff] %v10432_v40  ;;  %v13530_v13 = vand.u32 4294901760, %v10108_v61  ;;  %v10455_v0 = vsub.f32 %v10385_v59, %v13531_v19  ;;  %v13533_v61 = vand.u32 4294901760, %v10117_v49 }
  0x96   : > { %8463 = vmatprep.subr.mxu1 %v13459_v32  ;;  %8428 = vmatpush3.msra.mxu0 %v13523_v36  ;;  %13524 = vst [vmem:[#allocation33_spill] sm:$0xff] %v10424_v8  ;;  %v13172_v32 = vand.u32 4294901760, %v10401_v38  ;;  %v10442_v36 = vand.u32 4294901760, %v1510_v45  ;;  %v13535_v19 = vand.u32 4294901760, %v10131_v51  ;;  %v10474_v12 = vsub.f32 %v1512_v5, %v10432_v40 }
  0x97   : > { %8464 = vmatpush3.msra.mxu1 %v13461_v11  ;;  %8429 = vmatprep.subr.mxu0 %v13525_v14  ;;  %v1508_v11 = vld [vmem:[#allocation2 + $0x90] sm:$0xff]  ;;  %v10457_v14 = vand.u32 4294901760, %v1511_v34 }
  0x98   : > { %8465 = vmatprep.subr.mxu1 %v13462_v46  ;;  %8430 = vmatpush3.msra.mxu0 %v13527_v50  ;;  %13529 = vst [vmem:[#allocation8_spill] sm:$0xff] %v10442_v36  ;;  %v10450_v46 = vsub.f32 %v10388_v28, %v13171_v1  ;;  %v1509_v50 = vld [vmem:[#allocation2 + $0x98] sm:$0xff]  ;;  %v10468_v1 = vsub.f32 %v1513_v20, %v10424_v8  ;;  %13536 = vst [vmem:[#allocation10_spill] sm:$0xff] %v10474_v12  ;;  %v13538_v20 = vand.u32 4294901760, %v10140_v29 }
  0x99   : > { %8466 = vmatpush3.msra.mxu1 %v13463_v10  ;;  %8431 = vmatprep.subr.mxu0 %v13530_v13  ;;  %13532 = vst [vmem:[#allocation24_spill] sm:$0xff] %v10457_v14  ;;  %v10479_v49 = vsub.f32 %v10401_v38, %v13172_v32  ;;  %v10492_v5 = vsub.f32 %v1510_v45, %v10442_v36  ;;  %v1506_v32 = vld [vmem:[#allocation2 + $0x80] sm:$0xff]  ;;  %v1504_v10 = vld [vmem:[#allocation2 + $0x70] sm:$0xff]  ;;  %v13545_v13 = vand.u32 4294901760, %v10427_v57  ;;  %v13562_v30 = vand.u32 4294901760, %v10474_v12 }
  0x9a   : > { %8467 = vmatprep.subr.mxu1 %v13464_v44  ;;  %8432 = vmatpush3.msra.mxu0 %v13533_v61  ;;  %13534 = vst [vmem:[#allocation9_spill] sm:$0xff] %v10468_v1  ;;  %v10481_v44 = vand.u32 4294901760, %v1508_v11  ;;  %v1507_v61 = vld [vmem:[#allocation2 + $0x88] sm:$0xff]  ;;  %v13544_v45 = vld [vmem:[#allocation40_spill] sm:$0xff]  ;;  %v10528_v55 = vand.u32 4294901760, %v1504_v10  ;;  %v13555_v31 = vand.u32 4294901760, %v10468_v1 }
  0x9b   : > { %8468 = vmatpush3.msra.mxu1 %v13465_v16  ;;  %8433 = vmatprep.subr.mxu0 %v13535_v19  ;;  %v13539_v16 = vand.u32 4294901760, %v10409_v22  ;;  %13540 = vst [vmem:[#allocation11_spill] sm:$0xff] %v10492_v5  ;;  %v10494_v19 = vand.u32 4294901760, %v1509_v50  ;;  %v10510_v27 = vsub.f32 %v10427_v57, %v13545_v13  ;;  %v10526_v13 = vand.u32 4294901760, %v1506_v32 }
  0x9c   : > { %13537 = vst [vmem:[#allocation27_spill] sm:$0xff] %v10481_v44  ;;  %8469 = vmatprep.subr.mxu1 %v13466_v54  ;;  %8434 = vmatpush3.msra.mxu0 %v13538_v20  ;;  %v10517_v54 = vand.u32 4294901760, %v1507_v61  ;;  %v1505_v20 = vld [vmem:[#allocation2 + $0x78] sm:$0xff]  ;;  %v10524_v41 = vsub.f32 %v1508_v11, %v10481_v44  ;;  %13550 = vst [vmem:[#allocation34_spill] sm:$0xff] %v10528_v55  ;;  %v1502_v11 = vld [vmem:[#allocation2 + $0x60] sm:$0xff]  ;;  %v10560_v56 = vsub.f32 %v10468_v1, %v13555_v31 }
  0x9d   : > { %v10489_v51 = vsub.f32 %v10409_v22, %v13539_v16  ;;  %13541 = vst [vmem:[#allocation28_spill] sm:$0xff] %v10494_v19  ;;  %1269 = vmatprep.mubr.f32.mxu0 %v13542_v9  ;;  %8470 = vmatpush3.msra.mxu1 %v9903_v63  ;;  %v10503_v16 = vsub.f32 %v1511_v34, %v10457_v14  ;;  %v13546_v63 = vand.u32 4294901760, %v10422_v4  ;;  %13549 = vst [vmem:[#allocation13_spill] sm:$0xff] %v10526_v13  ;;  %v1501_v31 = vld [vmem:[#allocation2 + $0x58] sm:$0xff] }
  0x9e   : > { %1271 = vmatmul.mubr.f32.vlgmr.msra.gmra.mxu0 %v13544_v45  ;;  %8471 = vmatprep.subr.mxu1 %v9920_v39  ;;  %13547 = vst [vmem:[#allocation12_spill] sm:$0xff] %v10517_v54  ;;  %13548 = vst [vmem:[#allocation32_spill] sm:$0xff] %v10524_v41  ;;  %v13551_v34 = vand.u32 4294901760, %v10439_v25  ;;  %v1503_v39 = vld [vmem:[#allocation2 + $0x68] sm:$0xff]  ;;  %v10540_v21 = vsub.f32 %v1509_v50, %v10494_v19  ;;  %v10549_v43 = vand.u32 4294901760, %v1505_v20  ;;  %v13577_v1 = vand.u32 4294901760, %v10450_v46 }
  0x9f   : > { %13543 = vst [vmem:[#allocation30_spill] sm:$0xff] %v10503_v16  ;;  %v10515_v29 = vsub.f32 %v10422_v4, %v13546_v63  ;;  %1555 = vmatprep.subr.mxu0 %v10365_v15  ;;  %8472 = vmatpush3.msra.mxu1 %v13469_v58  ;;  %v10563_v52 = vsub.f32 %v1507_v61, %v10517_v54  ;;  %v10573_v35 = vand.u32 4294901760, %v1503_v39  ;;  %v10575_v58 = vand.u32 4294901760, %v1502_v11 }
  0xa0   : > { %1557 = vmatpush1.msra.mxu0 %v10367_v3  ;;  %8473 = vmatprep.subr.mxu1 %v13471_v2  ;;  %v10536_v37 = vsub.f32 %v10439_v25, %v13551_v34  ;;  %13552 = vst [vmem:[#allocation15_spill] sm:$0xff] %v10540_v21  ;;  %v13553_v2 = vand.u32 4294901760, %v10460_v17  ;;  %13554 = vst [vmem:[#allocation38_spill] sm:$0xff] %v10549_v43  ;;  %v13557_v34 = vld [vmem:[#allocation48_spill] sm:$0xff]  ;;  %v10571_v50 = vsub.f32 %v1504_v10, %v10528_v55  ;;  %v1499_v10 = vld [vmem:[#allocation2 + $0x48] sm:$0xff] }
  0xa1   : > { %1559 = vmatprep.subr.mxu0 %v10379_v6  ;;  %1276 = vmatprep.mubr.f32.mxu0 %v10142_v47  ;;  %13556 = vst [vmem:[#allocation17_spill] sm:$0xff] %v10563_v52  ;;  %13560 = vst [vmem:[#allocation68_spill] sm:$0xff] %v10573_v35  ;;  %v13564_v6 = vand.u32 4294901760, %v10492_v5 }
  0xa2   : > { %v10547_v63 = vsub.f32 %v10460_v17, %v13553_v2  ;;  %8474 = vmatpush3.msra.mxu1 %v13472_v53  ;;  %1561 = vmatpush1.msra.mxu0 %v10374_v23  ;;  %v1500_v2 = vld [vmem:[#allocation2 + $0x50] sm:$0xff]  ;;  %v10568_v53 = vsub.f32 %v1506_v32, %v10526_v13  ;;  %13559 = vst [vmem:[#allocation67_spill] sm:$0xff] %v10571_v50  ;;  %13561 = vst [vmem:[#allocation69_spill] sm:$0xff] %v10575_v58  ;;  %v1498_v23 = vld [vmem:[#allocation2 + $0x40] sm:$0xff] }
  0xa3   : > { %1278 = vmatmul.mubr.f32.gmra.mxu0 %v13557_v34  ;;  %8475 = vmatprep.subr.mxu1 %v13474_v18  ;;  %v10583_v18 = vsub.f32 %v10474_v12, %v13562_v30  ;;  %v10598_v30 = vsub.f32 %v10492_v5, %v13564_v6  ;;  %v10600_v32 = vand.u32 4294901760, %v1500_v2  ;;  %v10614_v6 = vsub.f32 %v1502_v11, %v10575_v58 }
  0xa4   : > { %13558 = vst [vmem:[#allocation18_spill] sm:$0xff] %v10568_v53  ;;  %1563 = vmatprep.subr.mxu0 %v10393_v7  ;;  %8476 = vmatpush3.msra.mxu1 %v13476_v33  ;;  %v13563_v33 = vand.u32 4294901760, %v10503_v16  ;;  %v10605_v7 = vand.u32 4294901760, %v1501_v31  ;;  %v10616_v5 = vand.u32 4294901760, %v1498_v23  ;;  %v13573_v11 = vand.u32 4294901760, %v10524_v41 }
  0xa5   : > { %1565 = vmatpush1.msra.mxu0 %v10395_v42  ;;  %8477 = vmatprep.subr.mxu1 %v10021_v48  ;;  %13565 = vst [vmem:[#allocation70_spill] sm:$0xff] %v10600_v32  ;;  %v13566_v42 = vld [vmem:[#allocation50_spill] sm:$0xff]  ;;  %13569 = vst [vmem:[#allocation73_spill] sm:$0xff] %v10614_v6  ;;  %v10620_v48 = vsub.f32 %v1503_v39, %v10573_v35  ;;  %v13575_v39 = vld [vmem:[#allocation52_spill] sm:$0xff]  ;;  %v10642_v15 = vsub.f32 %v1500_v2, %v10600_v32  ;;  %v13583_v46 = vand.u32 4294901760, %v10568_v53 }
  0xa6   : > { %v10593_v61 = vsub.f32 %v10503_v16, %v13563_v33  ;;  %1567 = vmatprep.subr.mxu0 %v10414_v60  ;;  %1283 = vmatprep.mubr.f32.mxu0 %v13566_v42  ;;  %13567 = vst [vmem:[#allocation71_spill] sm:$0xff] %v10605_v7  ;;  %v10609_v33 = vsub.f32 %v1505_v20, %v10549_v43  ;;  %13570 = vst [vmem:[#allocation74_spill] sm:$0xff] %v10616_v5  ;;  %v1496_v16 = vld [vmem:[#allocation2 + $0x30] sm:$0xff]  ;;  %v10635_v60 = vand.u32 4294901760, %v1499_v10  ;;  %v1495_v20 = vld [vmem:[#allocation2 + $0x28] sm:$0xff] }
  0xa7   : > { %8478 = vmatpush3.msra.mxu1 %v10039_v24  ;;  %1394 = vmatprep.mubr.f32.mxu1 %v13542_v9  ;;  %13571 = vst [vmem:[#allocation75_spill] sm:$0xff] %v10620_v48  ;;  %v13572_v24 = vand.u32 4294901760, %v10540_v21  ;;  %v10633_v12 = vsub.f32 %v10524_v41, %v13573_v11  ;;  %13576 = vst [vmem:[#allocation77_spill] sm:$0xff] %v10642_v15  ;;  %v13578_v11 = vand.u32 4294901760, %v10563_v52  ;;  %v1494_v2 = vld [vmem:[#allocation2 + $0x20] sm:$0xff] }
  0xa8   : > { %13568 = vst [vmem:[#allocation72_spill] sm:$0xff] %v10609_v33  ;;  %1569 = vmatpush1.msra.mxu0 %v10406_v62  ;;  %1396 = vmatmul.mubr.f32.vlgmr.msra.gmra.mxu1 %v13544_v45  ;;  %13574 = vst [vmem:[#allocation76_spill] sm:$0xff] %v10635_v60  ;;  %v10657_v45 = vsub.f32 %v1501_v31, %v10605_v7  ;;  %v13584_v31 = vand.u32 4294901760, %v10489_v51  ;;  %v10680_v25 = vsub.f32 %v1499_v10, %v10635_v60 }
  0xa9   : > { %v10628_v3 = vsub.f32 %v10540_v21, %v13572_v24  ;;  %1285 = vmatmul.mubr.f32.gmra.mxu0 %v13575_v39  ;;  %1571 = vmatprep.subr.mxu0 %v10424_v8  ;;  %v1497_v24 = vld [vmem:[#allocation2 + $0x38] sm:$0xff]  ;;  %v10651_v41 = vsub.f32 %v10563_v52, %v13578_v11  ;;  %v10654_v8 = vand.u32 4294901760, %v1496_v16  ;;  %v13581_v21 = vand.u32 4294901760, %v10455_v0  ;;  %v13585_v52 = vld [vmem:[#allocation57_spill] sm:$0xff] }
  0xaa   : > { %1752 = vmatprep.subr.mxu1 %v13577_v1  ;;  %1573 = vmatpush1.msra.mxu0 %v10432_v40  ;;  %13580 = vst [vmem:[#allocation79_spill] sm:$0xff] %v10657_v45  ;;  %v10663_v1 = vsub.f32 %v1498_v23, %v10616_v5  ;;  %v10668_v11 = vsub.f32 %v10568_v53, %v13583_v46  ;;  %v10677_v23 = vand.u32 4294901760, %v1497_v24  ;;  %13587 = vst [vmem:[#allocation82_spill] sm:$0xff] %v10680_v25  ;;  %v1493_v0 = vld [vmem:[#allocation2 + $0x18] sm:$0xff] }
  0xab   : > { %13579 = vst [vmem:[#allocation78_spill] sm:$0xff] %v10654_v8  ;;  %1758 = vmatpush1.msra.mxu1 %v13581_v21  ;;  %1575 = vmatprep.subr.mxu0 %v10457_v14  ;;  %v1492_v14 = vld [vmem:[#allocation2 + $0x10] sm:$0xff]  ;;  %v13588_v46 = vand.u32 4294901760, %v10571_v50  ;;  %v10691_v21 = vand.u32 4294901760, %v1494_v2  ;;  %v13591_v62 = vand.u32 4294901760, %v10479_v49  ;;  %v13594_v49 = vand.u32 4294901760, %v10620_v48 }
  0xac   : > { %13582 = vst [vmem:[#allocation80_spill] sm:$0xff] %v10663_v1  ;;  %1764 = vmatprep.subr.mxu1 %v13584_v31  ;;  %1290 = vmatprep.mubr.f32.mxu0 %v13585_v52  ;;  %13586 = vst [vmem:[#allocation81_spill] sm:$0xff] %v10677_v23  ;;  %v10689_v31 = vand.u32 4294901760, %v1495_v20  ;;  %v13595_v40 = vand.u32 4294901760, %v10614_v6 }
  0xad   : > { %1401 = vmatprep.mubr.f32.mxu1 %v10142_v47  ;;  %1577 = vmatpush1.msra.mxu0 %v10442_v36  ;;  %v10687_v51 = vsub.f32 %v10571_v50, %v13588_v46  ;;  %13590 = vst [vmem:[#allocation84_spill] sm:$0xff] %v10691_v21  ;;  %v13592_v47 = vand.u32 4294901760, %v10609_v33  ;;  %v10704_v46 = vsub.f32 %v1496_v16, %v10654_v8  ;;  %v10720_v16 = vand.u32 4294901760, %v1492_v14  ;;  %v1490_v50 = vld [vmem:[#allocation2] sm:$0xff] }
  0xae   : > { %13589 = vst [vmem:[#allocation83_spill] sm:$0xff] %v10689_v31  ;;  %1770 = vmatpush1.msra.mxu1 %v13591_v62  ;;  %1292 = vmatmul.mubr.f32.gmra.mxu0 %v10208_v26  ;;  %v10713_v10 = vsub.f32 %v10620_v48, %v13594_v49  ;;  %v10725_v62 = vand.u32 4294901760, %v1493_v0  ;;  %v10730_v48 = vsub.f32 %v1497_v24, %v10677_v23  ;;  %v13604_v24 = vand.u32 4294901760, %v10547_v63  ;;  %v1551_v63 = vld [vmem:[#allocation2 + $0x1e8] sm:$0xff] }
  0xaf   : > { %v10701_v36 = vsub.f32 %v10609_v33, %v13592_v47  ;;  %13593 = vst [vmem:[#allocation85_spill] sm:$0xff] %v10704_v46  ;;  %1403 = vmatmul.mubr.f32.gmra.mxu1 %v13557_v34  ;;  %1579 = vmatprep.subr.mxu0 %v10494_v19  ;;  %v10718_v47 = vsub.f32 %v10614_v6, %v13595_v40  ;;  %13596 = vst [vmem:[#allocation86_spill] sm:$0xff] %v10720_v16  ;;  %v1491_v33 = vld [vmem:[#allocation2 + $0x8] sm:$0xff]  ;;  %v13597_v34 = vand.u32 4294901760, %v10510_v27  ;;  %v1552_v19 = vld [vmem:[#allocation2 + $0x1f0] sm:$0xff] }
  0xb0   : > { %1581 = vmatpush1.msra.mxu0 %v10481_v44  ;;  %13598 = vst [vmem:[#allocation87_spill] sm:$0xff] %v10725_v62  ;;  %13599 = vst [vmem:[#allocation88_spill] sm:$0xff] %v10730_v48  ;;  %v13600_v40 = vand.u32 4294901760, %v10515_v29  ;;  %v10737_v27 = vsub.f32 %v1494_v2, %v10691_v21  ;;  %v10745_v49 = vsub.f32 %v1495_v20, %v10689_v31  ;;  %1408 = vmatprep.mubr.f32.mxu1 %v13566_v42 }
  0xb1   : > { %1776 = vmatprep.subr.mxu1 %v13597_v34  ;;  %1583 = vmatprep.subr.mxu0 %v10517_v54  ;;  %v13602_v34 = vand.u32 4294901760, %v10642_v15  ;;  %v10756_v6 = vand.u32 4294901760, %v1491_v33  ;;  %v1553_v54 = vld [vmem:[#allocation2 + $0x1f8] sm:$0xff]  ;;  %v13608_v20 = vand.u32 4294901760, %v10536_v37  ;;  %v10766_v29 = vsub.f32 %v1492_v14, %v10720_v16 }
  0xb2   : > { %1782 = vmatpush1.msra.mxu1 %v13600_v40  ;;  %13601 = vst [vmem:[#allocation89_spill] sm:$0xff] %v10737_v27  ;;  %13603 = vst [vmem:[#allocation90_spill] sm:$0xff] %v10745_v49  ;;  %v13605_v40 = vand.u32 4294901760, %v10657_v45  ;;  %1585 = vmatpush1.msra.mxu0 %v10526_v13  ;;  %v13610_v42 = vand.u32 4294901760, %v10680_v25  ;;  %v13611_v37 = vand.u32 4294901760, %v10663_v1  ;;  %v10782_v14 = vand.u32 4294901760, %v1552_v19 }
  0xb3   : > { %v10742_v44 = vsub.f32 %v10642_v15, %v13602_v34  ;;  %1788 = vmatprep.subr.mxu1 %v13604_v24  ;;  %13606 = vst [vmem:[#allocation91_spill] sm:$0xff] %v10756_v6  ;;  %v10758_v34 = vand.u32 4294901760, %v1490_v50  ;;  %13609 = vst [vmem:[#allocation93_spill] sm:$0xff] %v10766_v29  ;;  %1410 = vmatmul.mubr.f32.gmra.mxu1 %v13575_v39  ;;  %v13613_v39 = vand.u32 4294901760, %v10560_v56  ;;  %v13615_v24 = vand.u32 4294901760, %v10583_v18 }
  0xb4   : > { %v10754_v2 = vsub.f32 %v10657_v45, %v13605_v40  ;;  %1794 = vmatpush1.msra.mxu1 %v13608_v20  ;;  %1587 = vmatprep.subr.mxu0 %v10549_v43  ;;  %v10774_v13 = vsub.f32 %v10680_v25, %v13610_v42  ;;  %v10779_v20 = vsub.f32 %v10663_v1, %v13611_v37  ;;  %v1550_v40 = vld [vmem:[#allocation2 + $0x1e0] sm:$0xff]  ;;  %v10788_v42 = vand.u32 4294901760, %v1553_v54  ;;  %v1549_v43 = vld [vmem:[#allocation2 + $0x1d8] sm:$0xff] }
  0xb5   : > { %13607 = vst [vmem:[#allocation92_spill] sm:$0xff] %v10758_v34  ;;  %13612 = vst [vmem:[#allocation94_spill] sm:$0xff] %v10782_v14  ;;  %1800 = vmatprep.subr.mxu1 %v13613_v39  ;;  %1589 = vmatpush1.msra.mxu0 %v10528_v55  ;;  %v10792_v37 = vsub.f32 %v1493_v0, %v10725_v62  ;;  %v10799_v56 = vsub.f32 %v1490_v50, %v10758_v34  ;;  %v1548_v55 = vld [vmem:[#allocation2 + $0x1d0] sm:$0xff]  ;;  %v13616_v0 = vand.u32 4294901760, %v10593_v61 }
  0xb6   : > { %13614 = vst [vmem:[#allocation95_spill] sm:$0xff] %v10788_v42  ;;  %1806 = vmatpush1.msra.mxu1 %v13615_v24  ;;  %1591 = vmatprep.subr.mxu0 %v10573_v35  ;;  %v10803_v15 = vsub.f32 %v1491_v33, %v10756_v6  ;;  %v13617_v18 = vand.u32 4294901760, %v10704_v46  ;;  %v10813_v1 = vand.u32 4294901760, %v1551_v63  ;;  %v10815_v50 = vand.u32 4294901760, %v1550_v40 }
  0xb7   : > { %1812 = vmatprep.subr.mxu1 %v13616_v0  ;;  %1415 = vmatprep.mubr.f32.mxu1 %v13585_v52  ;;  %v13620_v33 = vand.u32 4294901760, %v10598_v30  ;;  %v13621_v25 = vand.u32 4294901760, %v10730_v48  ;;  %v10829_v52 = vsub.f32 %v1552_v19, %v10782_v14  ;;  %v13623_v39 = vand.u32 4294901760, %v10745_v49 }
  0xb8   : > { %v10811_v24 = vsub.f32 %v10704_v46, %v13617_v18  ;;  %13618 = vst [vmem:[#allocation96_spill] sm:$0xff] %v10813_v1  ;;  %13619 = vst [vmem:[#allocation97_spill] sm:$0xff] %v10815_v50  ;;  %1593 = vmatpush1.msra.mxu0 %v10575_v58  ;;  %1417 = vmatmul.mubr.f32.gmra.mxu1 %v10208_v26  ;;  %v10841_v61 = vand.u32 4294901760, %v1548_v55  ;;  %v1546_v58 = vld [vmem:[#allocation2 + $0x1c0] sm:$0xff]  ;;  %v13626_v19 = vand.u32 4294901760, %v10628_v3  ;;  %v13627_v26 = vand.u32 4294901760, %v10737_v27 }
  0xb9   : > { %1818 = vmatpush1.msra.mxu1 %v13620_v33  ;;  %v10826_v18 = vsub.f32 %v10730_v48, %v13621_v25  ;;  %13622 = vst [vmem:[#allocation98_spill] sm:$0xff] %v10829_v52  ;;  %1595 = vmatprep.subr.mxu0 %v10605_v7  ;;  %v10836_v30 = vsub.f32 %v10745_v49, %v13623_v39  ;;  %v10838_v33 = vand.u32 4294901760, %v1549_v43  ;;  %v1547_v25 = vld [vmem:[#allocation2 + $0x1c8] sm:$0xff]  ;;  %v1544_v49 = vld [vmem:[#allocation2 + $0x1b0] sm:$0xff]  ;;  %v13629_v46 = vand.u32 4294901760, %v10633_v12 }
  0xba   : > { %13625 = vst [vmem:[#allocation100_spill] sm:$0xff] %v10841_v61  ;;  %1824 = vmatprep.subr.mxu1 %v13626_v19  ;;  %1597 = vmatpush1.msra.mxu0 %v10600_v32  ;;  %v10849_v7 = vsub.f32 %v10737_v27, %v13627_v26  ;;  %v10854_v0 = vsub.f32 %v1553_v54, %v10788_v42  ;;  %v13631_v26 = vand.u32 4294901760, %v10766_v29  ;;  %v13633_v54 = vand.u32 4294901760, %v10651_v41 }
  0xbb   : > { %13624 = vst [vmem:[#allocation99_spill] sm:$0xff] %v10838_v33  ;;  %1830 = vmatpush1.msra.mxu1 %v13629_v46  ;;  %1599 = vmatprep.subr.mxu0 %v10635_v60  ;;  %v10861_v19 = vsub.f32 %v1550_v40, %v10815_v50  ;;  %v10869_v35 = vsub.f32 %v1551_v63, %v10813_v1  ;;  %v10875_v46 = vand.u32 4294901760, %v1547_v25  ;;  %v10877_v3 = vand.u32 4294901760, %v1546_v58  ;;  %v1545_v40 = vld [vmem:[#allocation2 + $0x1b8] sm:$0xff] }
  0xbc   : > { %13628 = vst [vmem:[#allocation101_spill] sm:$0xff] %v10854_v0  ;;  %v10866_v39 = vsub.f32 %v10766_v29, %v13631_v26  ;;  %1836 = vmatprep.subr.mxu1 %v13633_v54  ;;  %1601 = vmatpush1.msra.mxu0 %v10616_v5  ;;  %v13636_v26 = vand.u32 4294901760, %v10668_v11  ;;  %v13637_v41 = vand.u32 4294901760, %v10792_v37  ;;  %v10890_v12 = vsub.f32 %v1548_v55, %v10841_v61  ;;  %v1542_v29 = vld [vmem:[#allocation2 + $0x1a0] sm:$0xff] }
  0xbd   : > { %13630 = vst [vmem:[#allocation102_spill] sm:$0xff] %v10861_v19  ;;  %13632 = vst [vmem:[#allocation103_spill] sm:$0xff] %v10869_v35  ;;  %1603 = vmatprep.subr.mxu0 %v10677_v23  ;;  %v10892_v5 = vand.u32 4294901760, %v1544_v49  ;;  %v13640_v32 = vand.u32 4294901760, %v10701_v36  ;;  %v1543_v23 = vld [vmem:[#allocation2 + $0x1a8] sm:$0xff]  ;;  %v13643_v36 = vand.u32 4294901760, %v10687_v51  ;;  %v10923_v55 = vsub.f32 %v1546_v58, %v10877_v3  ;;  %2132 = vmatprep.mubr.f32.mxu1 %v13542_v9 }
  0xbe   : > { %13634 = vst [vmem:[#allocation104_spill] sm:$0xff] %v10875_v46  ;;  %13635 = vst [vmem:[#allocation105_spill] sm:$0xff] %v10877_v3  ;;  %1842 = vmatpush1.msra.mxu1 %v13636_v26  ;;  %v10887_v54 = vsub.f32 %v10792_v37, %v13637_v41  ;;  %1605 = vmatpush1.msra.mxu0 %v10654_v8  ;;  %v13641_v26 = vand.u32 4294901760, %v10803_v15  ;;  %v13642_v41 = vand.u32 4294901760, %v10799_v56  ;;  %v10913_v11 = vand.u32 4294901760, %v1545_v40  ;;  %v13741_v9 = vld [vmem:[#allocation72_spill] sm:$0xff] }
  0xbf   : > { %13638 = vst [vmem:[#allocation106_spill] sm:$0xff] %v10890_v12  ;;  %13639 = vst [vmem:[#allocation107_spill] sm:$0xff] %v10892_v5  ;;  %1848 = vmatprep.subr.mxu1 %v13640_v32  ;;  %1607 = vmatprep.subr.mxu0 %v10689_v31  ;;  %v10917_v8 = vsub.f32 %v1549_v43, %v10838_v33  ;;  %v13648_v51 = vand.u32 4294901760, %v10829_v52  ;;  %v1541_v31 = vld [vmem:[#allocation2 + $0x198] sm:$0xff]  ;;  %v10932_v43 = vsub.f32 %v1547_v25, %v10875_v46 }
  0xc0   : > { %v10901_v63 = vsub.f32 %v10803_v15, %v13641_v26  ;;  %v10906_v60 = vsub.f32 %v10799_v56, %v13642_v41  ;;  %1854 = vmatpush1.msra.mxu1 %v13643_v36  ;;  %13644 = vst [vmem:[#allocation108_spill] sm:$0xff] %v10913_v11  ;;  %v13646_v41 = vand.u32 4294901760, %v10713_v10  ;;  %1609 = vmatpush1.msra.mxu0 %v10691_v21  ;;  %13647 = vst [vmem:[#allocation110_spill] sm:$0xff] %v10923_v55  ;;  %v1540_v26 = vld [vmem:[#allocation2 + $0x190] sm:$0xff] }
  0xc1   : > { %13645 = vst [vmem:[#allocation109_spill] sm:$0xff] %v10917_v8  ;;  %v10928_v36 = vsub.f32 %v10829_v52, %v13648_v51  ;;  %13649 = vst [vmem:[#allocation111_spill] sm:$0xff] %v10932_v43  ;;  %v13650_v10 = vand.u32 4294901760, %v10718_v47  ;;  %1611 = vmatprep.subr.mxu0 %v10725_v62  ;;  %v1919_v58 = vand.u32 4294901760, %v10887_v54  ;;  %v10941_v21 = vand.u32 4294901760, %v1543_v23  ;;  %v1539_v62 = vld [vmem:[#allocation2 + $0x188] sm:$0xff] }
  0xc2   : > { %1860 = vmatprep.subr.mxu1 %v13646_v41  ;;  %v10939_v41 = vsub.f32 %v1544_v49, %v10892_v5  ;;  %v10943_v51 = vand.u32 4294901760, %v1542_v29  ;;  %v13654_v32 = vand.u32 4294901760, %v10754_v2  ;;  %1613 = vmatpush1.msra.mxu0 %v10720_v16  ;;  %v13656_v52 = vand.u32 4294901760, %v10742_v44  ;;  %v1536_v47 = vld [vmem:[#allocation2 + $0x170] sm:$0xff] }
  0xc3   : > { %1866 = vmatpush1.msra.mxu1 %v13650_v10  ;;  %13652 = vst [vmem:[#allocation113_spill] sm:$0xff] %v10941_v21  ;;  %v13655_v10 = vand.u32 4294901760, %v10854_v0  ;;  %1615 = vmatprep.subr.mxu0 %v10756_v6  ;;  %v13657_v2 = vand.u32 4294901760, %v10869_v35  ;;  %v10964_v25 = vand.u32 4294901760, %v1541_v31  ;;  %v10967_v16 = vand.u32 4294901760, %v1540_v26 }
  0xc4   : > { %13651 = vst [vmem:[#allocation112_spill] sm:$0xff] %v10939_v41  ;;  %13653 = vst [vmem:[#allocation114_spill] sm:$0xff] %v10943_v51  ;;  %1872 = vmatprep.subr.mxu1 %v13654_v32  ;;  %v13660_v49 = vand.u32 4294901760, %v10774_v13  ;;  %1617 = vmatpush1.msra.mxu0 %v10758_v34  ;;  %v13661_v44 = vand.u32 4294901760, %v10861_v19  ;;  %v10986_v13 = vsub.f32 %v1542_v29, %v10943_v51  ;;  %v13674_v34 = vand.u32 4294901760, %v10836_v30 }
  0xc5   : > { %v10953_v54 = vsub.f32 %v10854_v0, %v13655_v10  ;;  %1878 = vmatpush1.msra.mxu1 %v13656_v52  ;;  %v10962_v32 = vsub.f32 %v10869_v35, %v13657_v2  ;;  %13658 = vst [vmem:[#allocation115_spill] sm:$0xff] %v10964_v25  ;;  %13659 = vst [vmem:[#allocation116_spill] sm:$0xff] %v10967_v16  ;;  %v1538_v10 = vld [vmem:[#allocation2 + $0x180] sm:$0xff]  ;;  %v10980_v35 = vsub.f32 %v1545_v40, %v10913_v11 }
  0xc6   : > { %1884 = vmatprep.subr.mxu1 %v13660_v49  ;;  %v10976_v6 = vsub.f32 %v10861_v19, %v13661_v44  ;;  %v13663_v0 = vand.u32 4294901760, %v10779_v20  ;;  %1619 = vmatprep.subr.mxu0 %v10788_v42  ;;  %13664 = vst [vmem:[#allocation118_spill] sm:$0xff] %v10986_v13  ;;  %v10988_v49 = vand.u32 4294901760, %v1539_v62  ;;  %v10992_v44 = vsub.f32 %v1543_v23, %v10941_v21  ;;  %v1537_v42 = vld [vmem:[#allocation2 + $0x178] sm:$0xff]  ;;  %v1534_v52 = vld [vmem:[#allocation2 + $0x160] sm:$0xff] }
  0xc7   : > { %13662 = vst [vmem:[#allocation117_spill] sm:$0xff] %v10980_v35  ;;  %v13667_v2 = vand.u32 4294901760, %v10826_v18  ;;  %1621 = vmatpush2.msra.mxu0 %v10782_v14  ;;  %v1943_v20 = vand.u32 4294901760, %v10953_v54  ;;  %v11003_v29 = vand.u32 4294901760, %v1538_v10  ;;  %v13670_v23 = vand.u32 4294901760, %v10811_v24 }
  0xc8   : > { %1890 = vmatpush1.msra.mxu1 %v13663_v0  ;;  %13665 = vst [vmem:[#allocation119_spill] sm:$0xff] %v10988_v49  ;;  %13666 = vst [vmem:[#allocation120_spill] sm:$0xff] %v10992_v44  ;;  %v13668_v0 = vand.u32 4294901760, %v10890_v12  ;;  %1623 = vmatprep.subr.mxu0 %v10813_v1  ;;  %v1955_v18 = vand.u32 4294901760, %v10962_v32  ;;  %v11018_v14 = vand.u32 4294901760, %v1536_v47  ;;  %v1961_v24 = vand.u32 4294901760, %v10976_v6 }
  0xc9   : > { %1896 = vmatprep.subr.mxu1 %v13667_v2  ;;  %13669 = vst [vmem:[#allocation121_spill] sm:$0xff] %v11003_v29  ;;  %v13671_v2 = vand.u32 4294901760, %v10917_v8  ;;  %1625 = vmatpush2.msra.mxu0 %v10815_v50  ;;  %v13677_v1 = vand.u32 4294901760, %v10849_v7  ;;  %v11041_v30 = vand.u32 4294901760, %v1537_v42  ;;  %v13683_v50 = vand.u32 4294901760, %v10866_v39 }
  0xca   : > { %v11001_v40 = vsub.f32 %v10890_v12, %v13668_v0  ;;  %1902 = vmatpush1.msra.mxu1 %v13670_v23  ;;  %v11016_v0 = vsub.f32 %v1540_v26, %v10967_v16  ;;  %13673 = vst [vmem:[#allocation123_spill] sm:$0xff] %v11018_v14  ;;  %v13675_v23 = vand.u32 4294901760, %v10932_v43  ;;  %v11031_v26 = vsub.f32 %v1541_v31, %v10964_v25 }
  0xcb   : > { %v11013_v54 = vsub.f32 %v10917_v8, %v13671_v2  ;;  %1908 = vmatprep.subr.mxu1 %v13674_v34  ;;  %1627 = vmatprep.subr.mxu0 %v10838_v33  ;;  %v13678_v34 = vand.u32 4294901760, %v10923_v55  ;;  %13679 = vst [vmem:[#allocation125_spill] sm:$0xff] %v11041_v30  ;;  %v11045_v2 = vsub.f32 %v1539_v62, %v10988_v49  ;;  %v13682_v31 = vand.u32 4294901760, %v10939_v41 }
  0xcc   : > { %13672 = vst [vmem:[#allocation122_spill] sm:$0xff] %v11016_v0  ;;  %v11027_v32 = vsub.f32 %v10932_v43, %v13675_v23  ;;  %13676 = vst [vmem:[#allocation124_spill] sm:$0xff] %v11031_v26  ;;  %1914 = vmatpush1.msra.mxu1 %v13677_v1  ;;  %v1535_v23 = vld [vmem:[#allocation2 + $0x168] sm:$0xff]  ;;  %1629 = vmatpush2.msra.mxu0 %v10841_v61  ;;  %v1973_v7 = vand.u32 4294901760, %v11001_v40  ;;  %v11050_v1 = vsub.f32 %v1538_v10, %v11003_v29  ;;  %v1533_v40 = vld [vmem:[#allocation2 + $0x158] sm:$0xff] }
  0xcd   : > { %v11039_v6 = vsub.f32 %v10923_v55, %v13678_v34  ;;  %13680 = vst [vmem:[#allocation126_spill] sm:$0xff] %v11045_v2  ;;  %1920 = vmatprep.subr.mxu1 %v1919_v58  ;;  %v11055_v34 = vsub.f32 %v10939_v41, %v13682_v31  ;;  %v1532_v55 = vld [vmem:[#allocation2 + $0x150] sm:$0xff]  ;;  %1631 = vmatprep.subr.mxu0 %v10875_v46  ;;  %v1967_v62 = vand.u32 4294901760, %v11013_v54  ;;  %v11065_v10 = vand.u32 4294901760, %v1534_v52  ;;  %v1530_v46 = vld [vmem:[#allocation2 + $0x140] sm:$0xff] }
  0xce   : > { %13681 = vst [vmem:[#allocation127_spill] sm:$0xff] %v11050_v1  ;;  %1926 = vmatpush1.msra.mxu1 %v13683_v50  ;;  %v11063_v58 = vsub.f32 %v1536_v47, %v11018_v14  ;;  %v13685_v31 = vand.u32 4294901760, %v10901_v63  ;;  %1633 = vmatpush2.msra.mxu0 %v10877_v3  ;;  %v1979_v39 = vand.u32 4294901760, %v11027_v32  ;;  %v13686_v50 = vand.u32 4294901760, %v10980_v35 }
  0xcf   : > { %13684 = vst [vmem:[#allocation128_spill] sm:$0xff] %v11065_v10  ;;  %v11077_v54 = vand.u32 4294901760, %v1535_v23  ;;  %v13688_v41 = vand.u32 4294901760, %v10906_v60  ;;  %1635 = vmatprep.subr.mxu0 %v10913_v11  ;;  %v1985_v63 = vand.u32 4294901760, %v11039_v6  ;;  %v11089_v61 = vand.u32 4294901760, %v1532_v55  ;;  %v1528_v11 = vld [vmem:[#allocation2 + $0x130] sm:$0xff] }
  0xd0   : > { %1932 = vmatprep.subr.mxu1 %v13685_v31  ;;  %v11075_v33 = vsub.f32 %v10980_v35, %v13686_v50  ;;  %v13689_v31 = vand.u32 4294901760, %v10992_v44  ;;  %v1531_v50 = vld [vmem:[#allocation2 + $0x148] sm:$0xff]  ;;  %1637 = vmatpush2.msra.mxu0 %v10892_v5  ;;  %v1997_v60 = vand.u32 4294901760, %v11055_v34  ;;  %v11099_v6 = vand.u32 4294901760, %v1533_v40 }
  0xd1   : > { %13687 = vst [vmem:[#allocation129_spill] sm:$0xff] %v11077_v54  ;;  %1938 = vmatpush1.msra.mxu1 %v13688_v41  ;;  %v13690_v41 = vand.u32 4294901760, %v10986_v13  ;;  %1639 = vmatprep.subr.mxu0 %v10941_v21  ;;  %v13694_v34 = vand.u32 4294901760, %v11016_v0  ;;  %v11125_v21 = vand.u32 4294901760, %v1531_v50 }
  0xd2   : > { %v11087_v32 = vsub.f32 %v10992_v44, %v13689_v31  ;;  %1944 = vmatprep.subr.mxu1 %v1943_v20  ;;  %13691 = vst [vmem:[#allocation130_spill] sm:$0xff] %v11099_v6  ;;  %v11102_v31 = vsub.f32 %v1537_v42, %v11041_v30  ;;  %v13693_v44 = vand.u32 4294901760, %v10928_v36  ;;  %v11108_v20 = vsub.f32 %v1534_v52, %v11065_v10  ;;  %v1529_v42 = vld [vmem:[#allocation2 + $0x138] sm:$0xff] }
  0xd3   : > { %v11097_v47 = vsub.f32 %v10986_v13, %v13690_v41  ;;  %v11113_v3 = vsub.f32 %v11016_v0, %v13694_v34  ;;  %v11115_v41 = vand.u32 4294901760, %v1530_v46  ;;  %1641 = vmatpush2.msra.mxu0 %v10943_v51  ;;  %v1991_v36 = vand.u32 4294901760, %v11075_v33  ;;  %13696 = vst [vmem:[#allocation132_spill] sm:$0xff] %v11125_v21  ;;  %v1527_v0 = vld [vmem:[#allocation2 + $0x128] sm:$0xff] }
  0xd4   : > { %13692 = vst [vmem:[#allocation131_spill] sm:$0xff] %v11102_v31  ;;  %1950 = vmatpush2.msra.mxu1 %v13693_v44  ;;  %v13695_v44 = vand.u32 4294901760, %v11031_v26  ;;  %v11128_v34 = vsub.f32 %v1535_v23, %v11077_v54  ;;  %1643 = vmatprep.subr.mxu0 %v10964_v25  ;;  %v2003_v5 = vand.u32 4294901760, %v11087_v32  ;;  %v13697_v33 = vand.u32 4294901760, %v11045_v2  ;;  %v1526_v25 = vld [vmem:[#allocation2 + $0x120] sm:$0xff] }
  0xd5   : > { %1956 = vmatprep.subr.mxu1 %v1955_v18  ;;  %v11133_v18 = vsub.f32 %v1532_v55, %v11089_v61  ;;  %1645 = vmatpush2.msra.mxu0 %v10967_v16  ;;  %v11144_v23 = vand.u32 4294901760, %v1529_v42  ;;  %v11148_v55 = vsub.f32 %v1533_v40, %v11099_v6  ;;  %v13701_v32 = vand.u32 4294901760, %v11102_v31 }
  0xd6   : > { %v11123_v52 = vsub.f32 %v11031_v26, %v13695_v44  ;;  %1962 = vmatpush2.msra.mxu1 %v1961_v24  ;;  %v11138_v51 = vsub.f32 %v11045_v2, %v13697_v33  ;;  %v11140_v44 = vand.u32 4294901760, %v1528_v11  ;;  %v2009_v24 = vand.u32 4294901760, %v11097_v47  ;;  %1647 = vmatprep.subr.mxu0 %v10988_v49  ;;  %v1525_v26 = vld [vmem:[#allocation2 + $0x118] sm:$0xff] }
  0xd7   : > { %1968 = vmatprep.subr.mxu1 %v1967_v62  ;;  %v2021_v33 = vand.u32 4294901760, %v11113_v3  ;;  %v11153_v2 = vsub.f32 %v1530_v46, %v11115_v41  ;;  %v13699_v62 = vand.u32 4294901760, %v11050_v1  ;;  %1649 = vmatpush2.msra.mxu0 %v11003_v29  ;;  %v1524_v3 = vld [vmem:[#allocation2 + $0x110] sm:$0xff]  ;;  %v11165_v46 = vsub.f32 %v1531_v50, %v11125_v21  ;;  %v1523_v29 = vld [vmem:[#allocation2 + $0x108] sm:$0xff] }
  0xd8   : > { %1974 = vmatpush2.msra.mxu1 %v1973_v7  ;;  %v2015_v40 = vand.u32 4294901760, %v11123_v52  ;;  %v11161_v7 = vand.u32 4294901760, %v1527_v0  ;;  %1651 = vmatprep.subr.mxu0 %v11041_v30  ;;  %v11170_v16 = vsub.f32 %v1528_v11, %v11140_v44  ;;  %v2038_v50 = vsub.f32 %v11102_v31, %v13701_v32 }
  0xd9   : > { %13698 = vst [vmem:[#allocation133_spill] sm:$0xff] %v11153_v2  ;;  %v2032_v47 = vsub.f32 %v11050_v1, %v13699_v62  ;;  %1980 = vmatprep.subr.mxu1 %v1979_v39  ;;  %v2027_v62 = vand.u32 4294901760, %v11138_v51  ;;  %v11172_v39 = vand.u32 4294901760, %v1526_v25  ;;  %1653 = vmatpush2.msra.mxu0 %v11018_v14  ;;  %v1522_v51 = vld [vmem:[#allocation2 + $0x100] sm:$0xff]  ;;  %v11183_v11 = vsub.f32 %v1529_v42, %v11144_v23 }
  0xda   : > { %1986 = vmatpush2.msra.mxu1 %v1985_v63  ;;  %13700 = vst [vmem:[#allocation134_spill] sm:$0xff] %v11170_v16  ;;  %v11179_v63 = vand.u32 4294901760, %v1525_v26  ;;  %1655 = vmatprep.subr.mxu0 %v11077_v54  ;;  %v11189_v49 = vand.u32 4294901760, %v1524_v3  ;;  %v13703_v30 = vand.u32 4294901760, %v11128_v34  ;;  %v11196_v31 = vand.u32 4294901760, %v1523_v29 }
  0xdb   : > { %1992 = vmatprep.subr.mxu1 %v1991_v36  ;;  %v2033_v52 = vand.u32 4294901760, %v2032_v47  ;;  %v13702_v36 = vand.u32 4294901760, %v11063_v58  ;;  %1657 = vmatpush2.msra.mxu0 %v11065_v10  ;;  %v11200_v47 = vsub.f32 %v1527_v0, %v11161_v7  ;;  %v11209_v10 = vand.u32 4294901760, %v1522_v51 }
  0xdc   : > { %1998 = vmatpush2.msra.mxu1 %v1997_v60  ;;  %v2050_v42 = vsub.f32 %v11128_v34, %v13703_v30  ;;  %1659 = vmatprep.subr.mxu0 %v11099_v6  ;;  %v2039_v60 = vand.u32 4294901760, %v2038_v50  ;;  %v13706_v0 = vand.u32 4294901760, %v11148_v55  ;;  %v11222_v54 = vsub.f32 %v1524_v3, %v11189_v49  ;;  %v13721_v30 = vld [vmem:[#allocation45_spill] sm:$0xff] }
  0xdd   : > { %v2044_v14 = vsub.f32 %v11063_v58, %v13702_v36  ;;  %2004 = vmatprep.subr.mxu1 %v2003_v5  ;;  %13704 = vst [vmem:[#allocation135_spill] sm:$0xff] %v11200_v47  ;;  %v11204_v36 = vsub.f32 %v1526_v25, %v11172_v39  ;;  %v13705_v5 = vand.u32 4294901760, %v11108_v20  ;;  %1661 = vmatpush2.msra.mxu0 %v11089_v61 }
  0xde   : > { %2010 = vmatpush2.msra.mxu1 %v2009_v24  ;;  %v2062_v24 = vsub.f32 %v11148_v55, %v13706_v0  ;;  %v11218_v25 = vsub.f32 %v1525_v26, %v11179_v63  ;;  %1663 = vmatprep.subr.mxu0 %v11125_v21  ;;  %13708 = vst [vmem:[#allocation137_spill] sm:$0xff] %v11222_v54  ;;  %v2051_v0 = vand.u32 4294901760, %v2050_v42  ;;  %v13710_v26 = vand.u32 4294901760, %v11165_v46 }
  0xdf   : > { %v2056_v32 = vsub.f32 %v11108_v20, %v13705_v5  ;;  %2016 = vmatprep.subr.mxu1 %v2015_v40  ;;  %v2045_v5 = vand.u32 4294901760, %v2044_v14  ;;  %v13709_v40 = vand.u32 4294901760, %v11133_v18  ;;  %1665 = vmatpush2.msra.mxu0 %v11115_v41  ;;  %v11234_v14 = vsub.f32 %v1523_v29, %v11196_v31 }
  0xe0   : > { %13707 = vst [vmem:[#allocation136_spill] sm:$0xff] %v11218_v25  ;;  %2022 = vmatpush2.msra.mxu1 %v2021_v33  ;;  %v2074_v33 = vsub.f32 %v11165_v46, %v13710_v26  ;;  %1667 = vmatprep.subr.mxu0 %v11144_v23  ;;  %v2063_v26 = vand.u32 4294901760, %v2062_v24  ;;  %v13714_v29 = vand.u32 4294901760, %v11183_v11  ;;  %v13716_v24 = vand.u32 4294901760, %v11200_v47 }
  0xe1   : > { %v2068_v50 = vsub.f32 %v11133_v18, %v13709_v40  ;;  %2028 = vmatprep.subr.mxu1 %v2027_v62  ;;  %13711 = vst [vmem:[#allocation138_spill] sm:$0xff] %v11234_v14  ;;  %v2057_v3 = vand.u32 4294901760, %v2056_v32  ;;  %v11238_v40 = vsub.f32 %v1522_v51, %v11209_v10  ;;  %v13713_v62 = vand.u32 4294901760, %v11153_v2  ;;  %1669 = vmatpush2.msra.mxu0 %v11140_v44 }
  0xe2   : > { %2034 = vmatpush2.msra.mxu1 %v2033_v52  ;;  %v2086_v52 = vsub.f32 %v11183_v11, %v13714_v29  ;;  %1671 = vmatprep.subr.mxu0 %v11161_v7  ;;  %v13715_v32 = vand.u32 4294901760, %v11170_v16  ;;  %v2098_v29 = vsub.f32 %v11200_v47, %v13716_v24 }
  0xe3   : > { %13712 = vst [vmem:[#allocation139_spill] sm:$0xff] %v11238_v40  ;;  %v2080_v42 = vsub.f32 %v11153_v2, %v13713_v62  ;;  %2040 = vmatprep.subr.mxu1 %v2039_v60  ;;  %v2069_v51 = vand.u32 4294901760, %v2068_v50  ;;  %1673 = vmatpush2.msra.mxu0 %v11172_v39  ;;  %v2075_v60 = vand.u32 4294901760, %v2074_v33  ;;  %v13717_v50 = vand.u32 4294901760, %v11204_v36 }
  0xe4   : > { %2046 = vmatpush2.msra.mxu1 %v2045_v5  ;;  %v2092_v62 = vsub.f32 %v11170_v16, %v13715_v32  ;;  %1675 = vmatprep.subr.mxu0 %v11179_v63  ;;  %v13718_v33 = vand.u32 4294901760, %v11218_v25 }
  0xe5   : > { %2052 = vmatprep.subr.mxu1 %v2051_v0  ;;  %v2081_v5 = vand.u32 4294901760, %v2080_v42  ;;  %v2104_v32 = vsub.f32 %v11204_v36, %v13717_v50  ;;  %1677 = vmatpush2.msra.mxu0 %v11189_v49  ;;  %v2087_v0 = vand.u32 4294901760, %v2086_v52  ;;  %v13719_v42 = vand.u32 4294901760, %v11222_v54 }
  0xe6   : > { %2058 = vmatpush2.msra.mxu1 %v2057_v3  ;;  %v2110_v24 = vsub.f32 %v11218_v25, %v13718_v33  ;;  %1679 = vmatprep.subr.mxu0 %v11196_v31  ;;  %v2093_v3 = vand.u32 4294901760, %v2092_v62  ;;  %v2099_v50 = vand.u32 4294901760, %v2098_v29 }
  0xe7   : > { %2064 = vmatprep.subr.mxu1 %v2063_v26  ;;  %v2116_v6 = vsub.f32 %v11222_v54, %v13719_v42  ;;  %1681 = vmatpush2.msra.mxu0 %v11209_v10  ;;  %v13720_v26 = vand.u32 4294901760, %v11234_v14  ;;  %v2105_v33 = vand.u32 4294901760, %v2104_v32  ;;  %v13726_v32 = vld [vmem:[#allocation9_spill] sm:$0xff] }
  0xe8   : > { %2070 = vmatpush2.msra.mxu1 %v2069_v51  ;;  %1687 = vmatprep.mubr.f32.mxu0 %v13721_v30  ;;  %v13722_v51 = vand.u32 4294901760, %v11238_v40  ;;  %v2111_v42 = vand.u32 4294901760, %v2110_v24  ;;  %v13728_v24 = vld [vmem:[#allocation10_spill] sm:$0xff] }
  0xe9   : > { %2076 = vmatprep.subr.mxu1 %v2075_v60  ;;  %v2122_v52 = vsub.f32 %v11234_v14, %v13720_v26  ;;  %2166 = vmatprep.subr.mxu0 %v10388_v28  ;;  %v13723_v60 = vld [vmem:[#allocation46_spill] sm:$0xff]  ;;  %v2117_v29 = vand.u32 4294901760, %v2116_v6  ;;  %v13724_v6 = vld [vmem:[#allocation37_spill] sm:$0xff] }
  0xea   : > { %2082 = vmatpush2.msra.mxu1 %v2081_v5  ;;  %v2128_v62 = vsub.f32 %v11238_v40, %v13722_v51  ;;  %1693 = vmatmul.mubr.f32.vlgmr.msra.gmra.mxu0 %v13723_v60  ;;  %v13725_v5 = vld [vmem:[#allocation40_spill] sm:$0xff]  ;;  %v13733_v51 = vld [vmem:[#allocation22_spill] sm:$0xff] }
  0xeb   : > { %2088 = vmatprep.subr.mxu1 %v2087_v0  ;;  %2169 = vmatpush1.msra.mxu0 %v10385_v59  ;;  %v2123_v26 = vand.u32 4294901760, %v2122_v52  ;;  %v13727_v0 = vld [vmem:[#allocation20_spill] sm:$0xff]  ;;  %v13731_v52 = vld [vmem:[#allocation23_spill] sm:$0xff] }
  0xec   : > { %2094 = vmatpush2.msra.mxu1 %v2093_v3  ;;  %2172 = vmatprep.subr.mxu0 %v10409_v22  ;;  %v2129_v30 = vand.u32 4294901760, %v2128_v62  ;;  %v13729_v3 = vld [vmem:[#allocation21_spill] sm:$0xff]  ;;  %v13734_v62 = vld [vmem:[#allocation15_spill] sm:$0xff]  ;;  %v13736_v60 = vld [vmem:[#allocation32_spill] sm:$0xff] }
  0xed   : > { %2100 = vmatprep.subr.mxu1 %v2099_v50  ;;  %2175 = vmatpush1.msra.mxu0 %v10401_v38  ;;  %v13730_v50 = vld [vmem:[#allocation30_spill] sm:$0xff] }
  0xee   : > { %2106 = vmatpush2.msra.mxu1 %v2105_v33  ;;  %2178 = vmatprep.subr.mxu0 %v10427_v57  ;;  %v13732_v33 = vld [vmem:[#allocation11_spill] sm:$0xff] }
  0xef   : > { %2112 = vmatprep.subr.mxu1 %v2111_v42  ;;  %2181 = vmatpush1.msra.mxu0 %v10422_v4  ;;  %v13735_v42 = vld [vmem:[#allocation25_spill] sm:$0xff] }
  0xf0   : > { %2118 = vmatpush2.msra.mxu1 %v2117_v29  ;;  %2184 = vmatprep.subr.mxu0 %v10460_v17  ;;  %v13737_v29 = vld [vmem:[#allocation26_spill] sm:$0xff] }
  0xf1   : > { %2124 = vmatprep.subr.mxu1 %v2123_v26  ;;  %2187 = vmatpush1.msra.mxu0 %v13724_v6  ;;  %v13738_v26 = vld [vmem:[#allocation17_spill] sm:$0xff] }
  0xf2   : > { %2130 = vmatpush2.msra.mxu1 %v2129_v30  ;;  %2190 = vmatprep.subr.mxu0 %v13726_v32  ;;  %v13739_v30 = vld [vmem:[#allocation31_spill] sm:$0xff] }
  0xf3   : > { %2134 = vmatmul.mubr.f32.vlgmr.msra.gmra.mxu1 %v13725_v5  ;;  %2398 = vmatprep.subr.mxu1 %v13727_v0  ;;  %v13740_v5 = vld [vmem:[#allocation29_spill] sm:$0xff] }
  0xf4   : > { %2193 = vmatpush1.msra.mxu0 %v13728_v24  ;;  %2400 = vmatpush1.msra.mxu1 %v13729_v3 }
  0xf5   : > { %2196 = vmatprep.subr.mxu0 %v13730_v50  ;;  %2402 = vmatprep.subr.mxu1 %v13731_v52 }
  0xf6   : > { %2199 = vmatpush1.msra.mxu0 %v13732_v33  ;;  %2404 = vmatpush1.msra.mxu1 %v13733_v51  ;;  %v13742_v33 = vld [vmem:[#allocation33_spill] sm:$0xff]  ;;  %v13743_v51 = vld [vmem:[#allocation67_spill] sm:$0xff] }
  0xf7   : > { %2202 = vmatprep.subr.mxu0 %v13734_v62  ;;  %2406 = vmatprep.subr.mxu1 %v13735_v42  ;;  %v13744_v62 = vld [vmem:[#allocation35_spill] sm:$0xff] }
  0xf8   : > { %2205 = vmatpush1.msra.mxu0 %v13736_v60  ;;  %2408 = vmatpush1.msra.mxu1 %v13737_v29  ;;  %v13745_v42 = vld [vmem:[#allocation75_spill] sm:$0xff]  ;;  %v13746_v60 = vld [vmem:[#allocation24_spill] sm:$0xff]  ;;  %v13747_v29 = vld [vmem:[#allocation73_spill] sm:$0xff] }
  0xf9   : > { %2208 = vmatprep.subr.mxu0 %v13738_v26  ;;  %2410 = vmatprep.subr.mxu1 %v13739_v30  ;;  %v13748_v26 = vld [vmem:[#allocation8_spill] sm:$0xff] }
  0xfa   : > { %2211 = vmatpush1.msra.mxu0 %v10568_v53  ;;  %2412 = vmatpush1.msra.mxu1 %v13740_v5  ;;  %v13749_v53 = vld [vmem:[#allocation28_spill] sm:$0xff]  ;;  %v13750_v5 = vld [vmem:[#allocation77_spill] sm:$0xff] }
  0xfb   : > { %2214 = vmatprep.subr.mxu0 %v13741_v9  ;;  %2414 = vmatprep.subr.mxu1 %v13742_v33  ;;  %v13751_v9 = vld [vmem:[#allocation27_spill] sm:$0xff]  ;;  %v13752_v33 = vld [vmem:[#allocation82_spill] sm:$0xff] }
  0xfc   : > { %2217 = vmatpush1.msra.mxu0 %v13743_v51  ;;  %2416 = vmatpush1.msra.mxu1 %v13744_v62  ;;  %v13753_v51 = vld [vmem:[#allocation12_spill] sm:$0xff] }
  0xfd   : > { %2220 = vmatprep.subr.mxu0 %v13745_v42  ;;  %2418 = vmatprep.subr.mxu1 %v13746_v60  ;;  %v13754_v62 = vld [vmem:[#allocation80_spill] sm:$0xff]  ;;  %v13755_v42 = vld [vmem:[#allocation13_spill] sm:$0xff] }
  0xfe   : > { %2223 = vmatpush1.msra.mxu0 %v13747_v29  ;;  %2420 = vmatpush1.msra.mxu1 %v13748_v26  ;;  %v13756_v29 = vld [vmem:[#allocation38_spill] sm:$0xff]  ;;  %v13757_v26 = vld [vmem:[#allocation85_spill] sm:$0xff] }
  0xff   : > { %2226 = vmatprep.subr.mxu0 %v10657_v45  ;;  %2422 = vmatprep.subr.mxu1 %v13749_v53  ;;  %v13758_v45 = vld [vmem:[#allocation34_spill] sm:$0xff] }
 0x100   : > { %2229 = vmatpush1.msra.mxu0 %v13750_v5  ;;  %2424 = vmatpush1.msra.mxu1 %v13751_v9  ;;  %v13759_v53 = vld [vmem:[#allocation90_spill] sm:$0xff]  ;;  %v13760_v5 = vld [vmem:[#allocation68_spill] sm:$0xff] }
 0x101   : > { %2232 = vmatprep.subr.mxu0 %v13752_v33  ;;  %2426 = vmatprep.subr.mxu1 %v13753_v51  ;;  %v13761_v33 = vld [vmem:[#allocation69_spill] sm:$0xff] }
 0x102   : > { %2235 = vmatpush1.msra.mxu0 %v13754_v62  ;;  %2428 = vmatpush1.msra.mxu1 %v13755_v42  ;;  %v13762_v62 = vld [vmem:[#allocation71_spill] sm:$0xff]  ;;  %v13763_v42 = vld [vmem:[#allocation93_spill] sm:$0xff] }
 0x103   : > { %2238 = vmatprep.subr.mxu0 %v10730_v48  ;;  %2430 = vmatprep.subr.mxu1 %v13756_v29  ;;  %v13764_v48 = vld [vmem:[#allocation70_spill] sm:$0xff] }
 0x104   : > { %2241 = vmatpush1.msra.mxu0 %v13757_v26  ;;  %2432 = vmatpush1.msra.mxu1 %v13758_v45  ;;  %v13765_v26 = vld [vmem:[#allocation76_spill] sm:$0xff] }
 0x105   : > { %2244 = vmatprep.subr.mxu0 %v13759_v53  ;;  %2434 = vmatprep.subr.mxu1 %v13760_v5  ;;  %v13766_v53 = vld [vmem:[#allocation74_spill] sm:$0xff]  ;;  %v13767_v5 = vld [vmem:[#allocation101_spill] sm:$0xff] }
 0x106   : > { %2247 = vmatpush1.msra.mxu0 %v10737_v27  ;;  %2436 = vmatpush1.msra.mxu1 %v13761_v33  ;;  %v13768_v27 = vld [vmem:[#allocation81_spill] sm:$0xff]  ;;  %v13769_v33 = vld [vmem:[#allocation98_spill] sm:$0xff] }
 0x107   : > { %2250 = vmatprep.subr.mxu0 %v10792_v37  ;;  %2438 = vmatprep.subr.mxu1 %v13762_v62  ;;  %v13770_v62 = vld [vmem:[#allocation78_spill] sm:$0xff] }
 0x108   : > { %2253 = vmatpush1.msra.mxu0 %v13763_v42  ;;  %2440 = vmatpush1.msra.mxu1 %v13764_v48  ;;  %v13771_v42 = vld [vmem:[#allocation103_spill] sm:$0xff] }
 0x109   : > { %2256 = vmatprep.subr.mxu0 %v10803_v15  ;;  %2442 = vmatprep.subr.mxu1 %v13765_v26  ;;  %v13772_v48 = vld [vmem:[#allocation83_spill] sm:$0xff]  ;;  %v13773_v26 = vld [vmem:[#allocation84_spill] sm:$0xff] }
 0x10a   : > { %2259 = vmatpush1.msra.mxu0 %v10799_v56  ;;  %2444 = vmatpush1.msra.mxu1 %v13766_v53  ;;  %v13774_v53 = vld [vmem:[#allocation87_spill] sm:$0xff] }
 0x10b   : > { %2262 = vmatprep.subr.mxu0 %v13767_v5  ;;  %2446 = vmatprep.subr.mxu1 %v13768_v27  ;;  %v13775_v27 = vld [vmem:[#allocation86_spill] sm:$0xff] }
 0x10c   : > { %2265 = vmatpush2.msra.mxu0 %v13769_v33  ;;  %2448 = vmatpush1.msra.mxu1 %v13770_v62  ;;  %v13776_v33 = vld [vmem:[#allocation91_spill] sm:$0xff]  ;;  %v13777_v62 = vld [vmem:[#allocation110_spill] sm:$0xff] }
 0x10d   : > { %2268 = vmatprep.subr.mxu0 %v13771_v42  ;;  %2450 = vmatprep.subr.mxu1 %v13772_v48  ;;  %v13778_v42 = vld [vmem:[#allocation92_spill] sm:$0xff] }
 0x10e   : > { %2271 = vmatpush2.msra.mxu0 %v10861_v19  ;;  %2452 = vmatpush1.msra.mxu1 %v13773_v26  ;;  %v9348_v26 = vld [vmem:[%s9987_s25 + $0x38] sm:$0xff]  ;;  %v13793_v48 = vld [vmem:[#allocation104_spill] sm:$0xff] }
 0x10f   : > { %2274 = vmatprep.subr.mxu0 %v10917_v8  ;;  %2454 = vmatprep.subr.mxu1 %v13774_v53  ;;  %v9349_v8 = vld [vmem:[%s9987_s25 + $0x30] sm:$0xff]  ;;  %v13780_v53 = vld [vmem:[#allocation95_spill] sm:$0xff] }
 0x110   : > { %2277 = vmatpush2.msra.mxu0 %v10890_v12  ;;  %2456 = vmatpush1.msra.mxu1 %v13775_v27  ;;  %v11358_v19 = vmax.f32 %v9349_v8, %v9348_v26  ;;  %v13781_v27 = vld [vmem:[#allocation112_spill] sm:$0xff]  ;;  %v8259_v8 = vpop.f32.mrf.mxu0 }
 0x111   : > { %2280 = vmatprep.subr.mxu0 %v10932_v43  ;;  %2458 = vmatprep.subr.mxu1 %v13776_v33  ;;  %v13782_v43 = vld [vmem:[#allocation94_spill] sm:$0xff]  ;;  %v13783_v33 = vld [vmem:[#allocation120_spill] sm:$0xff] }
 0x112   : > { %2283 = vmatpush2.msra.mxu0 %v13777_v62  ;;  %2460 = vmatpush1.msra.mxu1 %v13778_v42  ;;  %13779 = vst [vmem:[#allocation45_spill] sm:$0xff] %v11358_v19  ;;  %v13784_v62 = vld [vmem:[#allocation96_spill] sm:$0xff] }
 0x113   : > { %2286 = vmatprep.subr.mxu0 %v10980_v35  ;;  %2462 = vmatprep.subr.mxu1 %v13780_v53  ;;  %v13785_v35 = vld [vmem:[#allocation97_spill] sm:$0xff]  ;;  %v13786_v26 = vld [vmem:[#allocation124_spill] sm:$0xff]  ;;  %v13787_v53 = vld [vmem:[#allocation99_spill] sm:$0xff] }
 0x114   : > { %2289 = vmatpush2.msra.mxu0 %v13781_v27  ;;  %2464 = vmatpush2.msra.mxu1 %v13782_v43  ;;  %v9350_v27 = vld [vmem:[%s9987_s25 + $0x28] sm:$0xff]  ;;  %v9351_v42 = vld [vmem:[%s9987_s25 + $0x20] sm:$0xff] }
 0x115   : > { %2292 = vmatprep.subr.mxu0 %v13783_v33  ;;  %2466 = vmatprep.subr.mxu1 %v13784_v62  ;;  %v11373_v43 = vmax.f32 %v9351_v42, %v9350_v27  ;;  %v9352_v33 = vld [vmem:[%s9987_s25 + $0x18] sm:$0xff]  ;;  %v9353_v62 = vld [vmem:[%s9987_s25 + $0x10] sm:$0xff]  ;;  %v13791_v12 = vld [vmem:[#allocation100_spill] sm:$0xff]  ;;  %v8260_v27 = vpop.f32.mrf.mxu0 }
 0x116   : > { %2295 = vmatpush2.msra.mxu0 %v10986_v13  ;;  %2468 = vmatpush2.msra.mxu1 %v13785_v35  ;;  %v11377_v13 = vmax.f32 %v9353_v62, %v9352_v33  ;;  %v13790_v35 = vld [vmem:[#allocation122_spill] sm:$0xff]  ;;  %v13795_v33 = vld [vmem:[#allocation131_spill] sm:$0xff]  ;;  %v13796_v62 = vld [vmem:[#allocation108_spill] sm:$0xff] }
 0x117   : > { %1440 = vrot.lane.b32.xlu0 %v11358_v19, %s9463_s28  ;;  %2298 = vmatprep.subr.mxu0 %v13786_v26  ;;  %13788 = vst [vmem:[#allocation46_spill] sm:$0xff] %v11373_v43  ;;  %v13792_v19 = vld [vmem:[#allocation126_spill] sm:$0xff]  ;;  %v8303_v42 = vpop.f32.mrf.mxu1 }
 0x118   : > { %2470 = vmatprep.subr.mxu1 %v13787_v53  ;;  %13789 = vst [vmem:[#allocation37_spill] sm:$0xff] %v11377_v13  ;;  %2301 = vmatpush2.msra.mxu0 %v13790_v35  ;;  %v13794_v53 = vld [vmem:[#allocation105_spill] sm:$0xff] }
 0x119   : > { %2472 = vmatpush2.msra.mxu1 %v13791_v12  ;;  %2304 = vmatprep.subr.mxu0 %v13792_v19  ;;  %v9354_v12 = vld [vmem:[%s9987_s25 + $0x8] sm:$0xff]  ;;  %v9355_v19 = vld [vmem:[%s9987_s25] sm:$0xff] }
 0x11a   : > { %2474 = vmatprep.subr.mxu1 %v13793_v48  ;;  %2307 = vmatpush2.msra.mxu0 %v11050_v1  ;;  %v11393_v35 = vmax.f32 %v9355_v19, %v9354_v12  ;;  %v8304_v48 = vpop.f32.mrf.mxu1  ;;  %v8261_v1 = vadd.f32 %v8260_v27, %v8259_v8  ;;  %v13802_v19 = vld [vmem:[#allocation64_spill] sm:$0xff]  ;;  %v13807_v8 = vld [vmem:[#allocation121_spill] sm:$0xff]  ;;  %v13809_v27 = vld [vmem:[#allocation47_spill] sm:$0xff] }
 0x11b   : > { %2476 = vmatpush2.msra.mxu1 %v13794_v53  ;;  %1438 = vrot.lane.b32.xlu0 %v11373_v43, %s9463_s28  ;;  %v13798_v53 = vld [vmem:[#allocation107_spill] sm:$0xff]  ;;  %v8305_v26 = vadd.f32 %v8304_v48, %v8303_v42  ;;  %v13799_v43 = vld [vmem:[#allocation113_spill] sm:$0xff]  ;;  %v13804_v12 = vld [vmem:[#allocation116_spill] sm:$0xff] }
 0x11c   : > { %1436 = vrot.lane.b32.xlu1 %v11377_v13, %s9463_s28  ;;  %2310 = vmatprep.subr.mxu0 %v13795_v33  ;;  %13797 = vst [vmem:[#allocation9_spill] sm:$0xff] %v11393_v35  ;;  %v13800_v13 = vld [vmem:[#allocation62_spill] sm:$0xff]  ;;  %v13803_v48 = vld [vmem:[#allocation115_spill] sm:$0xff]  ;;  %v13810_v42 = vld [vmem:[#allocation125_spill] sm:$0xff] }
 0x11d   : > { %2478 = vmatprep.subr.mxu1 %v13796_v62  ;;  %2313 = vmatpush2.msra.mxu0 %v11063_v58  ;;  %v11401_v62 = vadd.f32 %v8305_v26, %v8261_v1  ;;  %v13801_v33 = vld [vmem:[#allocation114_spill] sm:$0xff]  ;;  %v13808_v26 = vld [vmem:[#allocation36_spill] sm:$0xff] }
 0x11e   : > { %2480 = vmatpush2.msra.mxu1 %v13798_v53  ;;  %2316 = vmatprep.subr.mxu0 %v11128_v34  ;;  %v13806_v1 = vld [vmem:[#allocation14_spill] sm:$0xff] }
 0x11f   : > { %2482 = vmatprep.subr.mxu1 %v13799_v43  ;;  %1703 = vmatprep.mubr.f32.mxu0 %v13800_v13  ;;  %v13805_v13 = vld [vmem:[#allocation119_spill] sm:$0xff] }
 0x120   : > { %2319 = vmatpush2.msra.mxu0 %v11108_v20  ;;  %2484 = vmatpush2.msra.mxu1 %v13801_v33 }
 0x121   : > { %1434 = vrot.lane.b32.xlu1 %v11393_v35, %s9463_s28  ;;  %1709 = vmatmul.mubr.f32.gmra.mxu0 %v13802_v19  ;;  %v13811_v35 = vld [vmem:[#allocation48_spill] sm:$0xff] }
 0x122   : > { %2322 = vmatprep.subr.mxu0 %v11148_v55  ;;  %2486 = vmatprep.subr.mxu1 %v13803_v48 }
 0x123   : > { %2325 = vmatpush2.msra.mxu0 %v11133_v18  ;;  %2488 = vmatpush2.msra.mxu1 %v13804_v12 }
 0x124   : > { %2328 = vmatprep.subr.mxu0 %v11165_v46  ;;  %2490 = vmatprep.subr.mxu1 %v13805_v13  ;;  %v8262_v19 = vpop.f32.mrf.mxu0  ;;  %v13812_v13 = vld [vmem:[#allocation123_spill] sm:$0xff] }
 0x125   : > { %1719 = vmatprep.mubr.f32.mxu0 %v13806_v1  ;;  %2331 = vmatpush2.msra.mxu0 %v11153_v2  ;;  %v13813_v2 = vld [vmem:[#allocation129_spill] sm:$0xff] }
 0x126   : > { %2492 = vmatpush2.msra.mxu1 %v13807_v8  ;;  %1725 = vmatmul.mubr.f32.gmra.mxu0 %v13808_v26  ;;  %v8263_v1 = vpop.f32.mrf.mxu0  ;;  %v13814_v8 = vld [vmem:[#allocation16_spill] sm:$0xff] }
 0x127   : > { %2140 = vmatprep.mubr.f32.mxu1 %v13809_v27  ;;  %2334 = vmatprep.subr.mxu0 %v11183_v11  ;;  %v13815_v26 = vld [vmem:[#allocation128_spill] sm:$0xff]  ;;  %v13816_v27 = vld [vmem:[#allocation19_spill] sm:$0xff] }
 0x128   : > { %2494 = vmatprep.subr.mxu1 %v13810_v42  ;;  %2142 = vmatmul.mubr.f32.gmra.mxu1 %v13811_v35  ;;  %v13817_v42 = vld [vmem:[#allocation50_spill] sm:$0xff] }
 0x129   : > { %2337 = vmatpush2.msra.mxu0 %v11170_v16  ;;  %2496 = vmatpush2.msra.mxu1 %v13812_v13  ;;  %v8265_v35 = vpop.f32.mrf.mxu0  ;;  %v13818_v16 = vld [vmem:[#allocation130_spill] sm:$0xff]  ;;  %v13819_v13 = vld [vmem:[#allocation52_spill] sm:$0xff] }
 0x12a   : > { %2340 = vmatprep.subr.mxu0 %v11200_v47  ;;  %2498 = vmatprep.subr.mxu1 %v13813_v2 }
 0x12b   : > { %1735 = vmatprep.mubr.f32.mxu0 %v13814_v8  ;;  %2343 = vmatpush2.msra.mxu0 %v11204_v36  ;;  %v8306_v2 = vpop.f32.mrf.mxu1  ;;  %v8266_v47 = vpop.f32.mrf.mxu0  ;;  %v8264_v8 = vadd.f32 %v8263_v1, %v8262_v19  ;;  %v13824_v1 = vld [vmem:[#allocation59_spill] sm:$0xff] }
 0x12c   : > { %2500 = vmatpush2.msra.mxu1 %v13815_v26  ;;  %1741 = vmatmul.mubr.f32.gmra.mxu0 %v13816_v27 }
 0x12d   : > { %2148 = vmatprep.mubr.f32.mxu1 %v13817_v42  ;;  %2346 = vmatprep.subr.mxu0 %v11218_v25  ;;  %v8307_v27 = vpop.f32.mrf.mxu1  ;;  %v13820_v42 = vld [vmem:[#allocation41_spill] sm:$0xff] }
 0x12e   : > { %2502 = vmatprep.subr.mxu1 %v13818_v16  ;;  %2150 = vmatmul.mubr.f32.gmra.mxu1 %v13819_v13  ;;  %v8308_v16 = vadd.f32 %v8307_v27, %v8306_v2  ;;  %v13821_v13 = vld [vmem:[#allocation57_spill] sm:$0xff]  ;;  %v13826_v2 = vand.u32 4294901760, %v10409_v22  ;;  %v13830_v22 = vand.u32 4294901760, %v10427_v57  ;;  %v13834_v57 = vld [vmem:[#allocation43_spill] sm:$0xff] }
 0x12f   : > { %2349 = vmatpush2.msra.mxu0 %v11222_v54  ;;  %2504 = vmatpush2.msra.mxu1 %v11089_v61  ;;  %v13822_v54 = vld [vmem:[#allocation42_spill] sm:$0xff]  ;;  %v8268_v25 = vpop.f32.mrf.mxu0  ;;  %v13827_v27 = vld [vmem:[#allocation49_spill] sm:$0xff] }
 0x130   : > { %2352 = vmatprep.subr.mxu0 %v11234_v14  ;;  %2506 = vmatprep.subr.mxu1 %v11125_v21  ;;  %v13823_v14 = vand.u32 4294901760, %v10388_v28  ;;  %v785_v19 = vadd.f32 %v8308_v16, %v8264_v8  ;;  %v13828_v16 = vand.u32 4294901760, %v10401_v38 }
 0x131   : > { %2355 = vmatpush2.msra.mxu0 %v11238_v40  ;;  %2358 = vmatprep.mubr.f32.mxu0 %v13820_v42  ;;  %v13825_v40 = vand.u32 4294901760, %v10385_v59  ;;  %v8309_v42 = vpop.f32.mrf.mxu1  ;;  %v8269_v21 = vpop.f32.mrf.mxu0 }
 0x132   : > { %2508 = vmatpush2.msra.mxu1 %v11115_v41  ;;  %2156 = vmatprep.mubr.f32.mxu1 %v13821_v13 }
 0x133   : > { %2361 = vmatmul.mubr.f32.vlgmr.msra.gmra.mxu0 %v13822_v54  ;;  %2510 = vmatprep.subr.mxu1 %v11144_v23  ;;  %v8267_v54 = vadd.f32 %v8266_v47, %v8265_v35  ;;  %v8310_v28 = vpop.f32.mrf.mxu1  ;;  %v13831_v47 = vand.u32 4294901760, %v10422_v4  ;;  %v13836_v4 = vld [vmem:[#allocation44_spill] sm:$0xff] }
 0x134   : > { %2577 = vmatprep.subr.mxu0 %v13823_v14  ;;  %2158 = vmatmul.mubr.f32.gmra.mxu1 %v13824_v1  ;;  %v8311_v59 = vadd.f32 %v8310_v28, %v8309_v42  ;;  %v13829_v14 = vld [vmem:[#allocation51_spill] sm:$0xff]  ;;  %v13832_v42 = vand.u32 4294901760, %v10460_v17  ;;  %v13838_v17 = vand.u32 4294901760, %v13726_v32  ;;  %v13842_v32 = vld [vmem:[#allocation53_spill] sm:$0xff] }
 0x135   : > { %2581 = vmatpush1.msra.mxu0 %v13825_v40  ;;  %2512 = vmatpush2.msra.mxu1 %v11140_v44  ;;  %v8347_v40 = vpop.f32.mrf.mxu0 }
 0x136   : > { %2585 = vmatprep.subr.mxu0 %v13826_v2  ;;  %2514 = vmatprep.subr.mxu1 %v11161_v7  ;;  %v792_v35 = vadd.f32 %v8311_v59, %v8267_v54  ;;  %v13833_v2 = vld [vmem:[#allocation54_spill] sm:$0xff]  ;;  %v13835_v54 = vand.u32 4294901760, %v13724_v6  ;;  %v13840_v6 = vand.u32 4294901760, %v13730_v50  ;;  %v13848_v50 = vld [vmem:[#allocation15_spill] sm:$0xff] }
 0x137   : > { %2368 = vmatprep.mubr.f32.mxu0 %v13827_v27  ;;  %2516 = vmatpush2.msra.mxu1 %v11172_v39  ;;  %v8312_v8 = vpop.f32.mrf.mxu1  ;;  %v8348_v38 = vpop.f32.mrf.mxu0  ;;  %v8270_v27 = vadd.f32 %v8269_v21, %v8268_v25  ;;  %v13839_v25 = vand.u32 4294901760, %v13728_v24  ;;  %v13846_v24 = vld [vmem:[#allocation63_spill] sm:$0xff] }
 0x138   : > { %2589 = vmatpush1.msra.mxu0 %v13828_v16  ;;  %2518 = vmatprep.subr.mxu1 %v11179_v63  ;;  %v8349_v28 = vadd.f32 %v8348_v38, %v8347_v40  ;;  %v13843_v38 = vld [vmem:[#allocation11_spill] sm:$0xff] }
 0x139   : > { %2371 = vmatmul.mubr.f32.gmra.mxu0 %v13829_v14  ;;  %2593 = vmatprep.subr.mxu0 %v13830_v22  ;;  %v8313_v16 = vpop.f32.mrf.mxu1  ;;  %v13837_v22 = vld [vmem:[#allocation56_spill] sm:$0xff] }
 0x13a   : > { %2520 = vmatpush2.msra.mxu1 %v11189_v49  ;;  %2597 = vmatpush1.msra.mxu0 %v13831_v47  ;;  %v937_v59 = vadd.f32 %v8349_v28, %v11401_v62  ;;  %v8314_v14 = vadd.f32 %v8313_v16, %v8312_v8  ;;  %v13841_v62 = vld [vmem:[#allocation61_spill] sm:$0xff]  ;;  %v13849_v28 = vand.u32 4294901760, %v13848_v50  ;;  %v13851_v16 = vld [vmem:[#allocation32_spill] sm:$0xff] }
 0x13b   : > { %2522 = vmatprep.subr.mxu1 %v11196_v31  ;;  %2601 = vmatprep.subr.mxu0 %v13832_v42  ;;  %v8350_v21 = vpop.f32.mrf.mxu0  ;;  %v13844_v42 = vand.u32 4294901760, %v13843_v38  ;;  %v13860_v38 = vld [vmem:[#allocation60_spill] sm:$0xff] }
 0x13c   : > { %2378 = vmatprep.mubr.f32.mxu0 %v13833_v2  ;;  %2524 = vmatpush2.msra.mxu1 %v11209_v10  ;;  %v799_v40 = vadd.f32 %v8314_v14, %v8270_v27  ;;  %v13847_v27 = vld [vmem:[#allocation55_spill] sm:$0xff]  ;;  %v13853_v14 = vld [vmem:[#allocation26_spill] sm:$0xff] }
 0x13d   : > { %2528 = vmatprep.mubr.f32.mxu1 %v13834_v57  ;;  %2605 = vmatpush1.msra.mxu0 %v13835_v54  ;;  %v8351_v47 = vpop.f32.mrf.mxu0  ;;  %v13850_v57 = vld [vmem:[#allocation25_spill] sm:$0xff]  ;;  %v13852_v54 = vand.u32 4294901760, %v13851_v16 }
 0x13e   : > { %2532 = vmatmul.mubr.f32.vlgmr.msra.gmra.mxu1 %v13836_v4  ;;  %2381 = vmatmul.mubr.f32.gmra.mxu0 %v13837_v22  ;;  %v8352_v8 = vadd.f32 %v8351_v47, %v8350_v21  ;;  %v13854_v22 = vld [vmem:[#allocation17_spill] sm:$0xff]  ;;  %v13857_v47 = vld [vmem:[#allocation18_spill] sm:$0xff] }
 0x13f   : > { %2609 = vmatprep.subr.mxu0 %v13838_v17  ;;  %2864 = vmatprep.subr.mxu1 %v13727_v0  ;;  %v13845_v0 = vld [vmem:[#allocation22_spill] sm:$0xff]  ;;  %v13855_v17 = vand.u32 4294901760, %v13854_v22 }
 0x140   : > { %2613 = vmatpush1.msra.mxu0 %v13839_v25  ;;  %2866 = vmatpush1.msra.mxu1 %v13729_v3  ;;  %v946_v2 = vadd.f32 %v8352_v8, %v785_v19  ;;  %v8391_v3 = vpop.f32.mrf.mxu1  ;;  %v13856_v25 = vld [vmem:[#allocation58_spill] sm:$0xff]  ;;  %v13859_v8 = vld [vmem:[#allocation29_spill] sm:$0xff] }
 0x141   : > { %2617 = vmatprep.subr.mxu0 %v13840_v6  ;;  %2868 = vmatprep.subr.mxu1 %v13731_v52  ;;  %v8353_v52 = vpop.f32.mrf.mxu0 }
 0x142   : > { %2388 = vmatprep.mubr.f32.mxu0 %v13841_v62  ;;  %2540 = vmatprep.mubr.f32.mxu1 %v13842_v32  ;;  %v8392_v4 = vpop.f32.mrf.mxu1  ;;  %v13858_v62 = vand.u32 4294901760, %v13857_v47 }
 0x143   : > { %2621 = vmatpush1.msra.mxu0 %v13844_v42  ;;  %2870 = vmatpush1.msra.mxu1 %v13845_v0  ;;  %v8354_v21 = vpop.f32.mrf.mxu0  ;;  %v8393_v19 = vadd.f32 %v8392_v4, %v8391_v3  ;;  %v13861_v42 = vld [vmem:[#allocation72_spill] sm:$0xff]  ;;  %v13863_v3 = vld [vmem:[#allocation33_spill] sm:$0xff] }
 0x144   : > { %2391 = vmatmul.mubr.f32.gmra.mxu0 %v13846_v24  ;;  %2544 = vmatmul.mubr.f32.gmra.mxu1 %v13847_v27  ;;  %v8355_v6 = vadd.f32 %v8354_v21, %v8353_v52  ;;  %v13862_v0 = vand.u32 4294901760, %v13861_v42  ;;  %v13866_v52 = vld [vmem:[#allocation35_spill] sm:$0xff] }
 0x145   : > { %2625 = vmatprep.subr.mxu0 %v13849_v28  ;;  %2872 = vmatprep.subr.mxu1 %v13850_v57  ;;  %v11503_v32 = vadd.f32 %v8393_v19, %v937_v59  ;;  %v13867_v57 = vld [vmem:[#allocation75_spill] sm:$0xff]  ;;  %v13873_v19 = vld [vmem:[#allocation66_spill] sm:$0xff] }
 0x146   : > { %2629 = vmatpush1.msra.mxu0 %v13852_v54  ;;  %2874 = vmatpush1.msra.mxu1 %v13853_v14  ;;  %v955_v24 = vadd.f32 %v8355_v6, %v792_v35  ;;  %v8356_v27 = vpop.f32.mrf.mxu0  ;;  %v13868_v16 = vand.u32 4294901760, %v13867_v57  ;;  %v13869_v54 = vld [vmem:[#allocation65_spill] sm:$0xff] }
 0x147   : > { %2633 = vmatprep.subr.mxu0 %v13855_v17  ;;  %2876 = vmatprep.subr.mxu1 %v13739_v30  ;;  %v13864_v30 = vld [vmem:[#allocation67_spill] sm:$0xff]  ;;  %v8394_v28 = vpop.f32.mrf.mxu1  ;;  %v13870_v35 = vld [vmem:[#allocation73_spill] sm:$0xff]  ;;  %v13872_v17 = vld [vmem:[#allocation8_spill] sm:$0xff] }
 0x148   : > { %2552 = vmatprep.mubr.f32.mxu1 %v13856_v25  ;;  %2637 = vmatpush1.msra.mxu0 %v13858_v62  ;;  %v13865_v50 = vand.u32 4294901760, %v13864_v30  ;;  %v8357_v59 = vpop.f32.mrf.mxu0  ;;  %v13871_v22 = vand.u32 4294901760, %v13870_v35  ;;  %v13874_v25 = vld [vmem:[#allocation79_spill] sm:$0xff]  ;;  %v13876_v62 = vld [vmem:[#allocation28_spill] sm:$0xff] }
 0x149   : > { %2878 = vmatpush1.msra.mxu1 %v13859_v8  ;;  %2641 = vmatprep.subr.mxu0 %v13862_v0  ;;  %v8358_v4 = vadd.f32 %v8357_v59, %v8356_v27  ;;  %v8395_v14 = vpop.f32.mrf.mxu1  ;;  %v13875_v6 = vand.u32 4294901760, %v13874_v25  ;;  %v13877_v8 = vld [vmem:[#allocation77_spill] sm:$0xff]  ;;  %v13879_v0 = vld [vmem:[#allocation82_spill] sm:$0xff] }
 0x14a   : > { %2556 = vmatmul.mubr.f32.gmra.mxu1 %v13860_v38  ;;  %2880 = vmatprep.subr.mxu1 %v13863_v3  ;;  %v8396_v21 = vadd.f32 %v8395_v14, %v8394_v28  ;;  %v13880_v27 = vand.u32 4294901760, %v13879_v0  ;;  %v13881_v3 = vld [vmem:[#allocation80_spill] sm:$0xff]  ;;  %v13891_v14 = vld [vmem:[#allocation89_spill] sm:$0xff] }
 0x14b   : > { %2645 = vmatpush1.msra.mxu0 %v13865_v50  ;;  %2882 = vmatpush1.msra.mxu1 %v13866_v52  ;;  %v964_v47 = vadd.f32 %v8358_v4, %v799_v40  ;;  %v13882_v30 = vand.u32 4294901760, %v13881_v3  ;;  %v13883_v40 = vld [vmem:[#allocation13_spill] sm:$0xff]  ;;  %v13884_v28 = vld [vmem:[#allocation88_spill] sm:$0xff]  ;;  %v13892_v35 = vand.u32 4294901760, %v13891_v14  ;;  %v13923_v14 = vld [vmem:[#allocation110_spill] sm:$0xff] }
 0x14c   : > { %2649 = vmatprep.subr.mxu0 %v13868_v16  ;;  %2884 = vmatprep.subr.mxu1 %v13746_v60  ;;  %v13878_v60 = vand.u32 4294901760, %v13877_v8  ;;  %v11525_v38 = vadd.f32 %v8396_v21, %v946_v2  ;;  %v8397_v42 = vpop.f32.mrf.mxu1  ;;  %v13885_v52 = vand.u32 4294901760, %v13884_v28  ;;  %v13886_v2 = vld [vmem:[#allocation85_spill] sm:$0xff]  ;;  %v13890_v4 = vld [vmem:[#allocation68_spill] sm:$0xff]  ;;  %v13895_v21 = vld [vmem:[#allocation71_spill] sm:$0xff]  ;;  %v13901_v8 = vand.u32 4294901760, %v10799_v56 }
 0x14d   : > { %2564 = vmatprep.mubr.f32.mxu1 %v13869_v54  ;;  %2653 = vmatpush1.msra.mxu0 %v13871_v22  ;;  %v13887_v16 = vand.u32 4294901760, %v13886_v2  ;;  %v13893_v22 = vld [vmem:[#allocation69_spill] sm:$0xff]  ;;  %v13911_v56 = vld [vmem:[#allocation102_spill] sm:$0xff]  ;;  %v13913_v28 = vld [vmem:[#allocation84_spill] sm:$0xff] }
 0x14e   : > { %2886 = vmatpush1.msra.mxu1 %v13872_v17  ;;  %2657 = vmatprep.subr.mxu0 %v13875_v6  ;;  %v8398_v50 = vpop.f32.mrf.mxu1  ;;  %v13899_v6 = vand.u32 4294901760, %v10803_v15  ;;  %v13904_v0 = vld [vmem:[#allocation81_spill] sm:$0xff]  ;;  %v13908_v15 = vld [vmem:[#allocation103_spill] sm:$0xff]  ;;  %v13917_v2 = vld [vmem:[#allocation106_spill] sm:$0xff] }
 0x14f   : > { %2568 = vmatmul.mubr.f32.gmra.mxu1 %v13873_v19  ;;  %2888 = vmatprep.subr.mxu1 %v13876_v62  ;;  %v8399_v57 = vadd.f32 %v8398_v50, %v8397_v42  ;;  %v13900_v62 = vld [vmem:[#allocation76_spill] sm:$0xff]  ;;  %v13903_v42 = vand.u32 4294901760, %v13767_v5  ;;  %v13909_v50 = vand.u32 4294901760, %v13908_v15 }
 0x150   : > { %2661 = vmatpush1.msra.mxu0 %v13878_v60  ;;  %2890 = vmatpush1.msra.mxu1 %v13751_v9  ;;  %v13888_v9 = vld [vmem:[#allocation90_spill] sm:$0xff] }
 0x151   : > { %2665 = vmatprep.subr.mxu0 %v13880_v27  ;;  %2892 = vmatprep.subr.mxu1 %v13753_v51  ;;  %v13889_v59 = vand.u32 4294901760, %v13888_v9  ;;  %v11542_v51 = vadd.f32 %v8399_v57, %v955_v24  ;;  %v8400_v54 = vpop.f32.mrf.mxu1  ;;  %v13898_v24 = vld [vmem:[#allocation70_spill] sm:$0xff]  ;;  %v13916_v57 = vld [vmem:[#allocation87_spill] sm:$0xff] }
 0x152   : > { %2669 = vmatpush1.msra.mxu0 %v13882_v30  ;;  %2894 = vmatpush1.msra.mxu1 %v13883_v40  ;;  %v13905_v27 = vld [vmem:[#allocation98_spill] sm:$0xff]  ;;  %v13910_v40 = vld [vmem:[#allocation83_spill] sm:$0xff] }
 0x153   : > { %2673 = vmatprep.subr.mxu0 %v13885_v52  ;;  %2896 = vmatprep.subr.mxu1 %v13756_v29  ;;  %v13894_v29 = vand.u32 4294901760, %v10792_v37  ;;  %v8401_v17 = vpop.f32.mrf.mxu1  ;;  %v13902_v37 = vld [vmem:[#allocation74_spill] sm:$0xff]  ;;  %v13906_v3 = vand.u32 4294901760, %v13905_v27  ;;  %v13914_v52 = vld [vmem:[#allocation109_spill] sm:$0xff] }
 0x154   : > { %2677 = vmatpush1.msra.mxu0 %v13887_v16  ;;  %2898 = vmatpush1.msra.mxu1 %v13758_v45  ;;  %v13896_v45 = vld [vmem:[#allocation93_spill] sm:$0xff]  ;;  %v8402_v25 = vadd.f32 %v8401_v17, %v8400_v54  ;;  %v13907_v30 = vld [vmem:[#allocation78_spill] sm:$0xff]  ;;  %v13915_v5 = vand.u32 4294901760, %v13914_v52  ;;  %v13918_v16 = vand.u32 4294901760, %v13917_v2  ;;  %v13943_v52 = vld [vmem:[#allocation100_spill] sm:$0xff] }
 0x155   : > { %2681 = vmatprep.subr.mxu0 %v13889_v59  ;;  %2900 = vmatprep.subr.mxu1 %v13890_v4  ;;  %v13897_v19 = vand.u32 4294901760, %v13896_v45  ;;  %v13919_v9 = vld [vmem:[#allocation86_spill] sm:$0xff]  ;;  %v13920_v59 = vld [vmem:[#allocation111_spill] sm:$0xff]  ;;  %v13926_v17 = vld [vmem:[#allocation117_spill] sm:$0xff] }
 0x156   : > { %2685 = vmatpush1.msra.mxu0 %v13892_v35  ;;  %2902 = vmatpush1.msra.mxu1 %v13893_v22  ;;  %v11559_v60 = vadd.f32 %v8402_v25, %v964_v47  ;;  %v13912_v47 = vand.u32 4294901760, %v13911_v56  ;;  %v13921_v54 = vand.u32 4294901760, %v13920_v59  ;;  %v13922_v4 = vld [vmem:[#allocation91_spill] sm:$0xff]  ;;  %v13924_v35 = vand.u32 4294901760, %v13923_v14 }
 0x157   : > { %2689 = vmatprep.subr.mxu0 %v13894_v29  ;;  %2904 = vmatprep.subr.mxu1 %v13895_v21  ;;  %v13925_v29 = vld [vmem:[#allocation92_spill] sm:$0xff]  ;;  %v13927_v21 = vand.u32 4294901760, %v13926_v17  ;;  %v13928_v45 = vld [vmem:[#allocation95_spill] sm:$0xff] }
 0x158   : > { %2693 = vmatpush1.msra.mxu0 %v13897_v19  ;;  %2906 = vmatpush1.msra.mxu1 %v13898_v24  ;;  %v13929_v19 = vld [vmem:[#allocation112_spill] sm:$0xff]  ;;  %v13940_v56 = vld [vmem:[#allocation99_spill] sm:$0xff] }
 0x159   : > { %2697 = vmatprep.subr.mxu0 %v13899_v6  ;;  %2908 = vmatprep.subr.mxu1 %v13900_v62  ;;  %v13930_v25 = vand.u32 4294901760, %v13929_v19  ;;  %v13931_v6 = vld [vmem:[#allocation94_spill] sm:$0xff]  ;;  %v13932_v62 = vld [vmem:[#allocation120_spill] sm:$0xff]  ;;  %v13955_v19 = vand.u32 4294901760, %v11108_v20 }
 0x15a   : > { %2701 = vmatpush1.msra.mxu0 %v13901_v8  ;;  %2910 = vmatpush1.msra.mxu1 %v13902_v37  ;;  %v13933_v8 = vand.u32 4294901760, %v13932_v62 }
 0x15b   : > { %2705 = vmatprep.subr.mxu0 %v13903_v42  ;;  %2912 = vmatprep.subr.mxu1 %v13904_v0  ;;  %v13934_v42 = vld [vmem:[#allocation96_spill] sm:$0xff]  ;;  %v13935_v0 = vld [vmem:[#allocation118_spill] sm:$0xff] }
 0x15c   : > { %2709 = vmatpush2.msra.mxu0 %v13906_v3  ;;  %2914 = vmatpush1.msra.mxu1 %v13907_v30  ;;  %v13936_v27 = vand.u32 4294901760, %v13935_v0  ;;  %v13937_v3 = vld [vmem:[#allocation97_spill] sm:$0xff]  ;;  %v13938_v30 = vld [vmem:[#allocation124_spill] sm:$0xff] }
 0x15d   : > { %2713 = vmatprep.subr.mxu0 %v13909_v50  ;;  %2916 = vmatprep.subr.mxu1 %v13910_v40  ;;  %v13939_v15 = vand.u32 4294901760, %v13938_v30 }
 0x15e   : > { %2717 = vmatpush2.msra.mxu0 %v13912_v47  ;;  %2918 = vmatpush1.msra.mxu1 %v13913_v28  ;;  %v8435_v22 = vpop.f32.mrf.mxu0  ;;  %v13941_v47 = vld [vmem:[#allocation122_spill] sm:$0xff] }
 0x15f   : > { %2721 = vmatprep.subr.mxu0 %v13915_v5  ;;  %2920 = vmatprep.subr.mxu1 %v13916_v57  ;;  %v13942_v28 = vand.u32 4294901760, %v13941_v47  ;;  %v13944_v5 = vld [vmem:[#allocation126_spill] sm:$0xff] }
 0x160   : > { %2725 = vmatpush2.msra.mxu0 %v13918_v16  ;;  %2922 = vmatpush1.msra.mxu1 %v13919_v9  ;;  %v8436_v24 = vpop.f32.mrf.mxu0  ;;  %v13945_v57 = vand.u32 4294901760, %v13944_v5  ;;  %v13946_v16 = vld [vmem:[#allocation104_spill] sm:$0xff]  ;;  %v13947_v9 = vld [vmem:[#allocation127_spill] sm:$0xff]  ;;  %v13976_v5 = vld [vmem:[#allocation137_spill] sm:$0xff] }
 0x161   : > { %2729 = vmatprep.subr.mxu0 %v13921_v54  ;;  %2924 = vmatprep.subr.mxu1 %v13922_v4  ;;  %v8437_v37 = vadd.f32 %v8436_v24, %v8435_v22  ;;  %v13948_v59 = vand.u32 4294901760, %v13947_v9  ;;  %v13949_v4 = vld [vmem:[#allocation105_spill] sm:$0xff]  ;;  %v13953_v22 = vand.u32 4294901760, %v11063_v58  ;;  %v13956_v58 = vand.u32 4294901760, %v11148_v55 }
 0x162   : > { %2733 = vmatpush2.msra.mxu0 %v13924_v35  ;;  %2926 = vmatpush1.msra.mxu1 %v13925_v29  ;;  %v13952_v35 = vld [vmem:[#allocation108_spill] sm:$0xff] }
 0x163   : > { %2737 = vmatprep.subr.mxu0 %v13927_v21  ;;  %2928 = vmatprep.subr.mxu1 %v13928_v45  ;;  %v1273_v50 = vadd.f32 %v8437_v37, %v11503_v32  ;;  %v8438_v40 = vpop.f32.mrf.mxu0  ;;  %v13950_v32 = vld [vmem:[#allocation131_spill] sm:$0xff]  ;;  %v13954_v21 = vand.u32 4294901760, %v11128_v34 }
 0x164   : > { %2741 = vmatpush2.msra.mxu0 %v13930_v25  ;;  %2930 = vmatpush2.msra.mxu1 %v13931_v6  ;;  %v13951_v14 = vand.u32 4294901760, %v13950_v32  ;;  %v13960_v6 = vld [vmem:[#allocation119_spill] sm:$0xff] }
 0x165   : > { %2745 = vmatprep.subr.mxu0 %v13933_v8  ;;  %2932 = vmatprep.subr.mxu1 %v13934_v42  ;;  %v8439_v2 = vpop.f32.mrf.mxu0 }
 0x166   : > { %2749 = vmatpush2.msra.mxu0 %v13936_v27  ;;  %2934 = vmatpush2.msra.mxu1 %v13937_v3  ;;  %v8440_v54 = vadd.f32 %v8439_v2, %v8438_v40  ;;  %v13968_v27 = vld [vmem:[#allocation123_spill] sm:$0xff]  ;;  %v13972_v40 = vand.u32 4294901760, %v11204_v36  ;;  %v13979_v36 = vld [vmem:[#allocation138_spill] sm:$0xff] }
 0x167   : > { %2753 = vmatprep.subr.mxu0 %v13939_v15  ;;  %2936 = vmatprep.subr.mxu1 %v13940_v56  ;;  %v13969_v3 = vld [vmem:[#allocation135_spill] sm:$0xff]  ;;  %v13973_v56 = vld [vmem:[#allocation136_spill] sm:$0xff]  ;;  %v13980_v9 = vand.u32 4294901760, %v13979_v36 }
 0x168   : > { %2757 = vmatpush2.msra.mxu0 %v13942_v28  ;;  %2938 = vmatpush2.msra.mxu1 %v13943_v52  ;;  %v1280_v29 = vadd.f32 %v8440_v54, %v11525_v38  ;;  %v8479_v17 = vpop.f32.mrf.mxu1  ;;  %v13970_v30 = vand.u32 4294901760, %v13969_v3  ;;  %v13974_v47 = vand.u32 4294901760, %v13973_v56  ;;  %v13975_v52 = vld [vmem:[#allocation130_spill] sm:$0xff] }
 0x169   : > { %2761 = vmatprep.subr.mxu0 %v13945_v57  ;;  %2940 = vmatprep.subr.mxu1 %v13946_v16  ;;  %v8441_v45 = vpop.f32.mrf.mxu0  ;;  %v13977_v57 = vand.u32 4294901760, %v13976_v5 }
 0x16a   : > { %2765 = vmatpush2.msra.mxu0 %v13948_v59  ;;  %2942 = vmatpush2.msra.mxu1 %v13949_v4  ;;  %v8480_v25 = vpop.f32.mrf.mxu1  ;;  %v13981_v59 = vld [vmem:[#allocation132_spill] sm:$0xff] }
 0x16b   : > { %2769 = vmatprep.subr.mxu0 %v13951_v14  ;;  %2944 = vmatprep.subr.mxu1 %v13952_v35  ;;  %v8442_v24 = vpop.f32.mrf.mxu0  ;;  %v8481_v38 = vadd.f32 %v8480_v25, %v8479_v17  ;;  %v13985_v14 = vld [vmem:[#allocation40_spill] sm:$0xff] }
 0x16c   : > { %2773 = vmatpush2.msra.mxu0 %v13953_v22  ;;  %2946 = vmatpush2.msra.mxu1 %v13798_v53  ;;  %v13957_v53 = vand.u32 4294901760, %v11133_v18  ;;  %v8443_v34 = vadd.f32 %v8442_v24, %v8441_v45  ;;  %v13964_v18 = vand.u32 4294901760, %v11183_v11  ;;  %v13995_v24 = vld [vmem:[#allocation9_spill] sm:$0xff] }
 0x16d   : > { %2777 = vmatprep.subr.mxu0 %v13954_v21  ;;  %2948 = vmatprep.subr.mxu1 %v13799_v43  ;;  %v13958_v43 = vand.u32 4294901760, %v11165_v46  ;;  %v11632_v20 = vadd.f32 %v8481_v38, %v1273_v50  ;;  %v13966_v46 = vld [vmem:[#allocation134_spill] sm:$0xff]  ;;  %v13971_v50 = vld [vmem:[#allocation129_spill] sm:$0xff] }
 0x16e   : > { %2781 = vmatpush2.msra.mxu0 %v13955_v19  ;;  %2950 = vmatpush2.msra.mxu1 %v13801_v33  ;;  %v13961_v33 = vld [vmem:[#allocation133_spill] sm:$0xff]  ;;  %v1287_v62 = vadd.f32 %v8443_v34, %v11542_v51  ;;  %v8444_v8 = vpop.f32.mrf.mxu0  ;;  %v13967_v42 = vand.u32 4294901760, %v13966_v46  ;;  %v13993_v21 = vld [vmem:[#allocation46_spill] sm:$0xff] }
 0x16f   : > { %2785 = vmatprep.subr.mxu0 %v13956_v58  ;;  %2952 = vmatprep.subr.mxu1 %v13803_v48  ;;  %13959 = vst [vmem:[#allocation20_spill] sm:$0xff] %v11632_v20  ;;  %v13962_v55 = vand.u32 4294901760, %v13961_v33  ;;  %v13963_v48 = vld [vmem:[#allocation121_spill] sm:$0xff]  ;;  %v8482_v37 = vpop.f32.mrf.mxu1 }
 0x170   : > { %2789 = vmatpush2.msra.mxu0 %v13957_v53  ;;  %2954 = vmatpush2.msra.mxu1 %v13804_v12  ;;  %v13965_v12 = vld [vmem:[#allocation125_spill] sm:$0xff]  ;;  %v8445_v0 = vpop.f32.mrf.mxu0 }
 0x171   : > { %2793 = vmatprep.subr.mxu0 %v13958_v43  ;;  %2956 = vmatprep.subr.mxu1 %v13960_v6  ;;  %v8446_v15 = vadd.f32 %v8445_v0, %v8444_v8  ;;  %v8483_v51 = vpop.f32.mrf.mxu1  ;;  %v13994_v19 = vld [vmem:[#allocation37_spill] sm:$0xff] }
 0x172   : > { %2797 = vmatpush2.msra.mxu0 %v13962_v55  ;;  %2958 = vmatpush2.msra.mxu1 %v13963_v48  ;;  %v8484_v11 = vadd.f32 %v8483_v51, %v8482_v37 }
 0x173   : > { %2801 = vmatprep.subr.mxu0 %v13964_v18  ;;  %2960 = vmatprep.subr.mxu1 %v13965_v12  ;;  %v1294_v28 = vadd.f32 %v8446_v15, %v11559_v60  ;;  %v8485_v16 = vpop.f32.mrf.mxu1  ;;  %v13984_v60 = vld [vmem:[#allocation39_spill] sm:$0xff] }
 0x174   : > { %2805 = vmatpush2.msra.mxu0 %v13967_v42  ;;  %2962 = vmatpush2.msra.mxu1 %v13968_v27  ;;  %v11657_v2 = vadd.f32 %v8484_v11, %v1280_v29 }
 0x175   : > { %2809 = vmatprep.subr.mxu0 %v13970_v30  ;;  %2964 = vmatprep.subr.mxu1 %v13971_v50  ;;  %v8486_v4 = vpop.f32.mrf.mxu1 }
 0x176   : > { %2813 = vmatpush2.msra.mxu0 %v13972_v40  ;;  %2966 = vmatpush2.msra.mxu1 %v13815_v26  ;;  %13978 = vst [vmem:[#allocation10_spill] sm:$0xff] %v11657_v2  ;;  %v13982_v26 = vld [vmem:[#allocation139_spill] sm:$0xff]  ;;  %v8487_v32 = vadd.f32 %v8486_v4, %v8485_v16 }
 0x177   : > { %2817 = vmatprep.subr.mxu0 %v13974_v47  ;;  %2968 = vmatprep.subr.mxu1 %v13975_v52  ;;  %v13983_v54 = vand.u32 4294901760, %v13982_v26 }
 0x178   : > { %2821 = vmatpush2.msra.mxu0 %v13977_v57  ;;  %2970 = vmatpush2.msra.mxu1 %v11089_v61  ;;  %v13986_v61 = vld [vmem:[#allocation47_spill] sm:$0xff]  ;;  %v11671_v35 = vadd.f32 %v8487_v32, %v1287_v62  ;;  %v8488_v22 = vpop.f32.mrf.mxu1 }
 0x179   : > { %2825 = vmatprep.subr.mxu0 %v13980_v9  ;;  %2972 = vmatprep.subr.mxu1 %v13981_v59 }
 0x17a   : > { %2829 = vmatpush2.msra.mxu0 %v13983_v54  ;;  %2831 = vmatprep.mubr.f32.mxu0 %v13984_v60  ;;  %13987 = vst [vmem:[#allocation21_spill] sm:$0xff] %v11671_v35  ;;  %v8489_v29 = vpop.f32.mrf.mxu1 }
 0x17b   : > { %2974 = vmatpush2.msra.mxu1 %v11115_v41  ;;  %2833 = vmatmul.mubr.f32.vlgmr.msra.gmra.mxu0 %v13985_v14  ;;  %v13988_v41 = vld [vmem:[#allocation48_spill] sm:$0xff]  ;;  %v8490_v17 = vadd.f32 %v8489_v29, %v8488_v22 }
 0x17c   : > { %2976 = vmatprep.subr.mxu1 %v11144_v23  ;;  %2839 = vmatprep.mubr.f32.mxu0 %v13986_v61 }
 0x17d   : > { %2978 = vmatpush2.msra.mxu1 %v11140_v44  ;;  %2992 = vmatprep.mubr.f32.mxu1 %v13984_v60  ;;  %v13989_v44 = vld [vmem:[#allocation50_spill] sm:$0xff]  ;;  %v11681_v23 = vadd.f32 %v8490_v17, %v1294_v28 }
 0x17e   : > { %2980 = vmatprep.subr.mxu1 %v11161_v7  ;;  %v13991_v7 = vld [vmem:[#allocation52_spill] sm:$0xff] }
 0x17f   : > { %2982 = vmatpush2.msra.mxu1 %v11172_v39  ;;  %2841 = vmatmul.mubr.f32.gmra.mxu0 %v13988_v41  ;;  %13990 = vst [vmem:[#allocation30_spill] sm:$0xff] %v11681_v23 }
 0x180   : > { %2984 = vmatprep.subr.mxu1 %v11179_v63  ;;  %2847 = vmatprep.mubr.f32.mxu0 %v13989_v44 }
 0x181   : > { %2986 = vmatpush2.msra.mxu1 %v11189_v49 }
 0x182   : > { %2988 = vmatprep.subr.mxu1 %v11196_v31  ;;  %v13992_v31 = vld [vmem:[#allocation45_spill] sm:$0xff] }
 0x183   : > { %2990 = vmatpush2.msra.mxu1 %v11209_v10  ;;  %2849 = vmatmul.mubr.f32.gmra.mxu0 %v13991_v7 }
 0x184   : > { %2994 = vmatmul.mubr.f32.vlgmr.msra.gmra.mxu1 %v13985_v14  ;;  %2855 = vmatprep.mubr.f32.mxu0 %v13821_v13 }
 0x185   : > { %3000 = vmatprep.mubr.f32.mxu1 %v13986_v61 }
 0x187   : > { %2857 = vmatmul.mubr.f32.gmra.mxu0 %v13824_v1 }
 0x188   : > { %3002 = vmatmul.mubr.f32.gmra.mxu1 %v13988_v41 }
 0x189   : > { %3008 = vmatprep.mubr.f32.mxu1 %v13989_v44  ;;  %v1441_v49 = vpop.permute.xlu0 %1440 }
 0x18a   : > { %v11692_v39 = vmax.f32 %v13992_v31, %v1441_v49 }
 0x18c   : > { %3010 = vmatmul.mubr.f32.gmra.mxu1 %v13991_v7  ;;  %1460 = vrot.lane.b32.xlu0 %v11692_v39, %s9464_s29 }
 0x18d   : > { %3016 = vmatprep.mubr.f32.mxu1 %v13821_v13  ;;  %v1439_v10 = vpop.permute.xlu0 %1438 }
 0x18e   : > { %v1437_v63 = vpop.permute.xlu1 %1436  ;;  %v11699_v45 = vmax.f32 %v13993_v21, %v1439_v10 }
 0x18f   : > { %v11702_v25 = vmax.f32 %v13994_v19, %v1437_v63 }
 0x190   : > { %3018 = vmatmul.mubr.f32.gmra.mxu1 %v13824_v1  ;;  %1458 = vrot.lane.b32.xlu1 %v11699_v45, %s9464_s29 }
 0x191   : > { %1456 = vrot.lane.b32.xlu0 %v11702_v25, %s9464_s29 }
 0x193   : > { %v1435_v58 = vpop.permute.xlu1 %1434 }
 0x194   : > { %v11710_v38 = vmax.f32 %v13995_v24, %v1435_v58 }
 0x196   : > { %1454 = vrot.lane.b32.xlu1 %v11710_v38, %s9464_s29 }
 0x1aa   : > { %v1694_v13 = vpop.f32.mrf.mxu0 }
 0x1ac   : > { %v1696_v53 = vpop.f32.mrf.mxu0 }
 0x1b3   : > { %v2135_v43 = vpop.f32.mrf.mxu1 }
 0x1b4   : > { %v2136_v44 = vadd.f32 %v2135_v43, %v1694_v13 }
 0x1b5   : > { %v2137_v33 = vpop.f32.mrf.mxu1 }
 0x1b6   : > { %v2138_v29 = vadd.f32 %v2137_v33, %v1696_v53 }
 0x1e1   : > { %v1710_v34 = vpop.f32.mrf.mxu0 }
 0x1e3   : > { %v1712_v6 = vpop.f32.mrf.mxu0 }
 0x1e6   : > { %v1726_v1 = vpop.f32.mrf.mxu0 }
 0x1e8   : > { %v2143_v55 = vpop.f32.mrf.mxu1  ;;  %v1728_v62 = vpop.f32.mrf.mxu0 }
 0x1ea   : > { %v2145_v8 = vpop.f32.mrf.mxu1 }
 0x1eb   : > { %v2146_v58 = vadd.f32 %v2145_v8, %v1712_v6 }
 0x1ec   : > { %v1742_v48 = vpop.f32.mrf.mxu0 }
 0x1ee   : > { %v2151_v18 = vpop.f32.mrf.mxu1  ;;  %v1744_v37 = vpop.f32.mrf.mxu0 }
 0x1ef   : > { %v2152_v14 = vadd.f32 %v2151_v18, %v1726_v1  ;;  %v2144_v18 = vadd.f32 %v2143_v55, %v1710_v34 }
 0x1f0   : > { %v2153_v12 = vpop.f32.mrf.mxu1 }
 0x1f1   : > { %v2154_v61 = vadd.f32 %v2153_v12, %v1728_v62 }
 0x1f3   : > { %v2362_v46 = vpop.f32.mrf.mxu0 }
 0x1f4   : > { %v2159_v42 = vpop.f32.mrf.mxu1  ;;  %v2363_v24 = vadd.f32 %v2362_v46, %v2136_v44 }
 0x1f5   : > { %v2364_v0 = vpop.f32.mrf.mxu0  ;;  %v2160_v7 = vadd.f32 %v2159_v42, %v1742_v48 }
 0x1f6   : > { %v2161_v27 = vpop.f32.mrf.mxu1  ;;  %v2365_v10 = vadd.f32 %v2364_v0, %v2138_v29 }
 0x1f7   : > { %v2162_v63 = vadd.f32 %v2161_v27, %v1744_v37 }
 0x1f9   : > { %v2372_v3 = vpop.f32.mrf.mxu0 }
 0x1fa   : > { %v2373_v27 = vadd.f32 %v2372_v3, %v2144_v18 }
 0x1fb   : > { %v2374_v15 = vpop.f32.mrf.mxu0 }
 0x1fc   : > { %v2375_v53 = vadd.f32 %v2374_v15, %v2146_v58 }
 0x1fe   : > { %v2533_v30 = vpop.f32.mrf.mxu1  ;;  %v2382_v50 = vpop.f32.mrf.mxu0 }
 0x1ff   : > { %v2383_v41 = vadd.f32 %v2382_v50, %v2152_v14  ;;  %v2534_v33 = vadd.f32 %v2533_v30, %v2363_v24 }
 0x200   : > { %v2535_v51 = vpop.f32.mrf.mxu1  ;;  %v2384_v11 = vpop.f32.mrf.mxu0 }
 0x201   : > { %v2385_v17 = vadd.f32 %v2384_v11, %v2154_v61  ;;  %v2536_v23 = vadd.f32 %v2535_v51, %v2365_v10 }
 0x204   : > { %v2545_v40 = vpop.f32.mrf.mxu1  ;;  %v2392_v47 = vpop.f32.mrf.mxu0 }
 0x205   : > { %v2393_v20 = vadd.f32 %v2392_v47, %v2160_v7 }
 0x206   : > { %v2547_v56 = vpop.f32.mrf.mxu1  ;;  %v2394_v52 = vpop.f32.mrf.mxu0 }
 0x207   : > { %v2395_v35 = vadd.f32 %v2394_v52, %v2162_v63  ;;  %v2548_v50 = vadd.f32 %v2547_v56, %v2375_v53 }
 0x20a   : > { %v2557_v28 = vpop.f32.mrf.mxu1 }
 0x20b   : > { %v2558_v21 = vadd.f32 %v2557_v28, %v2383_v41  ;;  %v2546_v28 = vadd.f32 %v2545_v40, %v2373_v27  ;;  %v3088_v41 = vld [vmem:[%s13063_s4] sm:$0xff] }
 0x20c   : > { %v2559_v5 = vpop.f32.mrf.mxu1  ;;  %v3118_v7 = vsel %vm3116_vm0, %v3088_v41, 0 }
 0x20d   : > { %v2560_v19 = vadd.f32 %v2559_v5, %v2385_v17  ;;  %v1461_v5 = vpop.permute.xlu0 %1460 }
 0x20f   : > { %v2569_v16 = vpop.f32.mrf.mxu1 }
 0x210   : > { %v2570_v12 = vadd.f32 %v2569_v16, %v2393_v20 }
 0x211   : > { %v2571_v59 = vpop.f32.mrf.mxu1 }
 0x212   : > { %v2572_v48 = vadd.f32 %v2571_v59, %v2395_v35  ;;  %v1459_v35 = vpop.permute.xlu1 %1458  ;;  %v1457_v59 = vpop.permute.xlu0 %1456 }
 0x213   : > { %v1468_v40 = vmax.f32 %v11699_v45, %v1459_v35  ;;  %v11800_v35 = vld [vmem:[%s13066_s7 + $0x8] sm:$0xff] }
 0x216   : > { %v1455_v16 = vpop.permute.xlu1 %1454 }
 0x23b   : > { %v2834_v57 = vpop.f32.mrf.mxu0 }
 0x23c   : > { %v2835_v6 = vadd.f32 %v2834_v57, %v2534_v33 }
 0x23d   : > { %v2836_v36 = vpop.f32.mrf.mxu0 }
 0x23e   : > { %v2837_v42 = vadd.f32 %v2836_v36, %v2536_v23  ;;  %v1469_v36 = vmax.f32 %v11692_v39, %v1461_v5 }
 0x23f   : > { %v2842_v9 = vpop.f32.mrf.mxu0 }
 0x240   : > { %v2843_v23 = vadd.f32 %v2842_v9, %v2546_v28  ;;  %v1466_v9 = vmax.f32 %v11710_v38, %v1455_v16  ;;  %v3091_v28 = vld [vmem:[%s13063_s4 + $0x18] sm:$0xff] }
 0x241   : > { %v2844_v26 = vpop.f32.mrf.mxu0 }
 0x242   : > { %v2845_v34 = vadd.f32 %v2844_v26, %v2548_v50  ;;  %v1467_v26 = vmax.f32 %v11702_v25, %v1457_v59  ;;  %v13997_v50 = vld [vmem:[#allocation30_spill] sm:$0xff] }
 0x243   : > { %v2850_v54 = vpop.f32.mrf.mxu0 }
 0x244   : > { %v2995_v4 = vpop.f32.mrf.mxu1  ;;  %v2851_v1 = vadd.f32 %v2850_v54, %v2558_v21 }
 0x245   : > { %v2852_v60 = vpop.f32.mrf.mxu0  ;;  %v2996_v55 = vadd.f32 %v2995_v4, %v2835_v6  ;;  %v1425_v6 = vmul.f32 0.0625, %v13997_v50 }
 0x246   : > { %v2997_v32 = vpop.f32.mrf.mxu1  ;;  %v2853_v62 = vadd.f32 %v2852_v60, %v2560_v19 }
 0x247   : > { %v2858_v49 = vpop.f32.mrf.mxu0  ;;  %v2998_v46 = vadd.f32 %v2997_v32, %v2837_v42 }
 0x248   : > { %v3003_v22 = vpop.f32.mrf.mxu1  ;;  %v2859_v11 = vadd.f32 %v2858_v49, %v2570_v12  ;;  %v11735_v49 = vand.u32 4294901760, %v3118_v7 }
 0x249   : > { %v2860_v13 = vpop.f32.mrf.mxu0  ;;  %v3004_v56 = vadd.f32 %v3003_v22, %v2843_v23 }
 0x24a   : > { %v3005_v31 = vpop.f32.mrf.mxu1  ;;  %v2861_v51 = vadd.f32 %v2860_v13, %v2572_v48  ;;  %8793 = vmatprep.mubr.f32.mxu1 %v11735_v49 }
 0x24b   : > { %v3006_v15 = vadd.f32 %v3005_v31, %v2845_v34  ;;  %v9467_v34 = vmov 0  }
 0x24c   : > { %v3011_v2 = vpop.f32.mrf.mxu1  ;;  %9311 = vset.pattern.permute.xlu1 %v9467_v34  ;;  %9310 = vset.pattern.permute.xlu0 %v9467_v34 }
 0x24d   : > { %v3012_v0 = vadd.f32 %v3011_v2, %v2851_v1  ;;  %v3024_v2 = vmax.f32 %v2996_v55, %v2998_v46  ;;  %v3025_v57 = vmax.f32 %v3004_v56, %v3006_v15  ;;  %v11783_v55 = vld [vmem:[%s13066_s7 + $0x18] sm:$0xff] }
 0x24e   : > { %v3013_v43 = vpop.f32.mrf.mxu1 }
 0x24f   : > { %v3014_v37 = vadd.f32 %v3013_v43, %v2853_v62  ;;  %v11743_v62 = vsub.f32 %v3118_v7, %v11735_v49 }
 0x250   : > { %v3019_v8 = vpop.f32.mrf.mxu1 }
 0x251   : > { %v3026_v47 = vmax.f32 %v3012_v0, %v3014_v37  ;;  %v3020_v30 = vadd.f32 %v3019_v8, %v2859_v11  ;;  %v3204_v12 = vand.u32 4294901760, %v11743_v62  ;;  %v13996_v0 = vld [vmem:[#allocation21_spill] sm:$0xff]  ;;  %v13998_v8 = vld [vmem:[#allocation10_spill] sm:$0xff]  ;;  %v13999_v11 = vld [vmem:[#allocation20_spill] sm:$0xff] }
 0x252   : > { %v3021_v52 = vpop.f32.mrf.mxu1  ;;  %v1424_v37 = vmul.f32 0.0625, %v13996_v0  ;;  %v1423_v46 = vmul.f32 0.0625, %v13998_v8 }
 0x253   : > { %v3022_v20 = vadd.f32 %v3021_v52, %v2861_v51  ;;  %3036 = vrot.lane.b32.xlu1 %v3026_v47, %s9463_s28  ;;  %v3205_v13 = vsub.f32 %v11743_v62, %v3204_v12  ;;  %v11763_v51 = vmul.f32 0.0625, %v13999_v11  ;;  %v3090_v52 = vld [vmem:[%s13063_s4 + $0x10] sm:$0xff] }
 0x255   : > { %v3027_v3 = vmax.f32 %v3020_v30, %v3022_v20  ;;  %v3206_v48 = vand.u32 4294901760, %v3205_v13  ;;  %v11788_v30 = vld [vmem:[%s13066_s7 + $0x10] sm:$0xff]  ;;  %v11795_v20 = vld [vmem:[%s13066_s7] sm:$0xff] }
 0x257   : > { %3032 = vrot.lane.b32.xlu1 %v3024_v2, %s9463_s28  ;;  %3038 = vrot.lane.b32.xlu0 %v3027_v3, %s9463_s28 }
 0x258   : > { %8771 = vmatprep.mubr.f32.mxu0 %v3206_v48 }
 0x25b   : > { %1478 = vrot.lane.b32.xlu1 %v1468_v40, %s9465_s14  ;;  %3034 = vrot.lane.b32.xlu0 %v3025_v57, %s9463_s28 }
 0x25f   : > { %1474 = vrot.lane.b32.xlu1 %v1466_v9, %s9465_s14  ;;  %1480 = vrot.lane.b32.xlu0 %v1469_v36, %s9465_s14 }
 0x263   : > { %1476 = vrot.lane.b32.xlu0 %v1467_v26, %s9465_s14 }
 0x2c5   : > { %v3037_v45 = vpop.permute.xlu1 %3036 }
 0x2c6   : > { %v3046_v54 = vmax.f32 %v3026_v47, %v3037_v45  ;;  %v3089_v47 = vld [vmem:[%s13063_s4 + $0x8] sm:$0xff]  ;;  %v11818_v45 = vand.u32 4294901760, %v1424_v37 }
 0x2c7   : > { %v3121_v15 = vsel %vm3116_vm0, %v3089_v47, 0 }
 0x2c8   : > { %3056 = vrot.lane.b32.xlu1 %v3046_v54, %s9464_s29 }
 0x2c9   : > { %v3033_v4 = vpop.permute.xlu1 %3032  ;;  %v3039_v60 = vpop.permute.xlu0 %3038 }
 0x2ca   : > { %v3044_v32 = vmax.f32 %v3024_v2, %v3033_v4  ;;  %v3047_v14 = vmax.f32 %v3027_v3, %v3039_v60 }
 0x2cc   : > { %3052 = vrot.lane.b32.xlu1 %v3044_v32, %s9464_s29  ;;  %3058 = vrot.lane.b32.xlu0 %v3047_v14, %s9464_s29 }
 0x2cd   : > { %v1479_v39 = vpop.permute.xlu1 %1478  ;;  %v3035_v38 = vpop.permute.xlu0 %3034 }
 0x2ce   : > { %v1488_v61 = vmax.f32 %v1468_v40, %v1479_v39  ;;  %v3045_v22 = vmax.f32 %v3025_v57, %v3035_v38  ;;  %v11833_v39 = vld [vmem:[%s13067_s8] sm:$0x3] }
 0x2cf   : > { %v11838_v38 = vld [vmem:[%s13064_s5] sm:$0x3] }
 0x2d0   : > { %3807 = vrot.lane.b32.xlu1 %v1488_v61, %s9466_s22  ;;  %3054 = vrot.lane.b32.xlu0 %v3045_v22, %s9464_s29  ;;  %v11840_v61 = vand.u32 4294901760, %v1423_v46 }
 0x2d1   : > { %v1475_v25 = vpop.permute.xlu1 %1474  ;;  %v1481_v29 = vpop.permute.xlu0 %1480 }
 0x2d2   : > { %v1486_v17 = vmax.f32 %v1466_v9, %v1475_v25  ;;  %v1489_v44 = vmax.f32 %v1469_v36, %v1481_v29  ;;  %v11810_v36 = vand.u32 4294901760, %v3121_v15  ;;  %v11812_v9 = vand.u32 4294901760, %v1425_v6 }
 0x2d4   : > { %3803 = vrot.lane.b32.xlu1 %v1486_v17, %s9466_s22  ;;  %3809 = vrot.lane.b32.xlu0 %v1489_v44, %s9466_s22  ;;  %v11848_v25 = vsub.f32 %v1425_v6, %v11812_v9  ;;  %v11859_v17 = vsub.f32 %v1424_v37, %v11818_v45  ;;  %v11862_v44 = vand.u32 4294901760, %v11763_v51 }
 0x2d5   : > { %v1477_v31 = vpop.permute.xlu0 %1476 }
 0x2d6   : > { %v1487_v10 = vmax.f32 %v1467_v26, %v1477_v31  ;;  %v11896_v13 = vand.u32 4294901760, %v11859_v17 }
 0x2d8   : > { %3805 = vrot.lane.b32.xlu0 %v1487_v10, %s9466_s22 }
 0x33a   : > { %v3057_v63 = vpop.permute.xlu1 %3056 }
 0x33b   : > { %v3066_v21 = vmax.f32 %v3046_v54, %v3057_v63 }
 0x33d   : > { %3076 = vrot.lane.b32.xlu1 %v3066_v21, %s9465_s14 }
 0x33e   : > { %v3053_v19 = vpop.permute.xlu1 %3052  ;;  %v3059_v58 = vpop.permute.xlu0 %3058 }
 0x33f   : > { %v3064_v24 = vmax.f32 %v3044_v32, %v3053_v19  ;;  %v3067_v1 = vmax.f32 %v3047_v14, %v3059_v58  ;;  %v3124_v58 = vsel %vm3116_vm0, %v3090_v52, 0 }
 0x341   : > { %3072 = vrot.lane.b32.xlu1 %v3064_v24, %s9465_s14  ;;  %3078 = vrot.lane.b32.xlu0 %v3067_v1, %s9465_s14 }
 0x342   : > { %v3808_v18 = vpop.permute.xlu1 %3807  ;;  %v3055_v53 = vpop.permute.xlu0 %3054 }
 0x343   : > { %v3065_v33 = vmax.f32 %v3045_v22, %v3055_v53  ;;  %v11843_v22 = vsub.f32 %v3121_v15, %v11810_v36  ;;  %v11888_v53 = vand.u32 4294901760, %v11848_v25 }
 0x345   : > { %3835 = vrot.lane.b32.xlu1 %v3808_v18, %s9465_s14  ;;  %3074 = vrot.lane.b32.xlu0 %v3065_v33, %s9465_s14  ;;  %v3214_v19 = vand.u32 4294901760, %v11843_v22 }
 0x346   : > { %v3810_v43 = vpop.permute.xlu0 %3809  ;;  %v3804_v42 = vpop.permute.xlu1 %3803 }
 0x349   : > { %3831 = vrot.lane.b32.xlu1 %v3804_v42, %s9465_s14  ;;  %3837 = vrot.lane.b32.xlu0 %v3810_v43, %s9465_s14  ;;  %v11898_v43 = vand.u32 4294901760, %v3124_v58 }
 0x34a   : > { %v3806_v27 = vpop.permute.xlu0 %3805 }
 0x34d   : > { %3833 = vrot.lane.b32.xlu0 %v3806_v27, %s9465_s14  ;;  %3827 = vrot.lane.b32.xlu1 %v1424_v37, %s9465_s14  ;;  %v3215_v37 = vsub.f32 %v11843_v22, %v3214_v19 }
 0x351   : > { %3829 = vrot.lane.b32.xlu0 %v1425_v6, %s9465_s14  ;;  %3811 = vrot.lane.b32.xlu1 %v3088_v41, %s9463_s28  ;;  %v3290_v6 = vsub.f32 %v11848_v25, %v11888_v53 }
 0x353   : > { %v3291_v34 = vand.u32 4294901760, %v3290_v6 }
 0x355   : > { %3825 = vrot.lane.b32.xlu0 %v1423_v46, %s9465_s14  ;;  %3823 = vrot.lane.b32.xlu1 %v11763_v51, %s9465_s14 }
 0x359   : > { %3813 = vrot.lane.b32.xlu0 %v3089_v47, %s9463_s28  ;;  %3817 = vrot.lane.b32.xlu1 %v3091_v28, %s9463_s28 }
 0x35d   : > { %3815 = vrot.lane.b32.xlu0 %v3090_v52, %s9463_s28  ;;  %3108 = vperm.xlu1 %9311, %v11788_v30   ;;  %s8214_s28 = sshll.u32 %s341_s26, 6 }
 0x35e   : > { %s12981_s27 = scalar_lea.vmem [#allocation5], %s8214_s28 }
 0x35f   : > { %s8134_s14 = sshll.u32 %s12981_s27, 4  ;;  %s13013_s14 = int_to_ptr.vmem [resolvable:$true] %s8134_s14 }
 0x360   : > { %s9394_s21 = scalar_lea.vmem %s13013_s14, 1024 }
 0x361   : > { %3113 = vperm.xlu0 %9310, %v11783_v55   ;;  %3103 = vperm.xlu1 %9311, %v11800_v35   ;;  %p9395_p8 = scmp.ne.s32.totalorder %s13013_s14, %s9394_s21 }
 0x363   : > { %p9396_p9 = pnand %p9395_p8, %p9563_p5 }
 0x365   : > { %3098 = vperm.xlu0 %9310, %v11795_v20   ;;  %5030 = vrot.lane.b32.xlu1 %v11838_v38, %s9464_s29  ;;  %s13009_s29 = scalar_lea.hbm %s13068_s9, %s8226_s16  ;;  %p9397_p10 = pneg %p9396_p9 }
 0x369   : > { %4533 = vperm.xlu0 %9310, %v11833_v39  }
 0x3af   : > { %v3077_v23 = vpop.permute.xlu1 %3076 }
 0x3b0   : > { %v3086_v2 = vmax.f32 %v3066_v21, %v3077_v23  ;;  %v11877_v21 = vsub.f32 %v1423_v46, %v11840_v61  ;;  %v11919_v46 = vsub.f32 %v3124_v58, %v11898_v43 }
 0x3b2   : > { %v11805_v3 = vand.u32 4294901760, %v3086_v2  ;;  %v11915_v8 = vand.u32 4294901760, %v11877_v21 }
 0x3b3   : > { %v3073_v56 = vpop.permute.xlu1 %3072  ;;  %v3079_v5 = vpop.permute.xlu0 %3078 }
 0x3b4   : > { %v11808_v40 = vsub.f32 %v3086_v2, %v11805_v3  ;;  %v3084_v57 = vmax.f32 %v3064_v24, %v3073_v56  ;;  %v3087_v16 = vmax.f32 %v3067_v1, %v3079_v5  ;;  %v3127_v24 = vsel %vm3116_vm0, %v3091_v28, 0 }
 0x3b5   : > { %v11908_v27 = vand.u32 4294901760, %v3127_v24  ;;  %v3216_v28 = vand.u32 4294901760, %v3215_v37  ;;  %v3304_v23 = vsub.f32 %v11877_v21, %v11915_v8  ;;  %v3224_v56 = vand.u32 4294901760, %v11919_v46 }
 0x3b6   : > { %v11814_v59 = vand.u32 4294901760, %v3084_v57  ;;  %v11816_v26 = vand.u32 4294901760, %v3087_v16  ;;  %v11828_v14 = vand.u32 4294901760, %v11808_v40 }
 0x3b7   : > { %v3075_v54 = vpop.permute.xlu0 %3074  ;;  %v11928_v52 = vsub.f32 %v3127_v24, %v11908_v27 }
 0x3b8   : > { %v11821_v4 = vsub.f32 %v3084_v57, %v11814_v59  ;;  %v11824_v60 = vsub.f32 %v3087_v16, %v11816_v26  ;;  %v3085_v32 = vmax.f32 %v3065_v33, %v3075_v54  ;;  %8755 = vmatprep.subr.mxu0 %v11816_v26  ;;  %v3269_v10 = vsub.f32 %v11808_v40, %v11828_v14 }
 0x3b9   : > { %8756 = vmatpush3.msra.mxu0 %v11816_v26  ;;  %v11892_v33 = vsub.f32 %v11763_v51, %v11862_v44  ;;  %v3297_v51 = vsub.f32 %v11859_v17, %v11896_v13  ;;  %v3234_v5 = vand.u32 4294901760, %v11928_v52  ;;  %v3305_v57 = vand.u32 4294901760, %v3304_v23 }
 0x3ba   : > { %v11850_v29 = vand.u32 4294901760, %v3085_v32  ;;  %8757 = vmatprep.subr.mxu0 %v11805_v3  ;;  %v11854_v41 = vand.u32 4294901760, %v11824_v60  ;;  %v11874_v63 = vand.u32 4294901760, %v11821_v4  ;;  %v3270_v48 = vand.u32 4294901760, %v3269_v10 }
 0x3bb   : > { %8758 = vmatpush3.msra.mxu0 %v11805_v3  ;;  %v11925_v47 = vand.u32 4294901760, %v11892_v33  ;;  %v3298_v2 = vand.u32 4294901760, %v3297_v51  ;;  %v3225_v54 = vsub.f32 %v11919_v46, %v3224_v56 }
 0x3bc   : > { %v11866_v7 = vsub.f32 %v3085_v32, %v11850_v29  ;;  %8759 = vmatprep.subr.mxu0 %v11850_v29  ;;  %v3262_v31 = vsub.f32 %v11824_v60, %v11854_v41  ;;  %v3283_v0 = vsub.f32 %v11821_v4, %v11874_v63  ;;  %v11954_v32 = vpop.permute.xlu0 %3837 }
 0x3bd   : > { %8760 = vmatpush3.msra.mxu0 %v11850_v29  ;;  %v3311_v15 = vsub.f32 %v11892_v33, %v11925_v47  ;;  %v12015_v58 = vand.u32 4294901760, %v11954_v32 }
 0x3be   : > { %8761 = vmatprep.subr.mxu0 %v11814_v59  ;;  %v3263_v1 = vand.u32 4294901760, %v3262_v31  ;;  %v11885_v18 = vand.u32 4294901760, %v11866_v7  ;;  %v3284_v11 = vand.u32 4294901760, %v3283_v0 }
 0x3bf   : > { %8762 = vmatpush3.msra.mxu0 %v11814_v59  ;;  %v3312_v16 = vand.u32 4294901760, %v3311_v15 }
 0x3c0   : > { %8763 = vmatprep.subr.mxu0 %v11812_v9  ;;  %8777 = vmatprep.subr.mxu1 %v3263_v1  ;;  %v3276_v42 = vsub.f32 %v11866_v7, %v11885_v18 }
 0x3c1   : > { %8764 = vmatpush3.msra.mxu0 %v11812_v9  ;;  %8778 = vmatpush3.msra.mxu1 %v3263_v1 }
 0x3c2   : > { %8765 = vmatprep.subr.mxu0 %v11818_v45  ;;  %8779 = vmatprep.subr.mxu1 %v3270_v48  ;;  %v3277_v50 = vand.u32 4294901760, %v3276_v42 }
 0x3c3   : > { %8780 = vmatpush3.msra.mxu1 %v3270_v48  ;;  %8766 = vmatpush3.msra.mxu0 %v11818_v45 }
 0x3c4   : > { %8767 = vmatprep.subr.mxu0 %v11840_v61  ;;  %8781 = vmatprep.subr.mxu1 %v3277_v50 }
 0x3c5   : > { %8768 = vmatpush3.msra.mxu0 %v11840_v61  ;;  %8782 = vmatpush3.msra.mxu1 %v3277_v50 }
 0x3c6   : > { %8769 = vmatprep.subr.mxu0 %v11862_v44  ;;  %8783 = vmatprep.subr.mxu1 %v3284_v11 }
 0x3c7   : > { %8784 = vmatpush3.msra.mxu1 %v3284_v11  ;;  %8770 = vmatpush3.msra.mxu0 %v11862_v44 }
 0x3c8   : > { %8785 = vmatprep.subr.mxu1 %v3291_v34  ;;  %8799 = vmatprep.subr.mxu0 %v11824_v60 }
 0x3c9   : > { %8772 = vmatmul.mubr.f32.vlgmr.msra.gmra.mxu0 %v3216_v28  ;;  %8786 = vmatpush3.msra.mxu1 %v3291_v34 }
 0x3ca   : > { %8800 = vmatpush3.msra.mxu0 %v11824_v60  ;;  %8787 = vmatprep.subr.mxu1 %v3298_v2  ;;  %v3235_v60 = vsub.f32 %v11928_v52, %v3234_v5 }
 0x3cb   : > { %8801 = vmatprep.subr.mxu0 %v11808_v40  ;;  %8788 = vmatpush3.msra.mxu1 %v3298_v2 }
 0x3cc   : > { %8802 = vmatpush3.msra.mxu0 %v11808_v40  ;;  %8789 = vmatprep.subr.mxu1 %v3305_v57  ;;  %v3226_v40 = vand.u32 4294901760, %v3225_v54  ;;  %v3236_v31 = vand.u32 4294901760, %v3235_v60 }
 0x3cd   : > { %8803 = vmatprep.subr.mxu0 %v11866_v7  ;;  %8790 = vmatpush3.msra.mxu1 %v3305_v57 }
 0x3ce   : > { %8804 = vmatpush3.msra.mxu0 %v11866_v7  ;;  %8791 = vmatprep.subr.mxu1 %v3312_v16  ;;  %v11960_v7 = vpop.permute.xlu1 %3835 }
 0x3cf   : > { %8805 = vmatprep.subr.mxu0 %v11821_v4  ;;  %8792 = vmatpush3.msra.mxu1 %v3312_v16 }
 0x3d0   : > { %8806 = vmatpush3.msra.mxu0 %v11821_v4  ;;  %8794 = vmatmul.mubr.f32.vlgmr.msra.gmra.mxu1 %v11810_v36  ;;  %v11968_v4 = vpop.permute.xlu0 %3833 }
 0x3d1   : > { %8807 = vmatprep.subr.mxu0 %v11848_v25  ;;  %8821 = vmatprep.subr.mxu1 %v11816_v26 }
 0x3d2   : > { %8808 = vmatpush3.msra.mxu0 %v11848_v25  ;;  %8822 = vmatpush3.msra.mxu1 %v11816_v26  ;;  %v11974_v25 = vpop.permute.xlu1 %3831 }
 0x3d3   : > { %8809 = vmatprep.subr.mxu0 %v11859_v17  ;;  %8823 = vmatprep.subr.mxu1 %v11805_v3 }
 0x3d4   : > { %8774 = vmatprep.mubr.f32.mxu0 %v3226_v40  ;;  %8810 = vmatpush3.msra.mxu0 %v11859_v17  ;;  %v11984_v17 = vpop.permute.xlu0 %3829 }
 0x3d5   : > { %8824 = vmatpush3.msra.mxu1 %v11805_v3  ;;  %8775 = vmatmul.mubr.f32.gmra.mxu0 %v3236_v31  ;;  %v12073_v48 = vand.u32 4294901760, %v11984_v17 }
 0x3d6   : > { %8811 = vmatprep.subr.mxu0 %v11877_v21  ;;  %8825 = vmatprep.subr.mxu1 %v11850_v29  ;;  %v11990_v10 = vpop.permute.xlu1 %3827 }
 0x3d7   : > { %8812 = vmatpush3.msra.mxu0 %v11877_v21  ;;  %8826 = vmatpush3.msra.mxu1 %v11850_v29  ;;  %v12093_v6 = vand.u32 4294901760, %v11990_v10  ;;  %v12111_v51 = vsub.f32 %v11984_v17, %v12073_v48 }
 0x3d8   : > { %8813 = vmatprep.subr.mxu0 %v11892_v33  ;;  %8827 = vmatprep.subr.mxu1 %v11814_v59 }
 0x3d9   : > { %8814 = vmatpush3.msra.mxu0 %v11892_v33  ;;  %8815 = vmatprep.mubr.f32.mxu0 %v11743_v62  ;;  %v12023_v62 = vand.u32 4294901760, %v11960_v7 }
 0x3da   : > { %8828 = vmatpush3.msra.mxu1 %v11814_v59  ;;  %8816 = vmatmul.mubr.f32.vlgmr.msra.gmra.mxu0 %v11843_v22 }
 0x3db   : > { %8829 = vmatprep.subr.mxu1 %v11812_v9  ;;  %8843 = vmatprep.subr.mxu0 %v11854_v41  ;;  %v12047_v24 = vsub.f32 %v11960_v7, %v12023_v62 }
 0x3dc   : > { %8830 = vmatpush3.msra.mxu1 %v11812_v9  ;;  %8844 = vmatpush3.msra.mxu0 %v11854_v41  ;;  %v12000_v41 = vpop.permute.xlu0 %3825 }
 0x3dd   : > { %8796 = vmatprep.mubr.f32.mxu1 %v11898_v43  ;;  %8831 = vmatprep.subr.mxu1 %v11818_v45  ;;  %v12079_v0 = vand.u32 4294901760, %v12047_v24 }
 0x3de   : > { %8845 = vmatprep.subr.mxu0 %v11828_v14  ;;  %8797 = vmatmul.mubr.f32.gmra.mxu1 %v11908_v27 }
 0x3df   : > { %8832 = vmatpush3.msra.mxu1 %v11818_v45  ;;  %8846 = vmatpush3.msra.mxu0 %v11828_v14  ;;  %v3812_v14 = vpop.permute.xlu1 %3811 }
 0x3e0   : > { %8818 = vmatprep.mubr.f32.mxu0 %v11919_v46  ;;  %8833 = vmatprep.subr.mxu1 %v11840_v61  ;;  %v3814_v21 = vpop.permute.xlu0 %3813  ;;  %v3847_v22 = vsel %vm3116_vm0, %v3812_v14, 0 }
 0x3e1   : > { %8847 = vmatprep.subr.mxu0 %v11885_v18  ;;  %8819 = vmatmul.mubr.f32.gmra.mxu0 %v11928_v52  ;;  %v12051_v1 = vand.u32 4294901760, %v3847_v22  ;;  %v12119_v52 = vand.u32 4294901760, %v12000_v41 }
 0x3e2   : > { %8834 = vmatpush3.msra.mxu1 %v11840_v61  ;;  %8848 = vmatpush3.msra.mxu0 %v11885_v18  ;;  %v12056_v18 = vand.u32 4294901760, %v11974_v25 }
 0x3e3   : > { %8835 = vmatprep.subr.mxu1 %v11862_v44  ;;  %8849 = vmatprep.subr.mxu0 %v11874_v63  ;;  %v12082_v37 = vsub.f32 %v3847_v22, %v12051_v1  ;;  %v12152_v16 = vsub.f32 %v12000_v41, %v12119_v52 }
 0x3e4   : > { %8836 = vmatpush3.msra.mxu1 %v11862_v44  ;;  %8837 = vmatprep.mubr.f32.mxu1 %v3204_v12  ;;  %v12027_v12 = vpop.permute.xlu1 %3823  ;;  %v12090_v50 = vsub.f32 %v11974_v25, %v12056_v18 }
 0x3e5   : > { %8850 = vmatpush3.msra.mxu0 %v11874_v63  ;;  %8838 = vmatmul.mubr.f32.vlgmr.msra.gmra.mxu1 %v3214_v19  ;;  %v3849_v63 = vsel %vm3116_vm0, %v3814_v21, 0  ;;  %v3816_v19 = vpop.permute.xlu0 %3815  ;;  %v3930_v28 = vand.u32 4294901760, %v12082_v37  ;;  %v12144_v57 = vand.u32 4294901760, %v12027_v12 }
 0x3e6   : > { %8851 = vmatprep.subr.mxu0 %v11888_v53  ;;  %8865 = vmatprep.subr.mxu1 %v11816_v26  ;;  %v3851_v33 = vsel %vm3116_vm0, %v3816_v19, 0  ;;  %v12134_v15 = vand.u32 4294901760, %v12090_v50 }
 0x3e7   : > { %8852 = vmatpush3.msra.mxu0 %v11888_v53  ;;  %8866 = vmatpush3.msra.mxu1 %v11816_v26  ;;  %v12034_v26 = vsub.f32 %v11954_v32, %v12015_v58  ;;  %v12060_v53 = vand.u32 4294901760, %v3849_v63 }
 0x3e8   : > { %8853 = vmatprep.subr.mxu0 %v11896_v13  ;;  %8867 = vmatprep.subr.mxu1 %v11805_v3  ;;  %v4009_v40 = vsub.f32 %v12090_v50, %v12134_v15 }
 0x3e9   : > { %8840 = vmatprep.mubr.f32.mxu1 %v3224_v56  ;;  %8854 = vmatpush3.msra.mxu0 %v11896_v13  ;;  %v12064_v13 = vand.u32 4294901760, %v12034_v26 }
 0x3ea   : > { %8868 = vmatpush3.msra.mxu1 %v11805_v3  ;;  %8855 = vmatprep.subr.mxu0 %v11915_v8  ;;  %v12040_v3 = vand.u32 4294901760, %v11968_v4  ;;  %v4010_v14 = vand.u32 4294901760, %v4009_v40 }
 0x3eb   : > { %8841 = vmatmul.mubr.f32.gmra.mxu1 %v3234_v5  ;;  %8869 = vmatprep.subr.mxu1 %v11850_v29  ;;  %v3988_v46 = vsub.f32 %v12034_v26, %v12064_v13 }
 0x3ec   : > { %8856 = vmatpush3.msra.mxu0 %v11915_v8  ;;  %8870 = vmatpush3.msra.mxu1 %v11850_v29  ;;  %v3818_v29 = vpop.permute.xlu1 %3817  ;;  %v12096_v8 = vsub.f32 %v3849_v63, %v12060_v53 }
 0x3ed   : > { %8857 = vmatprep.subr.mxu0 %v11925_v47  ;;  %8871 = vmatprep.subr.mxu1 %v11814_v59  ;;  %v3853_v42 = vsel %vm3116_vm0, %v3818_v29, 0  ;;  %v3989_v2 = vand.u32 4294901760, %v3988_v46 }
 0x3ee   : > { %8858 = vmatpush3.msra.mxu0 %v11925_v47  ;;  %8859 = vmatprep.mubr.f32.mxu0 %v11735_v49  ;;  %v3995_v47 = vsub.f32 %v12047_v24, %v12079_v0  ;;  %v3940_v23 = vand.u32 4294901760, %v12096_v8 }
 0x3ef   : > { %8872 = vmatpush3.msra.mxu1 %v11814_v59  ;;  %8860 = vmatmul.mubr.f32.vlgmr.msra.gmra.mxu0 %v11810_v36  ;;  %v12068_v59 = vsub.f32 %v11968_v4, %v12040_v3  ;;  %v12173_v4 = vsub.f32 %v12027_v12, %v12144_v57 }
 0x3f0   : > { %8873 = vmatprep.subr.mxu1 %v11812_v9  ;;  %8887 = vmatprep.subr.mxu0 %v12015_v58  ;;  %v3941_v60 = vsub.f32 %v12096_v8, %v3940_v23 }
 0x3f1   : > { %8874 = vmatpush3.msra.mxu1 %v11812_v9  ;;  %8888 = vmatpush3.msra.mxu0 %v12015_v58  ;;  %v12086_v9 = vand.u32 4294901760, %v3851_v33  ;;  %v12107_v11 = vand.u32 4294901760, %v12068_v59  ;;  %v12195_v22 = vand.u32 4294901760, %v12173_v4 }
 0x3f2   : > { %8875 = vmatprep.subr.mxu1 %v11818_v45  ;;  %8889 = vmatprep.subr.mxu0 %v12023_v62  ;;  %v3942_v41 = vand.u32 4294901760, %v3941_v60 }
 0x3f3   : > { %8862 = vmatprep.mubr.f32.mxu0 %v11898_v43  ;;  %8876 = vmatpush3.msra.mxu1 %v11818_v45  ;;  %v12104_v45 = vand.u32 4294901760, %v3853_v42  ;;  %v12124_v34 = vsub.f32 %v3851_v33, %v12086_v9  ;;  %v4002_v5 = vsub.f32 %v12068_v59, %v12107_v11 }
 0x3f4   : > { %8890 = vmatpush3.msra.mxu0 %v12023_v62  ;;  %8877 = vmatprep.subr.mxu1 %v11840_v61 }
 0x3f5   : > { %8863 = vmatmul.mubr.f32.gmra.mxu0 %v11908_v27  ;;  %8891 = vmatprep.subr.mxu0 %v12040_v3  ;;  %v12138_v56 = vsub.f32 %v3853_v42, %v12104_v45  ;;  %v3950_v54 = vand.u32 4294901760, %v12124_v34  ;;  %v4003_v7 = vand.u32 4294901760, %v4002_v5  ;;  %v4037_v42 = vsub.f32 %v12173_v4, %v12195_v22 }
 0x3f6   : > { %8878 = vmatpush3.msra.mxu1 %v11840_v61  ;;  %8892 = vmatpush3.msra.mxu0 %v12040_v3  ;;  %v12128_v61 = vsub.f32 %v11990_v10, %v12093_v6  ;;  %v12183_v10 = vand.u32 4294901760, %v12152_v16 }
 0x3f7   : > { %8879 = vmatprep.subr.mxu1 %v11862_v44  ;;  %8893 = vmatprep.subr.mxu0 %v12056_v18  ;;  %v3960_v31 = vand.u32 4294901760, %v12138_v56 }
 0x3f8   : > { %8880 = vmatpush3.msra.mxu1 %v11862_v44  ;;  %8881 = vmatprep.mubr.f32.mxu1 %v11735_v49  ;;  %v3996_v49 = vand.u32 4294901760, %v3995_v47  ;;  %v12148_v44 = vand.u32 4294901760, %v12111_v51  ;;  %v12166_v32 = vand.u32 4294901760, %v12128_v61  ;;  %v4030_v19 = vsub.f32 %v12152_v16, %v12183_v10 }
 0x3f9   : > { %8894 = vmatpush3.msra.mxu0 %v12056_v18  ;;  %8882 = vmatmul.mubr.f32.vlgmr.msra.gmra.mxu1 %v11810_v36  ;;  %v3931_v36 = vsub.f32 %v12082_v37, %v3930_v28  ;;  %v4038_v47 = vand.u32 4294901760, %v4037_v42 }
 0x3fa   : > { %8895 = vmatprep.subr.mxu0 %v12073_v48  ;;  %8909 = vmatprep.subr.mxu1 %v3989_v2  ;;  %v4016_v25 = vsub.f32 %v12111_v51, %v12148_v44  ;;  %v4023_v21 = vsub.f32 %v12128_v61, %v12166_v32  ;;  %v4031_v46 = vand.u32 4294901760, %v4030_v19 }
 0x3fb   : > { %8896 = vmatpush3.msra.mxu0 %v12073_v48  ;;  %8910 = vmatpush3.msra.mxu1 %v3989_v2  ;;  %v3932_v17 = vand.u32 4294901760, %v3931_v36 }
 0x3fc   : > { %8897 = vmatprep.subr.mxu0 %v12093_v6  ;;  %8911 = vmatprep.subr.mxu1 %v3996_v49  ;;  %v4017_v12 = vand.u32 4294901760, %v4016_v25  ;;  %v4024_v29 = vand.u32 4294901760, %v4023_v21 }
 0x3fd   : > { %8884 = vmatprep.mubr.f32.mxu1 %v11898_v43  ;;  %8898 = vmatpush3.msra.mxu0 %v12093_v6  ;;  %v3951_v43 = vsub.f32 %v12124_v34, %v3950_v54 }
 0x3fe   : > { %8912 = vmatpush3.msra.mxu1 %v3996_v49  ;;  %8899 = vmatprep.subr.mxu0 %v12119_v52 }
 0x3ff   : > { %8885 = vmatmul.mubr.f32.gmra.mxu1 %v11908_v27  ;;  %8913 = vmatprep.subr.mxu1 %v4003_v7  ;;  %v3961_v27 = vsub.f32 %v12138_v56, %v3960_v31  ;;  %v3952_v63 = vand.u32 4294901760, %v3951_v43 }
 0x400   : > { %8900 = vmatpush3.msra.mxu0 %v12119_v52  ;;  %8914 = vmatpush3.msra.mxu1 %v4003_v7 }
 0x401   : > { %8925 = vmatprep.mubr.f32.mxu1 %v12051_v1  ;;  %8901 = vmatprep.subr.mxu0 %v12144_v57  ;;  %v3962_v33 = vand.u32 4294901760, %v3961_v27 }
 0x402   : > { %8915 = vmatprep.subr.mxu1 %v4010_v14  ;;  %8902 = vmatpush3.msra.mxu0 %v12144_v57 }
 0x403   : > { %8903 = vmatprep.mubr.f32.mxu0 %v3932_v17  ;;  %8916 = vmatpush3.msra.mxu1 %v4010_v14 }
 0x404   : > { %8904 = vmatmul.mubr.f32.vlgmr.msra.gmra.mxu0 %v3942_v41  ;;  %8917 = vmatprep.subr.mxu1 %v4017_v12 }
 0x405   : > { %8931 = vmatprep.subr.mxu0 %v12034_v26  ;;  %8918 = vmatpush3.msra.mxu1 %v4017_v12 }
 0x406   : > { %8932 = vmatpush3.msra.mxu0 %v12034_v26  ;;  %8919 = vmatprep.subr.mxu1 %v4024_v29 }
 0x407   : > { %8933 = vmatprep.subr.mxu0 %v12047_v24  ;;  %8906 = vmatprep.mubr.f32.mxu0 %v3952_v63 }
 0x408   : > { %8920 = vmatpush3.msra.mxu1 %v4024_v29  ;;  %8934 = vmatpush3.msra.mxu0 %v12047_v24 }
 0x409   : > { %8907 = vmatmul.mubr.f32.gmra.mxu0 %v3962_v33  ;;  %8921 = vmatprep.subr.mxu1 %v4031_v46 }
 0x40a   : > { %8935 = vmatprep.subr.mxu0 %v12068_v59  ;;  %8922 = vmatpush3.msra.mxu1 %v4031_v46 }
 0x40b   : > { %8936 = vmatpush3.msra.mxu0 %v12068_v59  ;;  %8947 = vmatprep.mubr.f32.mxu0 %v12082_v37  ;;  %v12306_v37 = vpop.permute.xlu1 %3108 }
 0x40c   : > { %8923 = vmatprep.subr.mxu1 %v4038_v47  ;;  %8937 = vmatprep.subr.mxu0 %v12090_v50 }
 0x40d   : > { %8924 = vmatpush3.msra.mxu1 %v4038_v47  ;;  %8938 = vmatpush3.msra.mxu0 %v12090_v50  ;;  %v12313_v50 = vpop.permute.xlu0 %3113 }
 0x40e   : > { %8926 = vmatmul.mubr.f32.vlgmr.msra.gmra.mxu1 %v12060_v53  ;;  %8939 = vmatprep.subr.mxu0 %v12111_v51 }
 0x40f   : > { %8953 = vmatprep.subr.mxu1 %v12015_v58  ;;  %8940 = vmatpush3.msra.mxu0 %v12111_v51 }
 0x410   : > { %8954 = vmatpush3.msra.mxu1 %v12015_v58  ;;  %8928 = vmatprep.mubr.f32.mxu1 %v12086_v9 }
 0x411   : > { %8941 = vmatprep.subr.mxu0 %v12128_v61  ;;  %8955 = vmatprep.subr.mxu1 %v12023_v62 }
 0x412   : > { %8942 = vmatpush3.msra.mxu0 %v12128_v61  ;;  %8956 = vmatpush3.msra.mxu1 %v12023_v62 }
 0x413   : > { %8929 = vmatmul.mubr.f32.gmra.mxu1 %v12104_v45  ;;  %8943 = vmatprep.subr.mxu0 %v12152_v16 }
 0x414   : > { %8957 = vmatprep.subr.mxu1 %v12040_v3  ;;  %8944 = vmatpush3.msra.mxu0 %v12152_v16 }
 0x415   : > { %8958 = vmatpush3.msra.mxu1 %v12040_v3  ;;  %8969 = vmatprep.mubr.f32.mxu1 %v3930_v28  ;;  %v12326_v28 = vpop.permute.xlu0 %3098 }
 0x416   : > { %8945 = vmatprep.subr.mxu0 %v12173_v4  ;;  %8959 = vmatprep.subr.mxu1 %v12056_v18 }
 0x417   : > { %8946 = vmatpush3.msra.mxu0 %v12173_v4  ;;  %8960 = vmatpush3.msra.mxu1 %v12056_v18 }
 0x418   : > { %8948 = vmatmul.mubr.f32.vlgmr.msra.gmra.mxu0 %v12096_v8  ;;  %8961 = vmatprep.subr.mxu1 %v12073_v48 }
 0x419   : > { %8975 = vmatprep.subr.mxu0 %v12064_v13  ;;  %8950 = vmatprep.mubr.f32.mxu0 %v12124_v34 }
 0x41a   : > { %8962 = vmatpush3.msra.mxu1 %v12073_v48  ;;  %8976 = vmatpush3.msra.mxu0 %v12064_v13  ;;  %v9470_v13 = vmov 1  }
 0x41b   : > { %8963 = vmatprep.subr.mxu1 %v12093_v6  ;;  %8977 = vmatprep.subr.mxu0 %v12079_v0 }
 0x41c   : > { %8964 = vmatpush3.msra.mxu1 %v12093_v6  ;;  %8978 = vmatpush3.msra.mxu0 %v12079_v0  ;;  %v12304_v0 = vld [vmem:[%s13065_s6 + $0x10] sm:$0xff] }
 0x41d   : > { %8951 = vmatmul.mubr.f32.gmra.mxu0 %v12138_v56  ;;  %8965 = vmatprep.subr.mxu1 %v12119_v52 }
 0x41e   : > { %8979 = vmatprep.subr.mxu0 %v12107_v11  ;;  %8966 = vmatpush3.msra.mxu1 %v12119_v52 }
 0x41f   : > { %8980 = vmatpush3.msra.mxu0 %v12107_v11  ;;  %8991 = vmatprep.mubr.f32.mxu0 %v12051_v1 }
 0x420   : > { %8967 = vmatprep.subr.mxu1 %v12144_v57  ;;  %8981 = vmatprep.subr.mxu0 %v12134_v15 }
 0x421   : > { %8968 = vmatpush3.msra.mxu1 %v12144_v57  ;;  %8982 = vmatpush3.msra.mxu0 %v12134_v15 }
 0x422   : > { %8970 = vmatmul.mubr.f32.vlgmr.msra.gmra.mxu1 %v3940_v23  ;;  %8983 = vmatprep.subr.mxu0 %v12148_v44 }
 0x423   : > { %8997 = vmatprep.subr.mxu1 %v12015_v58  ;;  %8972 = vmatprep.mubr.f32.mxu1 %v3950_v54 }
 0x424   : > { %8984 = vmatpush3.msra.mxu0 %v12148_v44  ;;  %8998 = vmatpush3.msra.mxu1 %v12015_v58  ;;  %v9468_v58 = vmov 0.0  }
 0x425   : > { %8985 = vmatprep.subr.mxu0 %v12166_v32  ;;  %8999 = vmatprep.subr.mxu1 %v12023_v62 }
 0x426   : > { %8986 = vmatpush3.msra.mxu0 %v12166_v32  ;;  %9000 = vmatpush3.msra.mxu1 %v12023_v62 }
 0x427   : > { %8973 = vmatmul.mubr.f32.gmra.mxu1 %v3960_v31  ;;  %8987 = vmatprep.subr.mxu0 %v12183_v10 }
 0x428   : > { %9001 = vmatprep.subr.mxu1 %v12040_v3  ;;  %8988 = vmatpush3.msra.mxu0 %v12183_v10 }
 0x429   : > { %9002 = vmatpush3.msra.mxu1 %v12040_v3  ;;  %9013 = vmatprep.mubr.f32.mxu1 %v12051_v1 }
 0x42a   : > { %8989 = vmatprep.subr.mxu0 %v12195_v22  ;;  %9003 = vmatprep.subr.mxu1 %v12056_v18 }
 0x42b   : > { %8990 = vmatpush3.msra.mxu0 %v12195_v22  ;;  %9004 = vmatpush3.msra.mxu1 %v12056_v18 }
 0x42c   : > { %8992 = vmatmul.mubr.f32.vlgmr.msra.gmra.mxu0 %v12060_v53  ;;  %9005 = vmatprep.subr.mxu1 %v12073_v48 }
 0x42d   : > { %8994 = vmatprep.mubr.f32.mxu0 %v12086_v9  ;;  %9006 = vmatpush3.msra.mxu1 %v12073_v48 }
 0x42e   : > { %9007 = vmatprep.subr.mxu1 %v12093_v6  ;;  %9019 = vmatprep.subr.mxu0 %v9468_v58 }
 0x42f   : > { %9008 = vmatpush3.msra.mxu1 %v12093_v6  ;;  %9312 = vset.pattern.permute.xlu1 %v9470_v13 }
 0x430   : > { %8995 = vmatmul.mubr.f32.gmra.mxu0 %v12104_v45  ;;  %9009 = vmatprep.subr.mxu1 %v12119_v52 }
 0x431   : > { %9010 = vmatpush3.msra.mxu1 %v12119_v52  ;;  %9027 = vmatprep.mubr.msk.f32.mxu0 %vm9469_vm1, %v9468_v58 }
 0x432   : > { %9011 = vmatprep.subr.mxu1 %v12144_v57  ;;  %5027 = vperm.xlu1 %9312, %v11833_v39   ;;  %v12320_v39 = vld [vmem:[%s13065_s6 + $0x18] sm:$0xff] }
 0x433   : > { %9012 = vmatpush3.msra.mxu1 %v12144_v57  ;;  %9313 = vset.pattern.permute.xlu0 %v9470_v13 }
 0x434   : > { %9014 = vmatmul.mubr.f32.vlgmr.msra.gmra.mxu1 %v12060_v53  ;;  %9030 = vmatprep.subr.mxu1 %v9468_v58  ;;  %v12297_v53 = vld [vmem:[%s13065_s6] sm:$0xff] }
 0x435   : > { %9016 = vmatprep.mubr.f32.mxu1 %v12086_v9  ;;  %6144 = vrot.lane.b32.xlu0 %v12297_v53, %s9471_s23  ;;  %v12311_v9 = vld [vmem:[%s13065_s6 + $0x8] sm:$0xff] }
 0x436   : > { %6146 = vrot.lane.b32.xlu1 %v12311_v9, %s9471_s23 }
 0x438   : > { %9017 = vmatmul.mubr.f32.gmra.mxu1 %v12104_v45  ;;  %v12322_v45 = vpop.permute.xlu1 %3103 }
 0x439   : > { %9038 = vmatprep.mubr.msk.f32.mxu1 %vm9469_vm1, %v9468_v58  ;;  %6148 = vrot.lane.b32.xlu0 %v12304_v0, %s9471_s23 }
 0x43a   : > { %6150 = vrot.lane.b32.xlu1 %v12320_v39, %s9471_s23  ;;  %s9473_s23 = smov [#allocation5]  }
 0x43b   : > { %s9398_s28 = sshll.u32 %s9473_s23, 4  ;;  %s9399_s28 = int_to_ptr.vmem [resolvable:$false] %s9398_s28 }
 0x43c   : > { %s9400_s16 = scalar_lea.vmem %s9399_s28, 2048  ;;  %p9401_p11 = scmp.lt.s32.totalorder %s13013_s14, %s9399_s28 }
 0x43d   : > { %5521 = vperm.xlu0 %9313, %v11795_v20   ;;  %p9402_p12 = scmp.lt.s32.totalorder %s9400_s16, %s9394_s21 }
 0x43e   : > { %5525 = vperm.xlu1 %9312, %v11800_v35  }
 0x43f   : > { %p9403_p13 = por %p9402_p12, %p9401_p11 }
 0x441   : > { %5533 = vperm.xlu0 %9313, %v11783_v55   ;;  %v4538_v55 = vsel %vm4536_vm2, %v11838_v38, 0  ;;  %p9404_p0 = pnand %p9403_p13, %p9397_p10 }
 0x442   : > { %5529 = vperm.xlu1 %9312, %v11788_v30   ;;  %v12337_v31 = vand.u32 4294901760, %v4538_v55 }
 0x444   : > { %v12340_v38 = vsub.f32 %v4538_v55, %v12337_v31 }
 0x446   : > { %v4611_v46 = vand.u32 4294901760, %v12340_v38 }
 0x448   : > { %v4612_v13 = vsub.f32 %v12340_v38, %v4611_v46 }
 0x489   : > { %v8773_v62 = vpop.f32.mrf.mxu0 }
 0x48a   : > { %v3219_v52 = vadd.f32 %v8773_v62, %v12322_v45 }
 0x48b   : > { %v3208_v26 = vpop.f32.mrf.mxu0 }
 0x48c   : > { %v3209_v23 = vadd.f32 %v3208_v26, %v12326_v28 }
 0x490   : > { %v8795_v24 = vpop.f32.mrf.mxu1 }
 0x491   : > { %v3356_v15 = vadd.f32 %v8795_v24, %v3219_v52  ;;  %v4613_v52 = vand.u32 4294901760, %v4612_v13 }
 0x492   : > { %v3349_v18 = vpop.f32.mrf.mxu1 }
 0x493   : > { %v3350_v5 = vadd.f32 %v3349_v18, %v3209_v23 }
 0x495   : > { %v8776_v3 = vpop.f32.mrf.mxu0 }
 0x496   : > { %v3239_v20 = vadd.f32 %v8776_v3, %v12313_v50 }
 0x497   : > { %v3228_v1 = vpop.f32.mrf.mxu0 }
 0x498   : > { %v3229_v57 = vadd.f32 %v3228_v1, %v12306_v37 }
 0x49a   : > { %v8817_v59 = vpop.f32.mrf.mxu0 }
 0x49b   : > { %v3463_v49 = vadd.f32 %v8817_v59, %v3356_v15 }
 0x49c   : > { %v3455_v6 = vpop.f32.mrf.mxu0 }
 0x49d   : > { %v3456_v16 = vadd.f32 %v3455_v6, %v3350_v5 }
 0x49e   : > { %v8798_v48 = vpop.f32.mrf.mxu1 }
 0x49f   : > { %v3368_v35 = vadd.f32 %v8798_v48, %v3239_v20 }
 0x4a0   : > { %v3361_v8 = vpop.f32.mrf.mxu1 }
 0x4a1   : > { %v8820_v11 = vpop.f32.mrf.mxu0  ;;  %v3362_v60 = vadd.f32 %v3361_v8, %v3229_v57 }
 0x4a2   : > { %v3477_v30 = vadd.f32 %v8820_v11, %v3368_v35 }
 0x4a3   : > { %v3469_v34 = vpop.f32.mrf.mxu0 }
 0x4a4   : > { %v3470_v10 = vadd.f32 %v3469_v34, %v3362_v60 }
 0x4a5   : > { %v8839_v51 = vpop.f32.mrf.mxu1 }
 0x4a6   : > { %v3566_v54 = vadd.f32 %v8839_v51, %v3463_v49 }
 0x4a7   : > { %v3557_v61 = vpop.f32.mrf.mxu1 }
 0x4a8   : > { %v3558_v40 = vadd.f32 %v3557_v61, %v3456_v16 }
 0x4ab   : > { %v8842_v56 = vpop.f32.mrf.mxu1 }
 0x4ac   : > { %v3582_v41 = vadd.f32 %v8842_v56, %v3477_v30 }
 0x4ad   : > { %v3573_v36 = vpop.f32.mrf.mxu1 }
 0x4ae   : > { %v3574_v12 = vadd.f32 %v3573_v36, %v3470_v10 }
 0x4af   : > { %v8861_v2 = vpop.f32.mrf.mxu0 }
 0x4b0   : > { %v3683_v32 = vadd.f32 %v8861_v2, %v3566_v54 }
 0x4b1   : > { %v3676_v44 = vpop.f32.mrf.mxu0 }
 0x4b2   : > { %v3677_v25 = vadd.f32 %v3676_v44, %v3558_v40 }
 0x4b5   : > { %v8864_v7 = vpop.f32.mrf.mxu0 }
 0x4b6   : > { %v3695_v22 = vadd.f32 %v8864_v7, %v3582_v41  ;;  %v5031_v41 = vpop.permute.xlu1 %5030 }
 0x4b7   : > { %v3688_v27 = vpop.f32.mrf.mxu0 }
 0x4b8   : > { %v3689_v29 = vadd.f32 %v3688_v27, %v3574_v12 }
 0x4b9   : > { %v8883_v4 = vpop.f32.mrf.mxu1 }
 0x4ba   : > { %v3780_v17 = vadd.f32 %v8883_v4, %v3683_v32 }
 0x4bb   : > { %v3773_v43 = vpop.f32.mrf.mxu1 }
 0x4bc   : > { %v3796_v14 = vmax.f32 %v3780_v17, 0.0  ;;  %v3774_v21 = vadd.f32 %v3773_v43, %v3677_v25 }
 0x4be   : > { %v3795_v63 = vmax.f32 %v3774_v21, 0.0  ;;  %v12342_v33 = vand.u32 4294901760, %v3796_v14 }
 0x4bf   : > { %v8886_v19 = vpop.f32.mrf.mxu1 }
 0x4c0   : > { %v3792_v42 = vadd.f32 %v8886_v19, %v3695_v22  ;;  %v12345_v62 = vand.u32 4294901760, %v3795_v63  ;;  %v12348_v24 = vsub.f32 %v3796_v14, %v12342_v33 }
 0x4c1   : > { %v3785_v47 = vpop.f32.mrf.mxu1 }
 0x4c2   : > { %v3798_v26 = vmax.f32 %v3792_v42, 0.0  ;;  %v3786_v3 = vadd.f32 %v3785_v47, %v3689_v29  ;;  %v12356_v59 = vsub.f32 %v3795_v63, %v12345_v62  ;;  %v4660_v8 = vand.u32 4294901760, %v12348_v24 }
 0x4c3   : > { %v5032_v63 = vsel %vm4536_vm2, %v5031_v41, 0 }
 0x4c4   : > { %v12350_v1 = vand.u32 4294901760, %v3798_v26  ;;  %v3797_v18 = vmax.f32 %v3786_v3, 0.0  ;;  %v4667_v34 = vand.u32 4294901760, %v12356_v59  ;;  %v4661_v2 = vsub.f32 %v12348_v24, %v4660_v8  ;;  %v12376_v57 = vpop.f32.mrf.mxu0 }
 0x4c5   : > { %v3945_v43 = vadd.f32 %v12376_v57, %v12322_v45  ;;  %v12430_v47 = vand.u32 4294901760, %v5032_v63 }
 0x4c6   : > { %v4645_v48 = vsub.f32 %v3798_v26, %v12350_v1  ;;  %v12359_v6 = vand.u32 4294901760, %v3797_v18  ;;  %9020 = vmatpush3.msra.mxu0 %v12350_v1  ;;  %v4668_v56 = vsub.f32 %v12356_v59, %v4667_v34  ;;  %v4662_v49 = vand.u32 4294901760, %v4661_v2  ;;  %v3934_v55 = vpop.f32.mrf.mxu0 }
 0x4c7   : > { %9021 = vmatprep.subr.mxu0 %v9468_v58  ;;  %v3935_v14 = vadd.f32 %v3934_v55, %v12326_v28 }
 0x4c8   : > { %v4646_v11 = vand.u32 4294901760, %v4645_v48  ;;  %v4652_v51 = vsub.f32 %v3797_v18, %v12359_v6  ;;  %9022 = vmatpush3.msra.mxu0 %v12359_v6  ;;  %v4669_v44 = vand.u32 4294901760, %v4668_v56 }
 0x4c9   : > { %9023 = vmatprep.subr.mxu0 %v9468_v58  ;;  %v8908_v16 = vpop.f32.mrf.mxu0 }
 0x4ca   : > { %v4647_v61 = vsub.f32 %v4645_v48, %v4646_v11  ;;  %v4653_v23 = vand.u32 4294901760, %v4652_v51  ;;  %9024 = vmatpush3.msra.mxu0 %v12342_v33  ;;  %v3965_v12 = vadd.f32 %v8908_v16, %v12313_v50 }
 0x4cb   : > { %9025 = vmatprep.subr.mxu0 %v9468_v58  ;;  %v3954_v54 = vpop.f32.mrf.mxu0 }
 0x4cc   : > { %v4654_v15 = vsub.f32 %v4652_v51, %v4653_v23  ;;  %9026 = vmatpush3.msra.mxu0 %v12345_v62  ;;  %v4648_v20 = vand.u32 4294901760, %v4647_v61  ;;  %v3955_v19 = vadd.f32 %v3954_v54, %v12306_v37  ;;  %v12433_v37 = vsub.f32 %v5032_v63, %v12430_v47 }
 0x4cd   : > { %9028 = vmatmul.mubr.f32.vlgmr.msra.gmra.mxu0 %v4613_v52  ;;  %9041 = vmatprep.subr.mxu0 %v9468_v58 }
 0x4ce   : > { %9031 = vmatpush3.msra.mxu1 %v4648_v20  ;;  %9042 = vmatpush3.msra.mxu0 %v4645_v48  ;;  %v4655_v5 = vand.u32 4294901760, %v4654_v15  ;;  %v8927_v35 = vpop.f32.mrf.mxu1  ;;  %v5105_v20 = vand.u32 4294901760, %v12433_v37 }
 0x4cf   : > { %9032 = vmatprep.subr.mxu1 %v9468_v58  ;;  %9043 = vmatprep.subr.mxu0 %v9468_v58  ;;  %v4082_v21 = vadd.f32 %v8927_v35, %v3945_v43 }
 0x4d0   : > { %9033 = vmatpush3.msra.mxu1 %v4655_v5  ;;  %9044 = vmatpush3.msra.mxu0 %v4652_v51  ;;  %v4075_v36 = vpop.f32.mrf.mxu1  ;;  %v5106_v16 = vsub.f32 %v12433_v37, %v5105_v20 }
 0x4d1   : > { %9034 = vmatprep.subr.mxu1 %v9468_v58  ;;  %9045 = vmatprep.subr.mxu0 %v9468_v58 }
 0x4d2   : > { %9035 = vmatpush3.msra.mxu1 %v4662_v49  ;;  %9046 = vmatpush3.msra.mxu0 %v12348_v24 }
 0x4d3   : > { %9036 = vmatprep.subr.mxu1 %v9468_v58  ;;  %9047 = vmatprep.subr.mxu0 %v9468_v58  ;;  %v8930_v40 = vpop.f32.mrf.mxu1 }
 0x4d4   : > { %9037 = vmatpush3.msra.mxu1 %v4669_v44  ;;  %9048 = vmatpush3.msra.mxu0 %v12356_v59  ;;  %v4094_v29 = vadd.f32 %v8930_v40, %v3965_v12 }
 0x4d5   : > { %9039 = vmatmul.mubr.f32.vlgmr.msra.gmra.mxu1 %v12337_v31  ;;  %9049 = vmatprep.mubr.msk.f32.mxu0 %vm9469_vm1, %v9468_v58  ;;  %v4087_v7 = vpop.f32.mrf.mxu1 }
 0x4d6   : > { %9052 = vmatprep.subr.mxu1 %v9468_v58  ;;  %9063 = vmatprep.subr.mxu0 %v9468_v58 }
 0x4d7   : > { %9050 = vmatmul.mubr.f32.vlgmr.msra.gmra.mxu0 %v12340_v38  ;;  %9053 = vmatpush3.msra.mxu1 %v12350_v1 }
 0x4d8   : > { %9064 = vmatpush3.msra.mxu0 %v4646_v11  ;;  %9054 = vmatprep.subr.mxu1 %v9468_v58  ;;  %v8949_v60 = vpop.f32.mrf.mxu0 }
 0x4d9   : > { %9065 = vmatprep.subr.mxu0 %v9468_v58  ;;  %9055 = vmatpush3.msra.mxu1 %v12359_v6  ;;  %v4189_v22 = vadd.f32 %v8949_v60, %v4082_v21 }
 0x4da   : > { %9066 = vmatpush3.msra.mxu0 %v4653_v23  ;;  %9056 = vmatprep.subr.mxu1 %v9468_v58  ;;  %v4181_v32 = vpop.f32.mrf.mxu0 }
 0x4db   : > { %9067 = vmatprep.subr.mxu0 %v9468_v58  ;;  %9057 = vmatpush3.msra.mxu1 %v12342_v33 }
 0x4dc   : > { %9068 = vmatpush3.msra.mxu0 %v4660_v8  ;;  %9058 = vmatprep.subr.mxu1 %v9468_v58 }
 0x4dd   : > { %9069 = vmatprep.subr.mxu0 %v9468_v58  ;;  %9059 = vmatpush3.msra.mxu1 %v12345_v62  ;;  %v8952_v4 = vpop.f32.mrf.mxu0 }
 0x4de   : > { %9060 = vmatprep.mubr.msk.f32.mxu1 %vm9469_vm1, %v9468_v58  ;;  %9070 = vmatpush3.msra.mxu0 %v4667_v34  ;;  %v4203_v28 = vadd.f32 %v8952_v4, %v4094_v29  ;;  %v9356_v29 = vld [vmem:[%s13066_s7] sm:$0xff] }
 0x4df   : > { %9061 = vmatmul.mubr.f32.vlgmr.msra.gmra.mxu1 %v4611_v46  ;;  %9074 = vmatprep.subr.mxu1 %v9468_v58  ;;  %v4195_v25 = vpop.f32.mrf.mxu0 }
 0x4e0   : > { %9071 = vmatprep.mubr.msk.f32.mxu0 %vm9469_vm1, %v9468_v58  ;;  %9075 = vmatpush3.msra.mxu1 %v12350_v1 }
 0x4e1   : > { %9072 = vmatmul.mubr.f32.vlgmr.msra.gmra.mxu0 %v12337_v31  ;;  %9076 = vmatprep.subr.mxu1 %v9468_v58 }
 0x4e2   : > { %9077 = vmatpush3.msra.mxu1 %v12359_v6  ;;  %9082 = vmatprep.mubr.msk.f32.mxu1 %vm9469_vm1, %v9468_v58  ;;  %v8971_v30 = vpop.f32.mrf.mxu1 }
 0x4e3   : > { %9078 = vmatprep.subr.mxu1 %v9468_v58  ;;  %9085 = vmatprep.subr.mxu0 %v9468_v58  ;;  %v4292_v42 = vadd.f32 %v8971_v30, %v4189_v22 }
 0x4e4   : > { %9079 = vmatpush3.msra.mxu1 %v12342_v33  ;;  %9093 = vmatprep.mubr.msk.f32.mxu0 %vm9469_vm1, %v9468_v58  ;;  %v4283_v17 = vpop.f32.mrf.mxu1 }
 0x4e5   : > { %9080 = vmatprep.subr.mxu1 %v9468_v58 }
 0x4e6   : > { %9081 = vmatpush3.msra.mxu1 %v12345_v62  ;;  %v4088_v62 = vadd.f32 %v4087_v7, %v3955_v19  ;;  %v5107_v7 = vand.u32 4294901760, %v5106_v16  ;;  %v9472_v19 = vmov 2  }
 0x4e7   : > { %9083 = vmatmul.mubr.f32.vlgmr.msra.gmra.mxu1 %v12337_v31  ;;  %9096 = vmatprep.subr.mxu1 %v9468_v58  ;;  %v8974_v38 = vpop.f32.mrf.mxu1  ;;  %v4076_v31 = vadd.f32 %v4075_v36, %v3935_v14 }
 0x4e8   : > { %9104 = vmatprep.mubr.msk.f32.mxu1 %vm9469_vm1, %v9468_v58  ;;  %v4196_v1 = vadd.f32 %v4195_v25, %v4088_v62  ;;  %v4308_v50 = vadd.f32 %v8974_v38, %v4203_v28  ;;  %9314 = vset.pattern.permute.xlu1 %v9472_v19 }
 0x4e9   : > { %v4182_v33 = vadd.f32 %v4181_v32, %v4076_v31  ;;  %v4299_v46 = vpop.f32.mrf.mxu1  ;;  %9315 = vset.pattern.permute.xlu0 %v9472_v19  ;;  %6129 = vperm.xlu1 %9314, %v9356_v29  }
 0x4ea   : > { %v4300_v6 = vadd.f32 %v4299_v46, %v4196_v1  ;;  %v9358_v46 = vld [vmem:[%s13066_s7 + $0x10] sm:$0xff]  ;;  %v5541_v1 = vsel %vm5536_vm3, %v12311_v9, 0 }
 0x4eb   : > { %v4284_v26 = vadd.f32 %v4283_v17, %v4182_v33  ;;  %v9357_v33 = vld [vmem:[%s13066_s7 + $0x8] sm:$0xff] }
 0x4ec   : > { %v8993_v10 = vpop.f32.mrf.mxu0  ;;  %6133 = vperm.xlu0 %9315, %v9357_v33  }
 0x4ed   : > { %v4409_v3 = vadd.f32 %v8993_v10, %v4292_v42  ;;  %6137 = vperm.xlu1 %9314, %v9358_v46  }
 0x4ee   : > { %v4402_v27 = vpop.f32.mrf.mxu0 }
 0x4ef   : > { %v4403_v18 = vadd.f32 %v4402_v27, %v4284_v26  ;;  %v5538_v27 = vsel %vm5536_vm3, %v12297_v53, 0 }
 0x4f0   : > { %v8996_v45 = vpop.f32.mrf.mxu0  ;;  %v12500_v12 = vand.u32 4294901760, %v5538_v27 }
 0x4f1   : > { %v4421_v8 = vadd.f32 %v8996_v45, %v4308_v50 }
 0x4f2   : > { %v4414_v59 = vpop.f32.mrf.mxu0  ;;  %v12505_v31 = vsub.f32 %v5538_v27, %v12500_v12 }
 0x4f3   : > { %v4415_v34 = vadd.f32 %v4414_v59, %v4300_v6  ;;  %v12527_v59 = vand.u32 4294901760, %v5541_v1 }
 0x4f4   : > { %v9015_v24 = vpop.f32.mrf.mxu1  ;;  %v5621_v22 = vand.u32 4294901760, %v12505_v31 }
 0x4f5   : > { %v4506_v13 = vadd.f32 %v9015_v24, %v4409_v3  ;;  %v4534_v3 = vpop.permute.xlu0 %4533 }
 0x4f6   : > { %v4499_v48 = vpop.f32.mrf.mxu1  ;;  %v5622_v53 = vsub.f32 %v12505_v31, %v5621_v22 }
 0x4f7   : > { %v4522_v11 = vmax.f32 %v4506_v13, 0.0  ;;  %v4500_v51 = vadd.f32 %v4499_v48, %v4403_v18  ;;  %v5544_v18 = vsel %vm5536_vm3, %v12304_v0, 0  ;;  %v5547_v48 = vsel %vm5536_vm3, %v12320_v39, 0 }
 0x4f8   : > { %v9018_v52 = vpop.f32.mrf.mxu1  ;;  %v5623_v63 = vand.u32 4294901760, %v5622_v53 }
 0x4f9   : > { %v12435_v61 = vand.u32 4294901760, %v4522_v11  ;;  %v4521_v23 = vmax.f32 %v4500_v51, 0.0  ;;  %v4518_v2 = vadd.f32 %v9018_v52, %v4421_v8  ;;  %v12534_v51 = vand.u32 4294901760, %v5547_v48 }
 0x4fa   : > { %v4511_v15 = vpop.f32.mrf.mxu1 }
 0x4fb   : > { %v12438_v56 = vand.u32 4294901760, %v4521_v23  ;;  %v4524_v5 = vmax.f32 %v4518_v2, 0.0  ;;  %v4512_v57 = vadd.f32 %v4511_v15, %v4415_v34  ;;  %v5153_v49 = vsub.f32 %v4522_v11, %v12435_v61 }
 0x4fc   : > { %v5630_v11 = vsub.f32 %v5541_v1, %v12527_v59  ;;  %v5650_v2 = vsub.f32 %v5547_v48, %v12534_v51 }
 0x4fd   : > { %v12441_v44 = vand.u32 4294901760, %v4524_v5  ;;  %v4523_v55 = vmax.f32 %v4512_v57, 0.0  ;;  %v5160_v35 = vsub.f32 %v4521_v23, %v12438_v56  ;;  %v5154_v60 = vand.u32 4294901760, %v5153_v49 }
 0x4fe   : > { %v5631_v23 = vand.u32 4294901760, %v5630_v11 }
 0x4ff   : > { %v5139_v54 = vsub.f32 %v4524_v5, %v12441_v44  ;;  %v12448_v36 = vand.u32 4294901760, %v4523_v55  ;;  %9086 = vmatpush3.msra.mxu0 %v12441_v44  ;;  %v5161_v4 = vand.u32 4294901760, %v5160_v35  ;;  %v5155_v17 = vsub.f32 %v5153_v49, %v5154_v60 }
 0x500   : > { %9087 = vmatprep.subr.mxu0 %v9468_v58  ;;  %v5632_v57 = vsub.f32 %v5630_v11, %v5631_v23 }
 0x501   : > { %v5140_v40 = vand.u32 4294901760, %v5139_v54  ;;  %v5146_v32 = vsub.f32 %v4523_v55, %v12448_v36  ;;  %9088 = vmatpush3.msra.mxu0 %v12448_v36  ;;  %v5162_v41 = vsub.f32 %v5160_v35, %v5161_v4  ;;  %v5156_v21 = vand.u32 4294901760, %v5155_v17 }
 0x502   : > { %9089 = vmatprep.subr.mxu0 %v9468_v58 }
 0x503   : > { %v5141_v30 = vsub.f32 %v5139_v54, %v5140_v40  ;;  %v5147_v25 = vand.u32 4294901760, %v5146_v32  ;;  %9090 = vmatpush3.msra.mxu0 %v12435_v61  ;;  %v5163_v38 = vand.u32 4294901760, %v5162_v41 }
 0x504   : > { %9091 = vmatprep.subr.mxu0 %v9468_v58 }
 0x505   : > { %v5148_v43 = vsub.f32 %v5146_v32, %v5147_v25  ;;  %9092 = vmatpush3.msra.mxu0 %v12438_v56  ;;  %v5142_v10 = vand.u32 4294901760, %v5141_v30 }
 0x506   : > { %9107 = vmatprep.subr.mxu0 %v9468_v58  ;;  %9094 = vmatmul.mubr.f32.vlgmr.msra.gmra.mxu0 %v5107_v7 }
 0x507   : > { %9097 = vmatpush3.msra.mxu1 %v5142_v10  ;;  %9108 = vmatpush3.msra.mxu0 %v5139_v54  ;;  %v5149_v14 = vand.u32 4294901760, %v5148_v43 }
 0x508   : > { %9098 = vmatprep.subr.mxu1 %v9468_v58  ;;  %9109 = vmatprep.subr.mxu0 %v9468_v58 }
 0x509   : > { %9099 = vmatpush3.msra.mxu1 %v5149_v14  ;;  %9110 = vmatpush3.msra.mxu0 %v5146_v32 }
 0x50a   : > { %9100 = vmatprep.subr.mxu1 %v9468_v58  ;;  %9111 = vmatprep.subr.mxu0 %v9468_v58 }
 0x50b   : > { %9101 = vmatpush3.msra.mxu1 %v5156_v21  ;;  %9112 = vmatpush3.msra.mxu0 %v5153_v49  ;;  %v5651_v49 = vand.u32 4294901760, %v5650_v2 }
 0x50c   : > { %9102 = vmatprep.subr.mxu1 %v9468_v58  ;;  %9113 = vmatprep.subr.mxu0 %v9468_v58 }
 0x50d   : > { %9103 = vmatpush3.msra.mxu1 %v5163_v38  ;;  %9114 = vmatpush3.msra.mxu0 %v5160_v35  ;;  %v6145_v35 = vpop.permute.xlu0 %6144 }
 0x50e   : > { %9115 = vmatprep.mubr.msk.f32.mxu0 %vm9469_vm1, %v9468_v58  ;;  %9105 = vmatmul.mubr.f32.vlgmr.msra.gmra.mxu1 %v12430_v47  ;;  %v6152_v7 = vsel %vm5536_vm3, %v6145_v35, 0  ;;  %v6789_v35 = vld [vmem:[%s13062_s3 + $0x18] sm:$0xff] }
 0x50f   : > { %9116 = vmatmul.mubr.f32.vlgmr.msra.gmra.mxu0 %v12433_v37  ;;  %9118 = vmatprep.subr.mxu1 %v9468_v58  ;;  %v12531_v37 = vand.u32 4294901760, %v5544_v18 }
 0x510   : > { %9129 = vmatprep.subr.mxu0 %v9468_v58  ;;  %9119 = vmatpush3.msra.mxu1 %v12441_v44 }
 0x511   : > { %9130 = vmatpush3.msra.mxu0 %v5140_v40  ;;  %9120 = vmatprep.subr.mxu1 %v9468_v58  ;;  %v5640_v34 = vsub.f32 %v5544_v18, %v12531_v37  ;;  %v6149_v33 = vpop.permute.xlu0 %6148 }
 0x512   : > { %9131 = vmatprep.subr.mxu0 %v9468_v58  ;;  %9121 = vmatpush3.msra.mxu1 %v12448_v36  ;;  %v6156_v46 = vsel %vm5536_vm3, %v6149_v33, 0 }
 0x513   : > { %9132 = vmatpush3.msra.mxu0 %v5147_v25  ;;  %9122 = vmatprep.subr.mxu1 %v9468_v58  ;;  %v12540_v25 = vand.u32 4294901760, %v6152_v7 }
 0x514   : > { %9133 = vmatprep.subr.mxu0 %v9468_v58  ;;  %9123 = vmatpush3.msra.mxu1 %v12435_v61 }
 0x515   : > { %9134 = vmatpush3.msra.mxu0 %v5154_v60  ;;  %9124 = vmatprep.subr.mxu1 %v9468_v58  ;;  %v5652_v60 = vsub.f32 %v5650_v2, %v5651_v49  ;;  %v12544_v10 = vsub.f32 %v6152_v7, %v12540_v25 }
 0x516   : > { %9135 = vmatprep.subr.mxu0 %v9468_v58  ;;  %9125 = vmatpush3.msra.mxu1 %v12438_v56 }
 0x517   : > { %9126 = vmatprep.mubr.msk.f32.mxu1 %vm9469_vm1, %v9468_v58  ;;  %9136 = vmatpush3.msra.mxu0 %v5161_v4  ;;  %v5653_v30 = vand.u32 4294901760, %v5652_v60  ;;  %v6231_v41 = vand.u32 4294901760, %v12544_v10 }
 0x518   : > { %9137 = vmatprep.mubr.msk.f32.mxu0 %vm9469_vm1, %v9468_v58  ;;  %9127 = vmatmul.mubr.f32.vlgmr.msra.gmra.mxu1 %v5105_v20  ;;  %v5641_v20 = vand.u32 4294901760, %v5640_v34 }
 0x519   : > { %9138 = vmatmul.mubr.f32.vlgmr.msra.gmra.mxu0 %v12430_v47  ;;  %9140 = vmatprep.subr.mxu1 %v9468_v58  ;;  %v6232_v14 = vsub.f32 %v12544_v10, %v6231_v41 }
 0x51a   : > { %9141 = vmatpush3.msra.mxu1 %v12441_v44  ;;  %9148 = vmatprep.mubr.msk.f32.mxu1 %vm9469_vm1, %v9468_v58  ;;  %v5642_v55 = vsub.f32 %v5640_v34, %v5641_v20 }
 0x51b   : > { %9142 = vmatprep.subr.mxu1 %v9468_v58  ;;  %9153 = vmatprep.mubr.f32.mxu0 %v5623_v63  ;;  %v6233_v21 = vand.u32 4294901760, %v6232_v14 }
 0x51c   : > { %9143 = vmatpush3.msra.mxu1 %v12448_v36  ;;  %v5633_v36 = vand.u32 4294901760, %v5632_v57  ;;  %v5643_v40 = vand.u32 4294901760, %v5642_v55 }
 0x51d   : > { %9144 = vmatprep.subr.mxu1 %v9468_v58 }
 0x51e   : > { %9145 = vmatpush3.msra.mxu1 %v12435_v61 }
 0x51f   : > { %9146 = vmatprep.subr.mxu1 %v9468_v58 }
 0x520   : > { %9147 = vmatpush3.msra.mxu1 %v12438_v56 }
 0x521   : > { %9149 = vmatmul.mubr.f32.vlgmr.msra.gmra.mxu1 %v12430_v47  ;;  %v9359_v47 = vld [vmem:[%s13066_s7 + $0x18] sm:$0xff] }
 0x522   : > { %9161 = vmatprep.mubr.f32.mxu1 %v12500_v12  ;;  %6141 = vperm.xlu1 %9314, %v9359_v47  }
 0x58d   : > { %v4615_v42 = vpop.f32.mrf.mxu0 }
 0x58e   : > { %v4616_v50 = vadd.f32 %v4615_v42, %v4534_v3  ;;  %v6249_v3 = vand.u32 4294901760, %v6156_v46 }
 0x58f   : > { %v9029_v45 = vpop.f32.mrf.mxu0 }
 0x595   : > { %v4706_v62 = vpop.f32.mrf.mxu1 }
 0x596   : > { %v4707_v13 = vadd.f32 %v4706_v62, %v4616_v50 }
 0x597   : > { %v4786_v28 = vpop.f32.mrf.mxu0  ;;  %v9040_v26 = vpop.f32.mrf.mxu1 }
 0x598   : > { %v4787_v8 = vadd.f32 %v4786_v28, %v4707_v13 }
 0x599   : > { %v9051_v24 = vpop.f32.mrf.mxu0 }
 0x59f   : > { %v4863_v6 = vpop.f32.mrf.mxu1 }
 0x5a0   : > { %v4864_v61 = vadd.f32 %v4863_v6, %v4787_v8 }
 0x5a1   : > { %v4946_v52 = vpop.f32.mrf.mxu0  ;;  %v9062_v9 = vpop.f32.mrf.mxu1 }
 0x5a2   : > { %v4947_v15 = vadd.f32 %v4946_v52, %v4864_v61 }
 0x5a3   : > { %v9073_v0 = vpop.f32.mrf.mxu0 }
 0x5a7   : > { %v5021_v39 = vpop.f32.mrf.mxu1 }
 0x5a8   : > { %v5022_v56 = vadd.f32 %v5021_v39, %v4947_v15 }
 0x5a9   : > { %v9084_v5 = vpop.f32.mrf.mxu1 }
 0x5aa   : > { %v5025_v44 = vmax.f32 %v5022_v56, 0.0 }
 0x5ac   : > { %v5551_v16 = vsel %vm5549_vm4, %v5025_v44, 0 }
 0x5ad   : > { %v5584_v54 = vand.u32 4294901760, %v5551_v16 }
 0x5af   : > { %v5691_v32 = vsub.f32 %v5551_v16, %v5584_v54  ;;  %9151 = vmatprep.subr.mxu0 %v5584_v54 }
 0x5b0   : > { %9152 = vmatpush3.msra.mxu0 %v5584_v54 }
 0x5b1   : > { %9154 = vmatmul.mubr.f32.vlgmr.msra.gmra.mxu0 %v5633_v36  ;;  %9167 = vmatprep.subr.mxu0 %v5691_v32  ;;  %v5692_v4 = vand.u32 4294901760, %v5691_v32  ;;  %v6788_v36 = vld [vmem:[%s13062_s3 + $0x10] sm:$0xff] }
 0x5b2   : > { %9168 = vmatpush3.msra.mxu0 %v5691_v32  ;;  %9156 = vmatprep.mubr.f32.mxu0 %v5643_v40  ;;  %v12589_v60 = vand.u32 4294901760, %v6788_v36  ;;  %v6787_v40 = vld [vmem:[%s13062_s3 + $0x8] sm:$0xff] }
 0x5b3   : > { %9183 = vmatprep.subr.mxu0 %v5692_v4  ;;  %v5693_v17 = vsub.f32 %v5691_v32, %v5692_v4  ;;  %v12597_v7 = vand.u32 4294901760, %v6787_v40 }
 0x5b5   : > { %9157 = vmatmul.mubr.f32.gmra.mxu0 %v5653_v30  ;;  %v5694_v43 = vand.u32 4294901760, %v5693_v17  ;;  %v12604_v30 = vsub.f32 %v6788_v36, %v12589_v60 }
 0x5b6   : > { %9169 = vmatprep.mubr.f32.mxu0 %v12505_v31  ;;  %v5028_v31 = vpop.permute.xlu1 %5027 }
 0x5b7   : > { %9159 = vmatprep.subr.mxu1 %v5694_v43 }
 0x5b8   : > { %9160 = vmatpush3.msra.mxu1 %v5694_v43  ;;  %v12611_v43 = vsub.f32 %v6787_v40, %v12597_v7 }
 0x5b9   : > { %9162 = vmatmul.mubr.f32.vlgmr.msra.gmra.mxu1 %v12527_v59  ;;  %9170 = vmatmul.mubr.f32.vlgmr.msra.gmra.mxu0 %v5630_v11 }
 0x5ba   : > { %9175 = vmatprep.subr.mxu1 %v5584_v54  ;;  %9184 = vmatpush3.msra.mxu0 %v5692_v4  ;;  %v6147_v19 = vpop.permute.xlu1 %6146  ;;  %v6786_v4 = vld [vmem:[%s13062_s3] sm:$0xff] }
 0x5bb   : > { %9176 = vmatpush3.msra.mxu1 %v5584_v54  ;;  %9164 = vmatprep.mubr.f32.mxu1 %v12531_v37 }
 0x5bc   : > { %9191 = vmatprep.subr.mxu1 %v5584_v54  ;;  %9172 = vmatprep.mubr.f32.mxu0 %v5640_v34 }
 0x5bd   : > { %9165 = vmatmul.mubr.f32.gmra.mxu1 %v12534_v51  ;;  %9173 = vmatmul.mubr.f32.gmra.mxu0 %v5650_v2 }
 0x5be   : > { %9177 = vmatprep.mubr.f32.mxu1 %v5621_v22  ;;  %9185 = vmatprep.mubr.f32.mxu0 %v12500_v12  ;;  %v6151_v62 = vpop.permute.xlu1 %6150 }
 0x5bf   : > { %v6158_v28 = vsel %vm5536_vm3, %v6151_v62, 0 }
 0x5c0   : > { %v6259_v13 = vand.u32 4294901760, %v6158_v28 }
 0x5c1   : > { %9178 = vmatmul.mubr.f32.vlgmr.msra.gmra.mxu1 %v5631_v23  ;;  %9186 = vmatmul.mubr.f32.vlgmr.msra.gmra.mxu0 %v12527_v59 }
 0x5c2   : > { %9192 = vmatpush3.msra.mxu1 %v5584_v54  ;;  %9180 = vmatprep.mubr.f32.mxu1 %v5641_v20  ;;  %v6260_v8 = vsub.f32 %v6158_v28, %v6259_v13  ;;  %v12584_v54 = vand.u32 4294901760, %v6789_v35  ;;  %v5526_v28 = vpop.permute.xlu1 %5525 }
 0x5c3   : > { %9188 = vmatprep.mubr.f32.mxu0 %v12531_v37 }
 0x5c4   : > { %v6261_v61 = vand.u32 4294901760, %v6260_v8  ;;  %v12595_v32 = vsub.f32 %v6789_v35, %v12584_v54 }
 0x5c5   : > { %9181 = vmatmul.mubr.f32.gmra.mxu1 %v5651_v49  ;;  %9189 = vmatmul.mubr.f32.gmra.mxu0 %v12534_v51 }
 0x5c6   : > { %v5109_v38 = vpop.f32.mrf.mxu0  ;;  %9193 = vmatprep.mubr.f32.mxu1 %v12500_v12  ;;  %9201 = vmatprep.mubr.f32.mxu0 %v6233_v21  ;;  %v6154_v12 = vsel %vm5536_vm3, %v6147_v19, 0  ;;  %v6262_v56 = vsub.f32 %v6260_v8, %v6261_v61  ;;  %v6950_v17 = vand.u32 4294901760, %v12595_v32  ;;  %v6962_v21 = vand.u32 4294901760, %v12611_v43 }
 0x5c7   : > { %v5110_v42 = vadd.f32 %v5109_v38, %v5028_v31  ;;  %v12566_v47 = vand.u32 4294901760, %v6154_v12 }
 0x5c8   : > { %v9095_v27 = vpop.f32.mrf.mxu0  ;;  %v6263_v44 = vand.u32 4294901760, %v6262_v56  ;;  %v6951_v14 = vsub.f32 %v12595_v32, %v6950_v17 }
 0x5c9   : > { %9194 = vmatmul.mubr.f32.vlgmr.msra.gmra.mxu1 %v12527_v59  ;;  %v6240_v18 = vsub.f32 %v6154_v12, %v12566_v47  ;;  %v5522_v12 = vpop.permute.xlu0 %5521 }
 0x5ca   : > { %9196 = vmatprep.mubr.f32.mxu1 %v12531_v37  ;;  %v6250_v37 = vsub.f32 %v6156_v46, %v6249_v3  ;;  %v6952_v31 = vand.u32 4294901760, %v6951_v14 }
 0x5cb   : > { %v6241_v6 = vand.u32 4294901760, %v6240_v18 }
 0x5cd   : > { %9197 = vmatmul.mubr.f32.gmra.mxu1 %v12534_v51  ;;  %v6251_v51 = vand.u32 4294901760, %v6250_v37  ;;  %v6242_v34 = vsub.f32 %v6240_v18, %v6241_v6 }
 0x5ce   : > { %v5200_v22 = vpop.f32.mrf.mxu1  ;;  %9209 = vmatprep.mubr.f32.mxu1 %v12540_v25 }
 0x5cf   : > { %v5280_v53 = vpop.f32.mrf.mxu0  ;;  %v5201_v45 = vadd.f32 %v5200_v22, %v5110_v42  ;;  %v6252_v2 = vsub.f32 %v6250_v37, %v6251_v51  ;;  %v6243_v20 = vand.u32 4294901760, %v6242_v34  ;;  %v6963_v22 = vsub.f32 %v12611_v43, %v6962_v21 }
 0x5d0   : > { %v9106_v63 = vpop.f32.mrf.mxu1 }
 0x5d1   : > { %v9117_v29 = vpop.f32.mrf.mxu0  ;;  %v5281_v1 = vadd.f32 %v5280_v53, %v5201_v45  ;;  %v6253_v5 = vand.u32 4294901760, %v6252_v2  ;;  %v6964_v19 = vand.u32 4294901760, %v6963_v22 }
 0x5d8   : > { %v5357_v26 = vpop.f32.mrf.mxu1 }
 0x5d9   : > { %v5440_v24 = vpop.f32.mrf.mxu0  ;;  %v5358_v48 = vadd.f32 %v5357_v26, %v5281_v1  ;;  %v5534_v26 = vpop.permute.xlu0 %5533 }
 0x5da   : > { %v9128_v50 = vpop.f32.mrf.mxu1 }
 0x5db   : > { %v9139_v59 = vpop.f32.mrf.mxu0  ;;  %v5441_v11 = vadd.f32 %v5440_v24, %v5358_v48 }
 0x5e1   : > { %v5515_v52 = vpop.f32.mrf.mxu1 }
 0x5e2   : > { %v5516_v9 = vadd.f32 %v5515_v52, %v5441_v11 }
 0x5e3   : > { %v9150_v0 = vpop.f32.mrf.mxu1 }
 0x5e4   : > { %v5519_v23 = vmax.f32 %v5516_v9, 0.0 }
 0x5e6   : > { %v6161_v15 = vsel %vm5549_vm4, %v5519_v23, 0 }
 0x5e7   : > { %v6194_v39 = vand.u32 4294901760, %v6161_v15 }
 0x5e9   : > { %v6301_v57 = vsub.f32 %v6161_v15, %v6194_v39  ;;  %9199 = vmatprep.subr.mxu0 %v6194_v39 }
 0x5ea   : > { %9200 = vmatpush3.msra.mxu0 %v6194_v39 }
 0x5eb   : > { %9202 = vmatmul.mubr.f32.vlgmr.msra.gmra.mxu0 %v6243_v20  ;;  %9215 = vmatprep.subr.mxu0 %v6301_v57  ;;  %v6302_v49 = vand.u32 4294901760, %v6301_v57 }
 0x5ec   : > { %9216 = vmatpush3.msra.mxu0 %v6301_v57  ;;  %9204 = vmatprep.mubr.f32.mxu0 %v6253_v5 }
 0x5ed   : > { %9231 = vmatprep.subr.mxu0 %v6302_v49  ;;  %v6303_v55 = vsub.f32 %v6301_v57, %v6302_v49 }
 0x5ef   : > { %9205 = vmatmul.mubr.f32.gmra.mxu0 %v6263_v44  ;;  %v6304_v16 = vand.u32 4294901760, %v6303_v55 }
 0x5f0   : > { %9217 = vmatprep.mubr.f32.mxu0 %v12544_v10  ;;  %v6956_v10 = vand.u32 4294901760, %v12604_v30 }
 0x5f1   : > { %9207 = vmatprep.subr.mxu1 %v6304_v16 }
 0x5f2   : > { %9208 = vmatpush3.msra.mxu1 %v6304_v16  ;;  %v6957_v38 = vsub.f32 %v12604_v30, %v6956_v10 }
 0x5f3   : > { %9210 = vmatmul.mubr.f32.vlgmr.msra.gmra.mxu1 %v12566_v47  ;;  %9218 = vmatmul.mubr.f32.vlgmr.msra.gmra.mxu0 %v6240_v18 }
 0x5f4   : > { %9223 = vmatprep.subr.mxu1 %v6194_v39  ;;  %9232 = vmatpush3.msra.mxu0 %v6302_v49  ;;  %v6958_v53 = vand.u32 4294901760, %v6957_v38 }
 0x5f5   : > { %9212 = vmatprep.mubr.f32.mxu1 %v6249_v3  ;;  %9220 = vmatprep.mubr.f32.mxu0 %v6250_v37 }
 0x5f6   : > { %9224 = vmatpush3.msra.mxu1 %v6194_v39  ;;  %6836 = vmatprep.subr.mxu0 %v12584_v54 }
 0x5f7   : > { %9239 = vmatprep.subr.mxu1 %v6194_v39  ;;  %9213 = vmatmul.mubr.f32.gmra.mxu1 %v6259_v13 }
 0x5f8   : > { %9221 = vmatmul.mubr.f32.gmra.mxu0 %v6260_v8  ;;  %9225 = vmatprep.mubr.f32.mxu1 %v6231_v41  ;;  %v5530_v8 = vpop.permute.xlu1 %5529 }
 0x5f9   : > { %9233 = vmatprep.mubr.f32.mxu0 %v12540_v25 }
 0x5fb   : > { %9226 = vmatmul.mubr.f32.vlgmr.msra.gmra.mxu1 %v6241_v6 }
 0x5fc   : > { %9234 = vmatmul.mubr.f32.vlgmr.msra.gmra.mxu0 %v12566_v47  ;;  %9240 = vmatpush3.msra.mxu1 %v6194_v39 }
 0x5fd   : > { %9228 = vmatprep.mubr.f32.mxu1 %v6251_v51  ;;  %9236 = vmatprep.mubr.f32.mxu0 %v6249_v3 }
 0x5fe   : > { %6838 = vmatpush1.msra.mxu0 %v12589_v60  ;;  %6953 = vmatprep.subr.mxu1 %v6952_v31 }
 0x5ff   : > { %9229 = vmatmul.mubr.f32.gmra.mxu1 %v6261_v61  ;;  %6840 = vmatprep.subr.mxu0 %v12597_v7 }
 0x600   : > { %9237 = vmatmul.mubr.f32.gmra.mxu0 %v6259_v13  ;;  %9241 = vmatprep.mubr.f32.mxu1 %v12540_v25  ;;  %v12606_v25 = vand.u32 4294901760, %v6786_v4 }
 0x601   : > { %6875 = vmatprep.mubr.f32.mxu0 %v9468_v58 }
 0x602   : > { %v12616_v41 = vsub.f32 %v6786_v4, %v12606_v25  ;;  %6842 = vmatpush1.msra.mxu0 %v12606_v25 }
 0x603   : > { %9242 = vmatmul.mubr.f32.vlgmr.msra.gmra.mxu1 %v12566_v47  ;;  %7063 = vmatprep.subr.mxu0 %v12595_v32 }
 0x604   : > { %9244 = vmatprep.mubr.f32.mxu1 %v6249_v3  ;;  %v6968_v27 = vand.u32 4294901760, %v12616_v41  ;;  %6959 = vmatpush1.msra.mxu1 %v6958_v53 }
 0x605   : > { %6965 = vmatprep.subr.mxu1 %v6964_v19 }
 0x606   : > { %v6969_v63 = vsub.f32 %v12616_v41, %v6968_v27 }
 0x607   : > { %9245 = vmatmul.mubr.f32.gmra.mxu1 %v6259_v13 }
 0x608   : > { %7004 = vmatprep.mubr.f32.mxu1 %v9468_v58  ;;  %v6970_v29 = vand.u32 4294901760, %v6969_v63 }
 0x60a   : > { %6971 = vmatpush1.msra.mxu1 %v6970_v29 }
 0x60b   : > { %7167 = vmatprep.subr.mxu1 %v12584_v54 }
 0x671   : > { %v9155_v33 = vpop.f32.mrf.mxu0 }
 0x672   : > { %v5636_v1 = vadd.f32 %v9155_v33, %v5526_v28 }
 0x673   : > { %v5625_v42 = vpop.f32.mrf.mxu0 }
 0x674   : > { %v5626_v59 = vadd.f32 %v5625_v42, %v5522_v12 }
 0x675   : > { %v9158_v46 = vpop.f32.mrf.mxu0 }
 0x676   : > { %v5656_v48 = vadd.f32 %v9158_v46, %v5534_v26 }
 0x677   : > { %v5645_v45 = vpop.f32.mrf.mxu0 }
 0x678   : > { %v5646_v9 = vadd.f32 %v5645_v45, %v5530_v8 }
 0x679   : > { %v9163_v47 = vpop.f32.mrf.mxu1  ;;  %v9171_v62 = vpop.f32.mrf.mxu0 }
 0x67a   : > { %v5738_v13 = vadd.f32 %v9163_v47, %v5636_v1 }
 0x67b   : > { %v5731_v3 = vpop.f32.mrf.mxu1  ;;  %v5823_v24 = vpop.f32.mrf.mxu0 }
 0x67c   : > { %v5732_v11 = vadd.f32 %v5731_v3, %v5626_v59  ;;  %v5831_v34 = vadd.f32 %v9171_v62, %v5738_v13 }
 0x67d   : > { %v9166_v50 = vpop.f32.mrf.mxu1  ;;  %v9174_v18 = vpop.f32.mrf.mxu0 }
 0x67e   : > { %v5750_v61 = vadd.f32 %v9166_v50, %v5656_v48  ;;  %v5824_v20 = vadd.f32 %v5823_v24, %v5732_v11 }
 0x67f   : > { %v5743_v37 = vpop.f32.mrf.mxu1  ;;  %v5837_v6 = vpop.f32.mrf.mxu0 }
 0x680   : > { %v5744_v2 = vadd.f32 %v5743_v37, %v5646_v9  ;;  %v5845_v5 = vadd.f32 %v9174_v18, %v5750_v61 }
 0x681   : > { %v9179_v51 = vpop.f32.mrf.mxu1  ;;  %v9187_v52 = vpop.f32.mrf.mxu0 }
 0x682   : > { %v5927_v15 = vadd.f32 %v9179_v51, %v5831_v34  ;;  %v5838_v44 = vadd.f32 %v5837_v6, %v5744_v2  ;;  %v6130_v6 = vpop.permute.xlu1 %6129 }
 0x683   : > { %v5918_v0 = vpop.f32.mrf.mxu1  ;;  %v6016_v23 = vpop.f32.mrf.mxu0 }
 0x684   : > { %v5919_v56 = vadd.f32 %v5918_v0, %v5824_v20  ;;  %v6023_v55 = vadd.f32 %v9187_v52, %v5927_v15 }
 0x685   : > { %v9182_v39 = vpop.f32.mrf.mxu1  ;;  %v9190_v49 = vpop.f32.mrf.mxu0 }
 0x686   : > { %v5943_v16 = vadd.f32 %v9182_v39, %v5845_v5  ;;  %v6017_v36 = vadd.f32 %v6016_v23, %v5919_v56  ;;  %v6138_v23 = vpop.permute.xlu1 %6137  ;;  %v6134_v39 = vpop.permute.xlu0 %6133 }
 0x687   : > { %v5934_v57 = vpop.f32.mrf.mxu1  ;;  %v6028_v14 = vpop.f32.mrf.mxu0 }
 0x688   : > { %v5935_v40 = vadd.f32 %v5934_v57, %v5838_v44  ;;  %v6035_v31 = vadd.f32 %v9190_v49, %v5943_v16 }
 0x689   : > { %v9195_v35 = vpop.f32.mrf.mxu1 }
 0x68a   : > { %v6113_v4 = vadd.f32 %v9195_v35, %v6023_v55  ;;  %v6029_v19 = vadd.f32 %v6028_v14, %v5935_v40  ;;  %v6793_v55 = vld [vmem:[%s13062_s3 + $0x38] sm:$0xff] }
 0x68b   : > { %v6106_v38 = vpop.f32.mrf.mxu1 }
 0x68c   : > { %v6739_v22 = vsub.f32 0.0, %v6113_v4  ;;  %v6107_v53 = vadd.f32 %v6106_v38, %v6017_v36 }
 0x68d   : > { %v9198_v63 = vpop.f32.mrf.mxu1 }
 0x68e   : > { %v6744_v29 = vmul.f32 1.442695, %v6739_v22  ;;  %v6738_v33 = vsub.f32 0.0, %v6107_v53  ;;  %v6125_v42 = vadd.f32 %v9198_v63, %v6035_v31  ;;  %v12663_v22 = vand.u32 4294901760, %v6793_v55  ;;  %v6142_v53 = vpop.permute.xlu1 %6141 }
 0x68f   : > { %v6118_v12 = vpop.f32.mrf.mxu1 }
 0x690   : > { %9316 = vpow2.f32 %v6744_v29  ;;  %v6742_v46 = vmul.f32 1.442695, %v6738_v33  ;;  %v6741_v45 = vsub.f32 0.0, %v6125_v42  ;;  %v6119_v47 = vadd.f32 %v6118_v12, %v6029_v19 }
 0x692   : > { %9318 = vpow2.f32 %v6742_v46  ;;  %v6748_v62 = vmul.f32 1.442695, %v6741_v45  ;;  %v6740_v28 = vsub.f32 0.0, %v6119_v47 }
 0x694   : > { %9320 = vpow2.f32 %v6748_v62  ;;  %v6746_v26 = vmul.f32 1.442695, %v6740_v28 }
 0x696   : > { %9322 = vpow2.f32 %v6746_v26 }
 0x69d   : > { %v9317_v3 = vpop.eup %9316 }
 0x69e   : > { %v6751_v24 = vadd.f32 1.0, %v9317_v3 }
 0x69f   : > { %v9319_v1 = vpop.eup %9318 }
 0x6a0   : > { %9324 = vrcp.f32 %v6751_v24  ;;  %v6750_v50 = vadd.f32 1.0, %v9319_v1 }
 0x6a1   : > { %v9321_v18 = vpop.eup %9320 }
 0x6a2   : > { %9326 = vrcp.f32 %v6750_v50  ;;  %v6753_v13 = vadd.f32 1.0, %v9321_v18 }
 0x6a3   : > { %v9323_v59 = vpop.eup %9322 }
 0x6a4   : > { %9328 = vrcp.f32 %v6753_v13  ;;  %v6752_v48 = vadd.f32 1.0, %v9323_v59 }
 0x6a6   : > { %9330 = vrcp.f32 %v6752_v48 }
 0x6ab   : > { %v9203_v37 = vpop.f32.mrf.mxu0 }
 0x6ac   : > { %v6246_v31 = vadd.f32 %v9203_v37, %v6134_v39 }
 0x6ad   : > { %v9325_v8 = vpop.eup %9324  ;;  %v6235_v11 = vpop.f32.mrf.mxu0 }
 0x6ae   : > { %v6799_v51 = vsel %vm6794_vm5, %v9325_v8, 0  ;;  %v6236_v33 = vadd.f32 %v6235_v11, %v6130_v6 }
 0x6af   : > { %v9327_v52 = vpop.eup %9326  ;;  %v9206_v9 = vpop.f32.mrf.mxu0  ;;  %v12636_v34 = vand.u32 4294901760, %v6799_v51 }
 0x6b0   : > { %v6796_v61 = vsel %vm6794_vm5, %v9327_v52, 0  ;;  %v6266_v26 = vadd.f32 %v9206_v9, %v6142_v53 }
 0x6b1   : > { %v9329_v0 = vpop.eup %9328  ;;  %v6255_v2 = vpop.f32.mrf.mxu0  ;;  %v12639_v15 = vand.u32 4294901760, %v6796_v61  ;;  %v12642_v20 = vsub.f32 %v6799_v51, %v12636_v34 }
 0x6b2   : > { %v6805_v56 = vsel %vm6794_vm5, %v9329_v0, 0  ;;  %v6256_v50 = vadd.f32 %v6255_v2, %v6138_v23  ;;  %v6791_v0 = vld [vmem:[%s13062_s3 + $0x28] sm:$0xff] }
 0x6b3   : > { %v9331_v5 = vpop.eup %9330  ;;  %v9211_v57 = vpop.f32.mrf.mxu1  ;;  %v12646_v44 = vsub.f32 %v6796_v61, %v12639_v15  ;;  %7006 = vmatmul.mubr.f32.vlgmr.msra.gmra.mxu1 %v12639_v15  ;;  %v6889_v14 = vand.u32 4294901760, %v12642_v20  ;;  %v12659_v38 = vand.u32 4294901760, %v6805_v56  ;;  %v6792_v61 = vld [vmem:[%s13062_s3 + $0x30] sm:$0xff] }
 0x6b4   : > { %v9219_v49 = vpop.f32.mrf.mxu0  ;;  %7011 = vmatprep.mubr.f32.mxu1 %v9468_v58  ;;  %v6802_v16 = vsel %vm6794_vm5, %v9331_v5, 0  ;;  %7169 = vmatpush1.msra.mxu1 %v12589_v60  ;;  %v6348_v42 = vadd.f32 %v9211_v57, %v6246_v31 }
 0x6b5   : > { %v6341_v35 = vpop.f32.mrf.mxu1  ;;  %v6878_v40 = vand.u32 4294901760, %v12646_v44  ;;  %v12656_v4 = vand.u32 4294901760, %v6802_v16  ;;  %7171 = vmatprep.subr.mxu1 %v12597_v7  ;;  %v6890_v47 = vsub.f32 %v12642_v20, %v6889_v14  ;;  %v12678_v62 = vsub.f32 %v6805_v56, %v12659_v38 }
 0x6b6   : > { %v6433_v36 = vpop.f32.mrf.mxu0  ;;  %7173 = vmatpush1.msra.mxu1 %v12606_v25  ;;  %v6342_v3 = vadd.f32 %v6341_v35, %v6236_v33  ;;  %v6441_v18 = vadd.f32 %v9219_v49, %v6348_v42 }
 0x6b7   : > { %v9214_v63 = vpop.f32.mrf.mxu1  ;;  %7013 = vmatmul.mubr.f32.gmra.mxu1 %v12636_v34  ;;  %v6879_v19 = vsub.f32 %v12646_v44, %v6878_v40  ;;  %v12670_v29 = vsub.f32 %v6802_v16, %v12656_v4  ;;  %7377 = vmatprep.subr.mxu1 %v12584_v54  ;;  %v12682_v54 = vsub.f32 %v6793_v55, %v12663_v22  ;;  %v6891_v37 = vand.u32 4294901760, %v6890_v47 }
 0x6b8   : > { %v9222_v12 = vpop.f32.mrf.mxu0  ;;  %7018 = vmatprep.mubr.f32.mxu1 %v9468_v58  ;;  %v6360_v13 = vadd.f32 %v9214_v63, %v6266_v26  ;;  %v6911_v8 = vand.u32 4294901760, %v12678_v62  ;;  %v6434_v11 = vadd.f32 %v6433_v36, %v6342_v3  ;;  %v12707_v55 = vand.u32 4294901760, %v6792_v61  ;;  %v6790_v63 = vld [vmem:[%s13062_s3 + $0x20] sm:$0xff] }
 0x6b9   : > { %v6353_v46 = vpop.f32.mrf.mxu1  ;;  %v6880_v45 = vand.u32 4294901760, %v6879_v19  ;;  %v6900_v28 = vand.u32 4294901760, %v12670_v29  ;;  %v7600_v9 = vand.u32 4294901760, %v12682_v54  ;;  %v12709_v16 = vand.u32 4294901760, %v6791_v0 }
 0x6ba   : > { %v6447_v24 = vpop.f32.mrf.mxu0  ;;  %v6354_v51 = vadd.f32 %v6353_v46, %v6256_v50  ;;  %v6455_v39 = vadd.f32 %v9222_v12, %v6360_v13  ;;  %v6912_v49 = vsub.f32 %v12678_v62, %v6911_v8  ;;  %v12730_v26 = vand.u32 4294901760, %v6790_v63 }
 0x6bb   : > { %v9227_v1 = vpop.f32.mrf.mxu1  ;;  %6881 = vmatmul.mubr.f32.vlgmr.msra.gmra.mxu0 %v6880_v45  ;;  %7020 = vmatmul.mubr.f32.gmra.mxu1 %v12656_v4  ;;  %v6901_v6 = vsub.f32 %v12670_v29, %v6900_v28  ;;  %v7601_v53 = vsub.f32 %v12682_v54, %v7600_v9  ;;  %v12725_v45 = vsub.f32 %v6792_v61, %v12707_v55 }
 0x6bc   : > { %v9235_v59 = vpop.f32.mrf.mxu0  ;;  %6886 = vmatprep.mubr.f32.mxu0 %v9468_v58  ;;  %7025 = vmatprep.mubr.f32.mxu1 %v9468_v58  ;;  %v6537_v52 = vadd.f32 %v9227_v1, %v6441_v18  ;;  %v6448_v35 = vadd.f32 %v6447_v24, %v6354_v51  ;;  %v12728_v47 = vsub.f32 %v6791_v0, %v12709_v16 }
 0x6bd   : > { %v6528_v48 = vpop.f32.mrf.mxu1  ;;  %7066 = vmatpush1.msra.mxu0 %v12604_v30  ;;  %v6902_v57 = vand.u32 4294901760, %v6901_v6  ;;  %v7602_v1 = vand.u32 4294901760, %v7601_v53 }
 0x6be   : > { %7069 = vmatprep.subr.mxu0 %v12611_v43  ;;  %v6626_v23 = vpop.f32.mrf.mxu0  ;;  %v6529_v56 = vadd.f32 %v6528_v48, %v6434_v11  ;;  %v6633_v36 = vadd.f32 %v9235_v59, %v6537_v52  ;;  %v7612_v6 = vand.u32 4294901760, %v12728_v47  ;;  %v12741_v11 = vsub.f32 %v6790_v63, %v12730_v26 }
 0x6bf   : > { %v9230_v2 = vpop.f32.mrf.mxu1  ;;  %6892 = vmatmul.mubr.f32.gmra.mxu0 %v6891_v37  ;;  %7027 = vmatmul.mubr.f32.gmra.mxu1 %v12659_v38 }
 0x6c0   : > { %6897 = vmatprep.mubr.f32.mxu0 %v9468_v58  ;;  %7206 = vmatprep.mubr.f32.mxu1 %v9468_v58  ;;  %v6553_v31 = vadd.f32 %v9230_v2, %v6455_v39  ;;  %v9238_v19 = vpop.f32.mrf.mxu0  ;;  %v6627_v42 = vadd.f32 %v6626_v23, %v6529_v56  ;;  %v7618_v23 = vand.u32 4294901760, %v12741_v11 }
 0x6c1   : > { %v6544_v5 = vpop.f32.mrf.mxu1  ;;  %7072 = vmatpush1.msra.mxu0 %v12616_v41 }
 0x6c2   : > { %7274 = vmatprep.subr.mxu0 %v6950_v17  ;;  %v6545_v12 = vadd.f32 %v6544_v5, %v6448_v35  ;;  %v6913_v17 = vand.u32 4294901760, %v6912_v49  ;;  %v6638_v50 = vpop.f32.mrf.mxu0  ;;  %v7619_v43 = vsub.f32 %v12741_v11, %v7618_v23 }
 0x6c3   : > { %v9243_v33 = vpop.f32.mrf.mxu1  ;;  %6903 = vmatmul.mubr.f32.gmra.mxu0 %v6902_v57  ;;  %7210 = vmatmul.mubr.f32.vlgmr.msra.gmra.mxu1 %v6878_v40  ;;  %v6645_v40 = vadd.f32 %v9238_v19, %v6553_v31 }
 0x6c4   : > { %v6723_v46 = vadd.f32 %v9243_v33, %v6633_v36  ;;  %6908 = vmatprep.mubr.f32.mxu0 %v9468_v58  ;;  %7215 = vmatprep.mubr.f32.mxu1 %v9468_v58 }
 0x6c5   : > { %v6716_v32 = vpop.f32.mrf.mxu1  ;;  %7379 = vmatpush1.msra.mxu1 %v12589_v60  ;;  %v6639_v60 = vadd.f32 %v6638_v50, %v6545_v12 }
 0x6c6   : > { %v6763_v3 = vsub.f32 0.0, %v6723_v46  ;;  %v6717_v24 = vadd.f32 %v6716_v32, %v6627_v42  ;;  %7381 = vmatprep.subr.mxu1 %v12597_v7  ;;  %v7606_v7 = vand.u32 4294901760, %v12725_v45 }
 0x6c7   : > { %v9246_v18 = vpop.f32.mrf.mxu1  ;;  %6914 = vmatmul.mubr.f32.gmra.mxu0 %v6913_v17  ;;  %7219 = vmatmul.mubr.f32.gmra.mxu1 %v6889_v14 }
 0x6c8   : > { %v6768_v13 = vmul.f32 1.442695, %v6763_v3  ;;  %v6762_v59 = vsub.f32 0.0, %v6717_v24  ;;  %v6735_v48 = vadd.f32 %v9246_v18, %v6645_v40  ;;  %7105 = vmatprep.mubr.f32.mxu0 %v9468_v58  ;;  %7224 = vmatprep.mubr.f32.mxu1 %v9468_v58  ;;  %v7607_v0 = vsub.f32 %v12725_v45, %v7606_v7 }
 0x6c9   : > { %v6728_v37 = vpop.f32.mrf.mxu1  ;;  %7383 = vmatpush1.msra.mxu1 %v12606_v25 }
 0x6ca   : > { %9332 = vpow2.f32 %v6768_v13  ;;  %v6766_v14 = vmul.f32 1.442695, %v6762_v59  ;;  %v6765_v51 = vsub.f32 0.0, %v6735_v48  ;;  %v6729_v52 = vadd.f32 %v6728_v37, %v6639_v60  ;;  %7603 = vmatprep.subr.mxu1 %v7602_v1 }
 0x6cb   : > { %7108 = vmatmul.mubr.f32.vlgmr.msra.gmra.mxu0 %v12646_v44  ;;  %7228 = vmatmul.mubr.f32.gmra.mxu1 %v6900_v28  ;;  %v7613_v28 = vsub.f32 %v12728_v47, %v7612_v6  ;;  %v7608_v30 = vand.u32 4294901760, %v7607_v0 }
 0x6cc   : > { %9334 = vpow2.f32 %v6766_v14  ;;  %v6772_v61 = vmul.f32 1.442695, %v6765_v51  ;;  %v6764_v25 = vsub.f32 0.0, %v6729_v52  ;;  %7113 = vmatprep.mubr.f32.mxu0 %v9468_v58  ;;  %7233 = vmatprep.mubr.f32.mxu1 %v9468_v58 }
 0x6cd   : > { %7278 = vmatpush1.msra.mxu0 %v6956_v10  ;;  %v7614_v10 = vand.u32 4294901760, %v7613_v28 }
 0x6ce   : > { %9336 = vpow2.f32 %v6772_v61  ;;  %v6770_v44 = vmul.f32 1.442695, %v6764_v25  ;;  %7282 = vmatprep.subr.mxu0 %v6962_v21  ;;  %v7620_v21 = vand.u32 4294901760, %v7619_v43 }
 0x6cf   : > { %7116 = vmatmul.mubr.f32.gmra.mxu0 %v12642_v20  ;;  %7237 = vmatmul.mubr.f32.gmra.mxu1 %v6911_v8 }
 0x6d0   : > { %9338 = vpow2.f32 %v6770_v44  ;;  %7121 = vmatprep.mubr.f32.mxu0 %v9468_v58  ;;  %7416 = vmatprep.mubr.f32.mxu1 %v9468_v58 }
 0x6d1   : > { %7286 = vmatpush1.msra.mxu0 %v6968_v27 }
 0x6d2   : > { %7486 = vmatprep.subr.mxu0 %v12663_v22 }
 0x6d3   : > { %7124 = vmatmul.mubr.f32.gmra.mxu0 %v12670_v29  ;;  %7418 = vmatmul.mubr.f32.vlgmr.msra.gmra.mxu1 %v12639_v15 }
 0x6d4   : > { %7129 = vmatprep.mubr.f32.mxu0 %v9468_v58  ;;  %7423 = vmatprep.mubr.f32.mxu1 %v9468_v58 }
 0x6d5   : > { %7609 = vmatpush1.msra.mxu1 %v7608_v30 }
 0x6d6   : > { %7615 = vmatprep.subr.mxu1 %v7614_v10 }
 0x6d7   : > { %v9333_v41 = vpop.eup %9332  ;;  %7132 = vmatmul.mubr.f32.gmra.mxu0 %v12678_v62  ;;  %7425 = vmatmul.mubr.f32.gmra.mxu1 %v12636_v34 }
 0x6d8   : > { %v6775_v27 = vadd.f32 1.0, %v9333_v41  ;;  %7319 = vmatprep.mubr.f32.mxu0 %v9468_v58  ;;  %7430 = vmatprep.mubr.f32.mxu1 %v9468_v58 }
 0x6d9   : > { %v9335_v20 = vpop.eup %9334  ;;  %7621 = vmatpush1.msra.mxu1 %v7620_v21 }
 0x6da   : > { %9340 = vrcp.f32 %v6775_v27  ;;  %v6774_v29 = vadd.f32 1.0, %v9335_v20  ;;  %7817 = vmatprep.subr.mxu1 %v12663_v22 }
 0x6db   : > { %v9337_v8 = vpop.eup %9336  ;;  %7321 = vmatmul.mubr.f32.vlgmr.msra.gmra.mxu0 %v12639_v15  ;;  %7432 = vmatmul.mubr.f32.gmra.mxu1 %v12656_v4 }
 0x6dc   : > { %9342 = vrcp.f32 %v6774_v29  ;;  %v6777_v62 = vadd.f32 1.0, %v9337_v8  ;;  %7326 = vmatprep.mubr.f32.mxu0 %v9468_v58  ;;  %7437 = vmatprep.mubr.f32.mxu1 %v9468_v58 }
 0x6dd   : > { %v9339_v2 = vpop.eup %9338  ;;  %7488 = vmatpush1.msra.mxu0 %v12707_v55 }
 0x6de   : > { %9344 = vrcp.f32 %v6777_v62  ;;  %v6776_v39 = vadd.f32 1.0, %v9339_v2  ;;  %7490 = vmatprep.subr.mxu0 %v12709_v16 }
 0x6df   : > { %7328 = vmatmul.mubr.f32.gmra.mxu0 %v12636_v34  ;;  %7439 = vmatmul.mubr.f32.gmra.mxu1 %v12659_v38 }
 0x6e0   : > { %9346 = vrcp.f32 %v6776_v39  ;;  %7333 = vmatprep.mubr.f32.mxu0 %v9468_v58  ;;  %7654 = vmatprep.mubr.f32.mxu1 %v9468_v58 }
 0x6e1   : > { %7492 = vmatpush1.msra.mxu0 %v12730_v26 }
 0x6e2   : > { %7713 = vmatprep.subr.mxu0 %v12682_v54 }
 0x6e3   : > { %7335 = vmatmul.mubr.f32.gmra.mxu0 %v12656_v4 }
 0x6e4   : > { %7340 = vmatprep.mubr.f32.mxu0 %v9468_v58 }
 0x6e7   : > { %v9341_v15 = vpop.eup %9340  ;;  %7342 = vmatmul.mubr.f32.gmra.mxu0 %v12659_v38 }
 0x6e8   : > { %v7449_v34 = vsel %vm6794_vm5, %v9341_v15, 0  ;;  %7525 = vmatprep.mubr.f32.mxu0 %v9468_v58 }
 0x6e9   : > { %v9343_v56 = vpop.eup %9342  ;;  %v12796_v5 = vand.u32 4294901760, %v7449_v34 }
 0x6ea   : > { %v7446_v57 = vsel %vm6794_vm5, %v9343_v56, 0 }
 0x6eb   : > { %v9345_v49 = vpop.eup %9344  ;;  %v12799_v35 = vand.u32 4294901760, %v7446_v57  ;;  %v7538_v36 = vsub.f32 %v7449_v34, %v12796_v5 }
 0x6ec   : > { %v7455_v4 = vsel %vm6794_vm5, %v9345_v49, 0 }
 0x6ed   : > { %v9347_v31 = vpop.eup %9346  ;;  %v7527_v53 = vsub.f32 %v7446_v57, %v12799_v35  ;;  %7656 = vmatmul.mubr.f32.vlgmr.msra.gmra.mxu1 %v12799_v35  ;;  %v7539_v33 = vand.u32 4294901760, %v7538_v36  ;;  %v12810_v42 = vand.u32 4294901760, %v7455_v4 }
 0x6ee   : > { %7661 = vmatprep.mubr.f32.mxu1 %v9468_v58  ;;  %v7452_v38 = vsel %vm6794_vm5, %v9347_v31, 0  ;;  %7819 = vmatpush1.msra.mxu1 %v12707_v55 }
 0x6ef   : > { %v7528_v63 = vand.u32 4294901760, %v7527_v53  ;;  %v12808_v19 = vand.u32 4294901760, %v7452_v38  ;;  %7821 = vmatprep.subr.mxu1 %v12709_v16  ;;  %v7540_v17 = vsub.f32 %v7538_v36, %v7539_v33  ;;  %v7560_v40 = vsub.f32 %v7455_v4, %v12810_v42 }
 0x6f0   : > { %7823 = vmatpush1.msra.mxu1 %v12730_v26 }
 0x6f1   : > { %7663 = vmatmul.mubr.f32.gmra.mxu1 %v12796_v5  ;;  %v7529_v12 = vsub.f32 %v7527_v53, %v7528_v63  ;;  %v7549_v46 = vsub.f32 %v7452_v38, %v12808_v19  ;;  %8027 = vmatprep.subr.mxu1 %v12663_v22  ;;  %v7541_v24 = vand.u32 4294901760, %v7540_v17  ;;  %v7561_v50 = vand.u32 4294901760, %v7560_v40 }
 0x6f2   : > { %7668 = vmatprep.mubr.f32.mxu1 %v9468_v58 }
 0x6f3   : > { %v7530_v32 = vand.u32 4294901760, %v7529_v12  ;;  %v7550_v3 = vand.u32 4294901760, %v7549_v46  ;;  %v7562_v18 = vsub.f32 %v7560_v40, %v7561_v50 }
 0x6f5   : > { %7531 = vmatmul.mubr.f32.vlgmr.msra.gmra.mxu0 %v7530_v32  ;;  %7670 = vmatmul.mubr.f32.gmra.mxu1 %v12808_v19  ;;  %v7551_v1 = vsub.f32 %v7549_v46, %v7550_v3  ;;  %v7563_v60 = vand.u32 4294901760, %v7562_v18 }
 0x6f6   : > { %7536 = vmatprep.mubr.f32.mxu0 %v9468_v58  ;;  %7675 = vmatprep.mubr.f32.mxu1 %v9468_v58 }
 0x6f7   : > { %7716 = vmatpush1.msra.mxu0 %v12725_v45  ;;  %v7552_v22 = vand.u32 4294901760, %v7551_v1 }
 0x6f8   : > { %7719 = vmatprep.subr.mxu0 %v12728_v47 }
 0x6f9   : > { %7542 = vmatmul.mubr.f32.gmra.mxu0 %v7541_v24  ;;  %7677 = vmatmul.mubr.f32.gmra.mxu1 %v12810_v42 }
 0x6fa   : > { %7547 = vmatprep.mubr.f32.mxu0 %v9468_v58  ;;  %7856 = vmatprep.mubr.f32.mxu1 %v9468_v58 }
 0x6fb   : > { %7722 = vmatpush1.msra.mxu0 %v12741_v11 }
 0x6fc   : > { %7924 = vmatprep.subr.mxu0 %v7600_v9 }
 0x6fd   : > { %7553 = vmatmul.mubr.f32.gmra.mxu0 %v7552_v22  ;;  %7860 = vmatmul.mubr.f32.vlgmr.msra.gmra.mxu1 %v7528_v63 }
 0x6fe   : > { %7558 = vmatprep.mubr.f32.mxu0 %v9468_v58  ;;  %7865 = vmatprep.mubr.f32.mxu1 %v9468_v58 }
 0x6ff   : > { %8029 = vmatpush1.msra.mxu1 %v12707_v55 }
 0x700   : > { %8031 = vmatprep.subr.mxu1 %v12709_v16 }
 0x701   : > { %7564 = vmatmul.mubr.f32.gmra.mxu0 %v7563_v60  ;;  %7869 = vmatmul.mubr.f32.gmra.mxu1 %v7539_v33 }
 0x702   : > { %7755 = vmatprep.mubr.f32.mxu0 %v9468_v58  ;;  %7874 = vmatprep.mubr.f32.mxu1 %v9468_v58 }
 0x703   : > { %8033 = vmatpush1.msra.mxu1 %v12730_v26 }
 0x705   : > { %7758 = vmatmul.mubr.f32.vlgmr.msra.gmra.mxu0 %v7527_v53  ;;  %7878 = vmatmul.mubr.f32.gmra.mxu1 %v7550_v3 }
 0x706   : > { %7763 = vmatprep.mubr.f32.mxu0 %v9468_v58  ;;  %7883 = vmatprep.mubr.f32.mxu1 %v9468_v58 }
 0x707   : > { %7928 = vmatpush1.msra.mxu0 %v7606_v7 }
 0x708   : > { %7932 = vmatprep.subr.mxu0 %v7612_v6 }
 0x709   : > { %7766 = vmatmul.mubr.f32.gmra.mxu0 %v7538_v36  ;;  %7887 = vmatmul.mubr.f32.gmra.mxu1 %v7561_v50 }
 0x70a   : > { %7771 = vmatprep.mubr.f32.mxu0 %v9468_v58  ;;  %8066 = vmatprep.mubr.f32.mxu1 %v9468_v58 }
 0x70b   : > { %7936 = vmatpush1.msra.mxu0 %v7618_v23 }
 0x70d   : > { %7774 = vmatmul.mubr.f32.gmra.mxu0 %v7549_v46  ;;  %8068 = vmatmul.mubr.f32.vlgmr.msra.gmra.mxu1 %v12799_v35 }
 0x70e   : > { %7779 = vmatprep.mubr.f32.mxu0 %v9468_v58  ;;  %8073 = vmatprep.mubr.f32.mxu1 %v9468_v58 }
 0x711   : > { %7782 = vmatmul.mubr.f32.gmra.mxu0 %v7560_v40  ;;  %8075 = vmatmul.mubr.f32.gmra.mxu1 %v12796_v5 }
 0x712   : > { %7969 = vmatprep.mubr.f32.mxu0 %v9468_v58  ;;  %8080 = vmatprep.mubr.f32.mxu1 %v9468_v58 }
 0x715   : > { %7971 = vmatmul.mubr.f32.vlgmr.msra.gmra.mxu0 %v12799_v35  ;;  %8082 = vmatmul.mubr.f32.gmra.mxu1 %v12808_v19 }
 0x716   : > { %7976 = vmatprep.mubr.f32.mxu0 %v9468_v58  ;;  %8087 = vmatprep.mubr.f32.mxu1 %v9468_v58 }
 0x719   : > { %7978 = vmatmul.mubr.f32.gmra.mxu0 %v12796_v5  ;;  %8089 = vmatmul.mubr.f32.gmra.mxu1 %v12810_v42 }
 0x71a   : > { %7983 = vmatprep.mubr.f32.mxu0 %v9468_v58 }
 0x71d   : > { %7985 = vmatmul.mubr.f32.gmra.mxu0 %v12808_v19 }
 0x71e   : > { %7990 = vmatprep.mubr.f32.mxu0 %v9468_v58 }
 0x721   : > { %7992 = vmatmul.mubr.f32.gmra.mxu0 %v12810_v42 }
 0x773   : > { %v7007_v54 = vpop.f32.mrf.mxu1 }
 0x775   : > { %v7009_v9 = vpop.f32.mrf.mxu1 }
 0x777   : > { %v7014_v55 = vpop.f32.mrf.mxu1 }
 0x779   : > { %v7016_v16 = vpop.f32.mrf.mxu1 }
 0x77b   : > { %v6882_v45 = vpop.f32.mrf.mxu0  ;;  %v7021_v47 = vpop.f32.mrf.mxu1 }
 0x77c   : > { %v12863_v26 = vadd.f32 %v7007_v54, %v6882_v45 }
 0x77d   : > { %v6884_v13 = vpop.f32.mrf.mxu0  ;;  %v7023_v59 = vpop.f32.mrf.mxu1 }
 0x77e   : > { %v12865_v48 = vadd.f32 %v7009_v9, %v6884_v13 }
 0x77f   : > { %v6893_v37 = vpop.f32.mrf.mxu0  ;;  %v7028_v7 = vpop.f32.mrf.mxu1 }
 0x780   : > { %v12867_v6 = vadd.f32 %v7014_v55, %v6893_v37 }
 0x781   : > { %v6895_v11 = vpop.f32.mrf.mxu0  ;;  %v7030_v58 = vpop.f32.mrf.mxu1 }
 0x782   : > { %v12869_v14 = vadd.f32 %v7016_v16, %v6895_v11 }
 0x783   : > { %v6904_v51 = vpop.f32.mrf.mxu0  ;;  %v12871_v52 = vpop.f32.mrf.mxu1 }
 0x784   : > { %v12873_v61 = vadd.f32 %v7021_v47, %v6904_v51 }
 0x785   : > { %v6906_v25 = vpop.f32.mrf.mxu0  ;;  %v12875_v0 = vpop.f32.mrf.mxu1 }
 0x786   : > { %v12877_v23 = vadd.f32 %v7023_v59, %v6906_v25 }
 0x787   : > { %v6915_v44 = vpop.f32.mrf.mxu0  ;;  %v12879_v28 = vpop.f32.mrf.mxu1 }
 0x788   : > { %v12881_v30 = vadd.f32 %v7028_v7, %v6915_v44 }
 0x789   : > { %v6917_v43 = vpop.f32.mrf.mxu0  ;;  %v12883_v10 = vpop.f32.mrf.mxu1 }
 0x78a   : > { %v12885_v21 = vadd.f32 %v7030_v58, %v6917_v43 }
 0x78b   : > { %v7109_v41 = vpop.f32.mrf.mxu0  ;;  %v12887_v27 = vpop.f32.mrf.mxu1 }
 0x78d   : > { %v7111_v20 = vpop.f32.mrf.mxu0  ;;  %v12889_v29 = vpop.f32.mrf.mxu1 }
 0x78f   : > { %v7117_v8 = vpop.f32.mrf.mxu0  ;;  %v12891_v62 = vpop.f32.mrf.mxu1 }
 0x791   : > { %v7119_v2 = vpop.f32.mrf.mxu0  ;;  %v12893_v39 = vpop.f32.mrf.mxu1 }
 0x792   : > { %14000 = vst [vmem:[#allocation23_spill] sm:$0xff] %v12893_v39  ;;  %v7110_v39 = vadd.f32 %v7109_v41, %v12863_v26 }
 0x793   : > { %v7125_v15 = vpop.f32.mrf.mxu0  ;;  %v12895_v34 = vpop.f32.mrf.mxu1 }
 0x795   : > { %v7127_v56 = vpop.f32.mrf.mxu0  ;;  %v12897_v5 = vpop.f32.mrf.mxu1 }
 0x797   : > { %v12899_v57 = vpop.f32.mrf.mxu0  ;;  %v12901_v49 = vpop.f32.mrf.mxu1 }
 0x799   : > { %v12903_v35 = vpop.f32.mrf.mxu0  ;;  %v12905_v36 = vpop.f32.mrf.mxu1 }
 0x79a   : > { %14001 = vst [vmem:[#allocation31_spill] sm:$0xff] %v12905_v36 }
 0x79b   : > { %v7322_v4 = vpop.f32.mrf.mxu0  ;;  %v12907_v31 = vpop.f32.mrf.mxu1 }
 0x79c   : > { %14002 = vst [vmem:[#allocation24_spill] sm:$0xff] %v12907_v31 }
 0x79d   : > { %v7324_v53 = vpop.f32.mrf.mxu0  ;;  %v12911_v63 = vpop.f32.mrf.mxu1 }
 0x79e   : > { %14003 = vst [vmem:[#allocation27_spill] sm:$0xff] %v12911_v63 }
 0x79f   : > { %v12909_v38 = vpop.f32.mrf.mxu0  ;;  %v12915_v33 = vpop.f32.mrf.mxu1 }
 0x7a0   : > { %14004 = vst [vmem:[#allocation12_spill] sm:$0xff] %v12915_v33 }
 0x7a1   : > { %v12913_v19 = vpop.f32.mrf.mxu0  ;;  %v12919_v12 = vpop.f32.mrf.mxu1 }
 0x7a2   : > { %14006 = vst [vmem:[#allocation34_spill] sm:$0xff] %v12919_v12 }
 0x7a3   : > { %v12917_v42 = vpop.f32.mrf.mxu0 }
 0x7a4   : > { %14005 = vst [vmem:[#allocation38_spill] sm:$0xff] %v12917_v42 }
 0x7a5   : > { %v12921_v46 = vpop.f32.mrf.mxu0 }
 0x7a6   : > { %14007 = vst [vmem:[#allocation101_spill] sm:$0xff] %v12921_v46  ;;  %v7112_v46 = vadd.f32 %v7111_v20, %v12865_v48 }
 0x7a7   : > { %v12923_v17 = vpop.f32.mrf.mxu0 }
 0x7a8   : > { %14008 = vst [vmem:[#allocation107_spill] sm:$0xff] %v12923_v17 }
 0x7a9   : > { %v12925_v24 = vpop.f32.mrf.mxu0 }
 0x7aa   : > { %14009 = vst [vmem:[#allocation113_spill] sm:$0xff] %v12925_v24 }
 0x7ad   : > { %v7657_v32 = vpop.f32.mrf.mxu1 }
 0x7af   : > { %v7659_v40 = vpop.f32.mrf.mxu1 }
 0x7b1   : > { %v7664_v3 = vpop.f32.mrf.mxu1 }
 0x7b3   : > { %v7666_v1 = vpop.f32.mrf.mxu1 }
 0x7b5   : > { %v7532_v50 = vpop.f32.mrf.mxu0  ;;  %v7671_v22 = vpop.f32.mrf.mxu1 }
 0x7b6   : > { %v7658_v36 = vadd.f32 %v7657_v32, %v7532_v50 }
 0x7b7   : > { %v7534_v18 = vpop.f32.mrf.mxu0  ;;  %v7673_v60 = vpop.f32.mrf.mxu1 }
 0x7b9   : > { %v7543_v54 = vpop.f32.mrf.mxu0  ;;  %v12927_v9 = vpop.f32.mrf.mxu1 }
 0x7ba   : > { %14010 = vst [vmem:[#allocation62_spill] sm:$0xff] %v12927_v9  ;;  %v7128_v9 = vadd.f32 %v7127_v56, %v12877_v23  ;;  %v7665_v48 = vadd.f32 %v7664_v3, %v7543_v54 }
 0x7bb   : > { %v7545_v55 = vpop.f32.mrf.mxu0  ;;  %v12929_v16 = vpop.f32.mrf.mxu1 }
 0x7bc   : > { %14011 = vst [vmem:[#allocation114_spill] sm:$0xff] %v12929_v16  ;;  %v7118_v16 = vadd.f32 %v7117_v8, %v12867_v6  ;;  %v7134_v6 = vadd.f32 %v12899_v57, %v12881_v30  ;;  %v7667_v23 = vadd.f32 %v7666_v1, %v7545_v55 }
 0x7bd   : > { %v7554_v45 = vpop.f32.mrf.mxu0  ;;  %v7861_v47 = vpop.f32.mrf.mxu1 }
 0x7be   : > { %v7221_v8 = vadd.f32 %v12879_v28, %v7118_v16  ;;  %v7136_v28 = vadd.f32 %v12903_v35, %v12885_v21 }
 0x7bf   : > { %v7556_v13 = vpop.f32.mrf.mxu0  ;;  %v7863_v59 = vpop.f32.mrf.mxu1 }
 0x7c1   : > { %v12931_v37 = vpop.f32.mrf.mxu0  ;;  %v7870_v7 = vpop.f32.mrf.mxu1  ;;  %v14020_v1 = vld [vmem:[#allocation62_spill] sm:$0xff] }
 0x7c2   : > { %14012 = vst [vmem:[#allocation64_spill] sm:$0xff] %v12931_v37  ;;  %v7214_v37 = vadd.f32 %v12875_v0, %v7112_v46  ;;  %v7672_v46 = vadd.f32 %v7671_v22, %v7554_v45 }
 0x7c3   : > { %v12933_v11 = vpop.f32.mrf.mxu0  ;;  %v12935_v58 = vpop.f32.mrf.mxu1  ;;  %v14024_v16 = vld [vmem:[#allocation114_spill] sm:$0xff] }
 0x7c4   : > { %14013 = vst [vmem:[#allocation115_spill] sm:$0xff] %v12933_v11  ;;  %14014 = vst [vmem:[#allocation116_spill] sm:$0xff] %v12935_v58 }
 0x7c5   : > { %v7759_v51 = vpop.f32.mrf.mxu0  ;;  %v12937_v25 = vpop.f32.mrf.mxu1 }
 0x7c6   : > { %14015 = vst [vmem:[#allocation14_spill] sm:$0xff] %v12937_v25  ;;  %v7120_v25 = vadd.f32 %v7119_v2, %v12869_v14  ;;  %v7760_v58 = vadd.f32 %v7759_v51, %v7658_v36  ;;  %v7232_v36 = vadd.f32 %v12889_v29, %v7128_v9  ;;  %v14022_v9 = vld [vmem:[#allocation38_spill] sm:$0xff]  ;;  %v14026_v51 = vld [vmem:[#allocation31_spill] sm:$0xff] }
 0x7c7   : > { %v7761_v44 = vpop.f32.mrf.mxu0  ;;  %v12939_v43 = vpop.f32.mrf.mxu1 }
 0x7c8   : > { %14016 = vst [vmem:[#allocation36_spill] sm:$0xff] %v12939_v43  ;;  %v7660_v43 = vadd.f32 %v7659_v40, %v7534_v18  ;;  %v7223_v2 = vadd.f32 %v12883_v10, %v7120_v25  ;;  %v14027_v25 = vld [vmem:[#allocation101_spill] sm:$0xff] }
 0x7c9   : > { %v7767_v12 = vpop.f32.mrf.mxu0  ;;  %v12941_v33 = vpop.f32.mrf.mxu1 }
 0x7ca   : > { %14017 = vst [vmem:[#allocation16_spill] sm:$0xff] %v12941_v33  ;;  %v7126_v33 = vadd.f32 %v7125_v15, %v12873_v61  ;;  %v7762_v20 = vadd.f32 %v7761_v44, %v7660_v43  ;;  %v7325_v15 = vadd.f32 %v7324_v53, %v7214_v37  ;;  %v7768_v56 = vadd.f32 %v7767_v12, %v7665_v48 }
 0x7cb   : > { %v7769_v24 = vpop.f32.mrf.mxu0  ;;  %v12943_v63 = vpop.f32.mrf.mxu1  ;;  %v7332_v35 = vadd.f32 %v12913_v19, %v7223_v2  ;;  %v14023_v55 = vld [vmem:[#allocation115_spill] sm:$0xff]  ;;  %v7339_v44 = vadd.f32 %v14027_v25, %v7232_v36 }
 0x7cc   : > { %14018 = vst [vmem:[#allocation128_spill] sm:$0xff] %v12943_v63  ;;  %v7212_v63 = vadd.f32 %v12871_v52, %v7110_v39  ;;  %v7862_v52 = vadd.f32 %v7861_v47, %v7760_v58  ;;  %v7330_v39 = vadd.f32 %v12909_v38, %v7221_v8  ;;  %v7230_v0 = vadd.f32 %v12887_v27, %v7126_v33 }
 0x7cd   : > { %v7775_v17 = vpop.f32.mrf.mxu0  ;;  %v8069_v31 = vpop.f32.mrf.mxu1  ;;  %v7770_v10 = vadd.f32 %v7769_v24, %v7667_v23  ;;  %v7674_v38 = vadd.f32 %v7673_v60, %v7556_v13  ;;  %v7422_v33 = vadd.f32 %v12897_v5, %v7325_v15  ;;  %v7871_v3 = vadd.f32 %v7870_v7, %v7768_v56  ;;  %v14019_v24 = vld [vmem:[#allocation64_spill] sm:$0xff]  ;;  %v14025_v19 = vld [vmem:[#allocation14_spill] sm:$0xff] }
 0x7ce   : > { %v7323_v14 = vadd.f32 %v7322_v4, %v7212_v63  ;;  %v7864_v4 = vadd.f32 %v7863_v59, %v7762_v20  ;;  %v7239_v63 = vadd.f32 %v12891_v62, %v7134_v6  ;;  %v7776_v12 = vadd.f32 %v7775_v17, %v7672_v46  ;;  %v14021_v5 = vld [vmem:[#allocation116_spill] sm:$0xff] }
 0x7cf   : > { %v7777_v11 = vpop.f32.mrf.mxu0  ;;  %v8071_v42 = vpop.f32.mrf.mxu1  ;;  %v7427_v21 = vadd.f32 %v12901_v49, %v7330_v39  ;;  %v7873_v54 = vadd.f32 %v14021_v5, %v7770_v10  ;;  %v7681_v45 = vadd.f32 %v14024_v16, %v14023_v55  ;;  %v9360_v59 = vld [vmem:[%s9987_s25] sm:$0xff]  ;;  %v14031_v39 = vld [vmem:[#allocation23_spill] sm:$0xff]  ;;  %v9362_v10 = vld [vmem:[%s9987_s25 + $0x10] sm:$0xff] }
 0x7d0   : > { %v7420_v53 = vadd.f32 %v12895_v34, %v7323_v14  ;;  %v7679_v34 = vadd.f32 %v14020_v1, %v14019_v24  ;;  %v7778_v50 = vadd.f32 %v7777_v11, %v7674_v38  ;;  %v7880_v13 = vadd.f32 %v14025_v19, %v7776_v12  ;;  %v14028_v6 = vld [vmem:[#allocation36_spill] sm:$0xff]  ;;  %v14033_v38 = vld [vmem:[#allocation27_spill] sm:$0xff]  ;;  %v9365_v55 = vld [vmem:[%s9987_s25 + $0x28] sm:$0xff] }
 0x7d1   : > { %v7783_v26 = vpop.f32.mrf.mxu0  ;;  %v8076_v41 = vpop.f32.mrf.mxu1  ;;  %v14029_v23 = vld [vmem:[#allocation24_spill] sm:$0xff]  ;;  %v7436_v12 = vadd.f32 %v14033_v38, %v7339_v44 }
 0x7d2   : > { %v7784_v47 = vadd.f32 %v7783_v26, %v7679_v34  ;;  %v7882_v14 = vadd.f32 %v14028_v6, %v7778_v50  ;;  %v9361_v26 = vld [vmem:[%s9987_s25 + $0x8] sm:$0xff]  ;;  %v14032_v46 = vld [vmem:[#allocation16_spill] sm:$0xff] }
 0x7d3   : > { %v7785_v61 = vpop.f32.mrf.mxu0  ;;  %v8078_v32 = vpop.f32.mrf.mxu1  ;;  %v14036_v34 = vld [vmem:[#allocation12_spill] sm:$0xff] }
 0x7d4   : > { %v7786_v43 = vadd.f32 %v7785_v61, %v7681_v45 }
 0x7d5   : > { %v7972_v30 = vpop.f32.mrf.mxu0  ;;  %v8083_v62 = vpop.f32.mrf.mxu1 }
 0x7d6   : > { %v7973_v57 = vadd.f32 %v7972_v30, %v7862_v52  ;;  %v14030_v52 = vld [vmem:[#allocation107_spill] sm:$0xff]  ;;  %v7889_v30 = vadd.f32 %v14032_v46, %v7784_v47 }
 0x7d7   : > { %v7974_v27 = vpop.f32.mrf.mxu0  ;;  %v8085_v48 = vpop.f32.mrf.mxu1  ;;  %v7344_v61 = vadd.f32 %v14030_v52, %v7239_v63 }
 0x7d8   : > { %v8070_v29 = vadd.f32 %v8069_v31, %v7973_v57  ;;  %v7975_v40 = vadd.f32 %v7974_v27, %v7864_v4  ;;  %v7337_v31 = vadd.f32 %v14022_v9, %v7230_v0  ;;  %v7241_v0 = vadd.f32 %v14031_v39, %v7136_v28  ;;  %v14034_v27 = vld [vmem:[#allocation113_spill] sm:$0xff]  ;;  %v9363_v28 = vld [vmem:[%s9987_s25 + $0x18] sm:$0xff]  ;;  %v14037_v9 = vld [vmem:[#allocation34_spill] sm:$0xff] }
 0x7d9   : > { %v7979_v22 = vpop.f32.mrf.mxu0  ;;  %v7441_v50 = vadd.f32 %v14036_v34, %v7344_v61 }
 0x7da   : > { %v8095_v17 = vmul.f32 %v8070_v29, %v7420_v53  ;;  %v8072_v18 = vadd.f32 %v8071_v42, %v7975_v40  ;;  %v7980_v60 = vadd.f32 %v7979_v22, %v7871_v3  ;;  %v7429_v42 = vadd.f32 %v14026_v51, %v7332_v35  ;;  %v8090_v29 = vpop.f32.mrf.mxu1  ;;  %v14035_v40 = vld [vmem:[#allocation128_spill] sm:$0xff] }
 0x7db   : > { %v7981_v49 = vpop.f32.mrf.mxu0  ;;  %v7434_v56 = vadd.f32 %v14029_v23, %v7337_v31  ;;  %v7891_v3 = vadd.f32 %v14035_v40, %v7786_v43  ;;  %v9364_v22 = vld [vmem:[%s9987_s25 + $0x20] sm:$0xff] }
 0x7dc   : > { %v8103_v37 = vmul.f32 %v9360_v59, %v8095_v17  ;;  %v8096_v7 = vmul.f32 %v8072_v18, %v7422_v33  ;;  %v8077_v11 = vadd.f32 %v8076_v41, %v7980_v60  ;;  %v7982_v58 = vadd.f32 %v7981_v49, %v7873_v54  ;;  %v8092_v54 = vpop.f32.mrf.mxu1  ;;  %v9366_v49 = vld [vmem:[%s9987_s25 + $0x30] sm:$0xff]  ;;  %v9367_v59 = vld [vmem:[%s9987_s25 + $0x38] sm:$0xff] }
 0x7dd   : > { %v7986_v20 = vpop.f32.mrf.mxu0  ;;  %v7346_v33 = vadd.f32 %v14034_v27, %v7241_v0 }
 0x7de   : > { %8111 = vst [vmem:[%s12981_s27] sm:$0xff] %v8103_v37  ;;  %v8104_v8 = vmul.f32 %v9361_v26, %v8096_v7  ;;  %v8097_v2 = vmul.f32 %v8077_v11, %v7427_v21  ;;  %v8079_v41 = vadd.f32 %v8078_v32, %v7982_v58  ;;  %v7987_v15 = vadd.f32 %v7986_v20, %v7880_v13 }
 0x7df   : > { %v7988_v36 = vpop.f32.mrf.mxu0  ;;  %v7443_v31 = vadd.f32 %v14037_v9, %v7346_v33 }
 0x7e0   : > { %8112 = vst [vmem:[%s12981_s27 + $0x8] sm:$0xff] %v8104_v8  ;;  %v8105_v57 = vmul.f32 %v9362_v10, %v8097_v2  ;;  %v8098_v4 = vmul.f32 %v8079_v41, %v7429_v42  ;;  %v8084_v53 = vadd.f32 %v8083_v62, %v7987_v15  ;;  %v7989_v32 = vadd.f32 %v7988_v36, %v7882_v14 }
 0x7e1   : > { %v7993_v63 = vpop.f32.mrf.mxu0 }
 0x7e2   : > { %8113 = vst [vmem:[%s12981_s27 + $0x10] sm:$0xff] %v8105_v57  ;;  %v8106_v21 = vmul.f32 %v9363_v28, %v8098_v4  ;;  %v8099_v35 = vmul.f32 %v8084_v53, %v7434_v56  ;;  %v8086_v24 = vadd.f32 %v8085_v48, %v7989_v32  ;;  %v7994_v1 = vadd.f32 %v7993_v63, %v7889_v30 }
 0x7e3   : > { %v7995_v62 = vpop.f32.mrf.mxu0 }
 0x7e4   : > { %8114 = vst [vmem:[%s12981_s27 + $0x18] sm:$0xff] %v8106_v21  ;;  %v8107_v17 = vmul.f32 %v9364_v22, %v8099_v35  ;;  %v8100_v18 = vmul.f32 %v8086_v24, %v7436_v12  ;;  %v8091_v60 = vadd.f32 %v8090_v29, %v7994_v1  ;;  %v7996_v5 = vadd.f32 %v7995_v62, %v7891_v3 }
 0x7e6   : > { %8115 = vst [vmem:[%s12981_s27 + $0x20] sm:$0xff] %v8107_v17  ;;  %v8108_v16 = vmul.f32 %v9365_v55, %v8100_v18  ;;  %v8101_v45 = vmul.f32 %v8091_v60, %v7441_v50  ;;  %v8093_v47 = vadd.f32 %v8092_v54, %v7996_v5 }
 0x7e8   : > { %8116 = vst [vmem:[%s12981_s27 + $0x28] sm:$0xff] %v8108_v16  ;;  %v8109_v19 = vmul.f32 %v9366_v49, %v8101_v45  ;;  %v8102_v13 = vmul.f32 %v8093_v47, %v7443_v31 }
 0x7ea   : > { %8117 = vst [vmem:[%s12981_s27 + $0x30] sm:$0xff] %v8109_v19  ;;  %v8110_v37 = vmul.f32 %v9367_v59, %v8102_v13 }
 0x7ec   : > { %8118 = vst [vmem:[%s12981_s27 + $0x38] sm:$0xff] %v8110_v37 }
 0x7ed   : > { %9407 = shalt.err (!%p9404_p0)
}
 0x7ee   : > { %s9408_s25 = scalar_lea.hbm %s13009_s29, 1024  ;;  %s9412_s17 = scalar_lea.hbm %s13068_s9, 2048 }
 0x7ef   : > { %p9409_p1 = scmp.ne.s32.totalorder %s13009_s29, %s9408_s25  ;;  %p9413_p4 = scmp.lt.s32.totalorder %s13009_s29, %s13068_s9 }
 0x7f0   : > { %p9414_p7 = scmp.lt.s32.totalorder %s9412_s17, %s9408_s25 }
 0x7f1   : > { %p9410_p2 = pnand %p9409_p1, %p9563_p5 }
 0x7f2   : > { %p9415_p6 = por %p9414_p7, %p9413_p4 }
 0x7f3   : > { %p9411_p3 = pneg %p9410_p2 }
 0x7f5   : > { %p9416_p8 = pnand %p9415_p6, %p9411_p3 }
 0x7f7   : > { %9419 = shalt.err (!%p9416_p8)
}
 0x7f8   : > { %s9474_s21 = smov 256  }
 0x7f9   : > { %9251 = dma.vmem_to_hbm [thread:$0]  (%p9563_p5), %s13013_s14, 1024, %s13009_s29, %s13018_s13, %s9474_s21, %s9474_s21, %s9466_s22  }
 0x7fa PF: > { %p9263_p9 = scmp.ge.s32.totalorder %s9458_s12, 2  ;;  %s8149_s28 = sand.u32 1, %s9446_s30  }
 0x7fb   : > { %p14038_p10 = scmp.ne.s32.totalorder %s13379_s20, 0  ;;  %s8150_s16 = scalar_lea.sflag [#allocation4], %s8149_s28 }
 0x7fd   : > { %p9258_p11 = pnand %p9263_p9, %p14038_p10 }
 0x7ff   : > { %p9259_p12 = pneg %p9258_p11 }
 0x801   : > { %9441 = dma.done.wait (%p9259_p12), %s8150_s16, 1024  }
 0x802   : > { %9443 = vsyncadd (%p9259_p12), %s8150_s16, 4294966272  ;;  %p20_p13 = scmp.ge.s32.totalorder %s9550_s15, 4   ;;  %s14039_s30 = smov %s9450_s10 }
 0x803   : > { %s14040_s10 = smov %s9454_s11  ;;  %s14041_s11 = smov %s9561_s18 }
 0x804   : > { %s14042_s12 = smov %s9550_s15  ;;  %22 = sbr.rel (!%p20_p13) target bundleno = 4 (0x4), region = 96 }
 0x809   :  { %8155 = vsyncpa [#allocation3], 1 }
 0x80a   :  { %8157 = vsyncpa [#allocation3 + $0x1], 1 }
 0x80b   :  { %8158 = vsyncpa [#allocation4], 1 }
 0x80c   :  { %8160 = vsyncpa [#allocation4 + $0x1], 1 }

</bundles_post_ra>
